<compile_context>
chip_gen: v7x
topology: tpu7x:2x2x1
jax: 0.10.0
libtpu: 0.0.40
codegen_flags: <defaults>
</compile_context>

<pallas_src>
import jax
import jax.numpy as jnp
from jax import lax
from jax.experimental import pallas as pl
from jax.experimental.pallas import tpu as pltpu


def _round_up(v, m):
    return ((v + m - 1) // m) * m


def _ceil_div(a, b):
    return -(-a // b)


# ---------------------------------------------------------------------------
# Kernel: k-hot MXU gather.
# ---------------------------------------------------------------------------
def _onehot_gather_kernel(idx_ref, w_ref, o_ref):
    # idx_ref: (t_rows, k) int32 lookup ids for this tile
    # w_ref:   (k*vocab_pad, lane) block-diagonal replicated table (resident)
    # o_ref:   (t_rows, lane) -- k packed embeddings per 128-lane output row
    t_rows, k = idx_ref.shape
    kv, _ = w_ref.shape
    vocab_pad = kv // k

    col = lax.broadcasted_iota(jnp.int32, (t_rows, kv), 1)
    idx = idx_ref[...]

    # k-hot matrix: row r has a single 1.0 in segment j at column
    # j*vocab_pad + idx[r, j].  Segments are disjoint so summing the k
    # per-segment one-hots is exact.  k is a small static int (<= 128/embed_dim)
    # so this Python loop fully unrolls into k VPU compare+add passes.
    hot = jnp.zeros((t_rows, kv), dtype=jnp.float32)
    for j in range(k):
        hot = hot + (col == (idx[:, j:j + 1] + j * vocab_pad)).astype(jnp.float32)

    o_ref[...] = jnp.dot(
        hot, w_ref[...].astype(jnp.float32),
        precision=lax.Precision.HIGHEST,          # exact 1.0 * w row copy
        preferred_element_type=jnp.float32,
    ).astype(o_ref.dtype)


# ---------------------------------------------------------------------------
# One-time table preparation (hoisted out of the forward path).
# ---------------------------------------------------------------------------
def prepare_embedding_table(weight):
    vocab, embed_dim = weight.shape
    if embed_dim % 128 == 0:
        k, lane = 1, embed_dim                    # already lane-dense
    elif 128 % embed_dim == 0:
        k, lane = 128 // embed_dim, 128           # pack k lookups per output row
    else:
        # TODO(synk): generalize block-diagonal packing to embed_dims that
        # neither divide nor are multiples of 128; this path writes padded
        # columns that the wrapper slices off.
        k, lane = 1, _round_up(embed_dim, 128)
    vocab_pad = _round_up(vocab, 128)
    table = jnp.zeros((k * vocab_pad, lane), dtype=weight.dtype)
    for j in range(k):
        table = table.at[j * vocab_pad:j * vocab_pad + vocab,
                         j * embed_dim:(j + 1) * embed_dim].set(weight)
    return table, k, vocab_pad, lane


# ---------------------------------------------------------------------------
# Forward pass.
# ---------------------------------------------------------------------------
def embedding_lookup(x, table, *, embed_dim, k, vocab_pad, lane,
                     tile_lookups=2048):
    out_dtype = table.dtype
    kv = k * vocab_pad

    flat = x.reshape(-1).astype(jnp.int32)
    n = flat.shape[0]

    # ---- static tiling decisions -------------------------------------------
    rows_needed = max(8, _round_up(_ceil_div(n, k), 8))
    t_rows = min(max(_round_up(tile_lookups // k, 8), 8), rows_needed)
    # keep the (t_rows, k*vocab_pad) f32 one-hot under ~2 MiB
    onehot_cap = max(8, (((2 << 20) // (kv * 4)) // 8) * 8)
    t_rows = min(t_rows, onehot_cap)
    # v7x: keep >= 2 grid steps when there is enough work to split across TCs.
    if rows_needed > 128:
        t_rows = min(t_rows, _round_up(_ceil_div(rows_needed, 2), 8))
    num_tiles = _ceil_div(rows_needed, t_rows)
    n_rows_pad = num_tiles * t_rows
    n_lookups_pad = n_rows_pad * k

    # ---- VMEM budget / guard -------------------------------------------------
    itemsize = jnp.dtype(out_dtype).itemsize
    table_bytes = kv * lane * itemsize
    tile_bytes = 2 * (t_rows * k * 4) + 2 * (t_rows * lane * itemsize)
    scratch_bytes = 2 * (t_rows * kv * 4) + (t_rows * lane * 4)
    needed = table_bytes + tile_bytes + scratch_bytes + (2 << 20)
    try:
        budget = int(pltpu.get_tpu_info().vmem_capacity_bytes * 0.9)
    except Exception:
        budget = int((64 << 20) * 0.9)            # conservative: v7x per-core VMEM
    if needed > budget:
        # TODO(synk): manual-DMA row-gather fallback for non-resident tables.
        raise NotImplementedError(
            f"embedding table needs ~{needed >> 20} MiB VMEM, budget "
            f"{budget >> 20} MiB; DMA-gather fallback not implemented")
    # headroom for a second table buffer in case the single-buffer hint is ignored
    vmem_limit = int(min(budget, max(needed + table_bytes, 32 << 20)))

    # ---- pad + reshape indices (padded slots read row 0, dropped below) -----
    flat = jnp.pad(flat, (0, n_lookups_pad - n))
    idx2d = flat.reshape(n_rows_pad, k)

    def build(table_spec):
        return pl.pallas_call(
            _onehot_gather_kernel,
            out_shape=jax.ShapeDtypeStruct((n_rows_pad, lane), out_dtype),
            grid=(num_tiles,),
            in_specs=[pl.BlockSpec((t_rows, k), lambda i: (i, 0)), table_spec],
            out_specs=pl.BlockSpec((t_rows, lane), lambda i: (i, 0)),
            compiler_params=pltpu.CompilerParams(
                dimension_semantics=("parallel",),
                vmem_limit_bytes=vmem_limit),
        )

    # Constant index_map -> table is DMA'd into VMEM once and stays resident
    # across all grid steps.  Request a single buffer (default double-buffering
    # only wastes VMEM); fall back if this jax version rejects pipeline_mode.
    try:
        resident = pl.BlockSpec((kv, lane), lambda i: (0, 0),
                                pipeline_mode=pl.Buffered(1))
        out_pad = build(resident)(idx2d, table)
    except Exception:
        resident = pl.BlockSpec((kv, lane), lambda i: (0, 0))
        out_pad = build(resident)(idx2d, table)

    # ---- unpack ---------------------------------------------------------------
    if k * embed_dim == lane:
        # packed rows: contiguous reshape then drop padded lookups (no column waste)
        out = out_pad.reshape(n_rows_pad * k, embed_dim)[:n]
    else:
        out = out_pad[:n, :embed_dim]             # padded-column fallback path
    return out.reshape(x.shape + (embed_dim,))


class FeaturesEmbedding:
    """JAX/Pallas port of the torch FeaturesEmbedding module."""

    def __init__(self, field_dims, embed_dim, key, dtype=jnp.float32,
                 tile_lookups=2048):
        vocab = int(sum(field_dims))
        self.vocab = vocab
        self.embed_dim = int(embed_dim)
        self.weight = xavier_uniform(key, (vocab, embed_dim), dtype)
        # One-time prep (padding + block-diagonal replication) hoisted out of
        # the forward path so forward never re-pads the full table.
        self.table, self.k, self.vocab_pad, self.lane = \
            prepare_embedding_table(self.weight)
        self.tile_lookups = tile_lookups

    def __call__(self, x):
        return embedding_lookup(
            x, self.table, embed_dim=self.embed_dim, k=self.k,
            vocab_pad=self.vocab_pad, lane=self.lane,
            tile_lookups=self.tile_lookups)


def xavier_uniform(key, shape, dtype=jnp.float32):
    # Matches torch.nn.init.xavier_uniform_ for a 2-D weight.
    fan_in, fan_out = shape
    bound = (6.0 / (fan_in + fan_out)) ** 0.5
    return jax.random.uniform(key, shape, dtype, minval=-bound, maxval=bound)


if __name__ == "__main__":
    key = jax.random.PRNGKey(0)
    k_w, k_x = jax.random.split(key)

    # Small shapes consistent with the module: vocab = sum(field_dims).
    field_dims = (10, 20, 30)
    embed_dim = 32
    batch = 2
    num_fields = len(field_dims)
    vocab = sum(field_dims)

    emb = FeaturesEmbedding(field_dims, embed_dim, k_w)
    x = jax.random.randint(k_x, (batch, num_fields), 0, vocab, dtype=jnp.int32)

    out = emb(x)
    out = jax.block_until_ready(out)

    # Reference check against plain-JAX gather (== torch embedding lookup).
    ref = jnp.take(emb.weight, x.reshape(-1), axis=0).reshape(
        batch, num_fields, embed_dim)
    assert out.shape == (batch, num_fields, embed_dim)
    assert out.dtype == emb.weight.dtype
    assert jnp.allclose(out, ref)

    print("KERNEL_OK")
</pallas_src>

<mosaic_0001>
module attributes {stable_mosaic.version = 11 : i64} {
  func.func @_onehot_gather_kernel(%arg0: i32, %arg1: memref<8x4xi32, #tpu.memory_space<vmem>>, %arg2: memref<512x128xf32, #tpu.memory_space<vmem>>, %arg3: memref<8x128xf32, #tpu.memory_space<vmem>>) attributes {dimension_semantics = [#tpu.dimension_semantics<parallel>], iteration_bounds = array<i64: 1>, scalar_prefetch = 0 : i64, scratch_operands = 0 : i64, tpu.core_type = #tpu.core_type<tc>, window_params = [{transform_indices = @transform_0, window_bounds = array<i64: 8, 4>}, {pipeline_mode = #tpu.pipeline_mode<synchronous>, transform_indices = @transform_1, window_bounds = array<i64: 512, 128>}, {transform_indices = @transform_2, window_bounds = array<i64: 8, 128>}]} {
    %0 = tpu.iota {dimensions = array<i32: 1>} : vector<8x512xi32>
    %c0 = arith.constant 0 : index
    %c0_0 = arith.constant 0 : index
    %1 = vector.load %arg1[%c0, %c0_0] : memref<8x4xi32, #tpu.memory_space<vmem>>, vector<8x4xi32>
    %cst = arith.constant 0.000000e+00 : f32
    %2 = vector.broadcast %cst : f32 to vector<8x512xf32>
    %3 = vector.extract_strided_slice %1 {offsets = [0, 0], sizes = [8, 1], strides = [1, 1]} : vector<8x4xi32> to vector<8x1xi32>
    %c0_i32 = arith.constant 0 : i32
    %4 = vector.broadcast %c0_i32 : i32 to vector<8x1xi32>
    %5 = arith.addi %3, %4 : vector<8x1xi32>
    %6 = vector.broadcast %5 : vector<8x1xi32> to vector<8x512xi32>
    %7 = arith.cmpi eq, %0, %6 : vector<8x512xi32>
    %8 = arith.extui %7 : vector<8x512xi1> to vector<8x512xi32>
    %9 = arith.sitofp %8 : vector<8x512xi32> to vector<8x512xf32>
    %10 = arith.addf %2, %9 : vector<8x512xf32>
    %11 = vector.extract_strided_slice %1 {offsets = [0, 1], sizes = [8, 1], strides = [1, 1]} : vector<8x4xi32> to vector<8x1xi32>
    %c128_i32 = arith.constant 128 : i32
    %12 = vector.broadcast %c128_i32 : i32 to vector<8x1xi32>
    %13 = arith.addi %11, %12 : vector<8x1xi32>
    %14 = vector.broadcast %13 : vector<8x1xi32> to vector<8x512xi32>
    %15 = arith.cmpi eq, %0, %14 : vector<8x512xi32>
    %16 = arith.extui %15 : vector<8x512xi1> to vector<8x512xi32>
    %17 = arith.sitofp %16 : vector<8x512xi32> to vector<8x512xf32>
    %18 = arith.addf %10, %17 : vector<8x512xf32>
    %19 = vector.extract_strided_slice %1 {offsets = [0, 2], sizes = [8, 1], strides = [1, 1]} : vector<8x4xi32> to vector<8x1xi32>
    %c256_i32 = arith.constant 256 : i32
    %20 = vector.broadcast %c256_i32 : i32 to vector<8x1xi32>
    %21 = arith.addi %19, %20 : vector<8x1xi32>
    %22 = vector.broadcast %21 : vector<8x1xi32> to vector<8x512xi32>
    %23 = arith.cmpi eq, %0, %22 : vector<8x512xi32>
    %24 = arith.extui %23 : vector<8x512xi1> to vector<8x512xi32>
    %25 = arith.sitofp %24 : vector<8x512xi32> to vector<8x512xf32>
    %26 = arith.addf %18, %25 : vector<8x512xf32>
    %27 = vector.extract_strided_slice %1 {offsets = [0, 3], sizes = [8, 1], strides = [1, 1]} : vector<8x4xi32> to vector<8x1xi32>
    %c384_i32 = arith.constant 384 : i32
    %28 = vector.broadcast %c384_i32 : i32 to vector<8x1xi32>
    %29 = arith.addi %27, %28 : vector<8x1xi32>
    %30 = vector.broadcast %29 : vector<8x1xi32> to vector<8x512xi32>
    %31 = arith.cmpi eq, %0, %30 : vector<8x512xi32>
    %32 = arith.extui %31 : vector<8x512xi1> to vector<8x512xi32>
    %33 = arith.sitofp %32 : vector<8x512xi32> to vector<8x512xf32>
    %34 = arith.addf %26, %33 : vector<8x512xf32>
    %c0_1 = arith.constant 0 : index
    %c0_2 = arith.constant 0 : index
    %35 = vector.load %arg2[%c0_1, %c0_2] : memref<512x128xf32, #tpu.memory_space<vmem>>, vector<512x128xf32>
    %cst_3 = arith.constant dense<0.000000e+00> : vector<8x128xf32>
    %36 = tpu.matmul %34, %35, %cst_3 {dimension_numbers = #tpu.dot_dimension_numbers<[1], [0], [0], [1], [0, 0, 1, 1], [], []>, precision = #tpu.contract_precision<fp32>} : vector<8x512xf32>, vector<512x128xf32>, vector<8x128xf32> -> vector<8x128xf32>
    %c0_4 = arith.constant 0 : index
    %c0_5 = arith.constant 0 : index
    %37 = vector.load %arg3[%c0_4, %c0_5] : memref<8x128xf32, #tpu.memory_space<vmem>>, vector<8x128xf32>
    tpu.vector_store %arg3[%c0_4, %c0_5], %36 {strides = array<i32>} : memref<8x128xf32, #tpu.memory_space<vmem>>, vector<8x128xf32>,
    return
  }
  func.func @transform_0(%arg0: i32) -> (i32, i32) {
    %c0_i32 = arith.constant 0 : i32
    %c0_i32_0 = arith.constant 0 : i32
    return %arg0, %c0_i32 : i32, i32
  }
  func.func @transform_1(%arg0: i32) -> (i32, i32) {
    %c0_i32 = arith.constant 0 : i32
    %c0_i32_0 = arith.constant 0 : i32
    %c0_i32_1 = arith.constant 0 : i32
    return %c0_i32, %c0_i32_0 : i32, i32
  }
  func.func @transform_2(%arg0: i32) -> (i32, i32) {
    %c0_i32 = arith.constant 0 : i32
    %c0_i32_0 = arith.constant 0 : i32
    return %arg0, %c0_i32 : i32, i32
  }
}

module attributes {stable_mosaic.version = 11 : i64} {
  func.func @_onehot_gather_kernel(%arg0: i32, %arg1: memref<8x4xi32, #tpu.memory_space<vmem>>, %arg2: memref<512x128xf32, #tpu.memory_space<vmem>>, %arg3: memref<8x128xf32, #tpu.memory_space<vmem>>) attributes {dimension_semantics = [#tpu.dimension_semantics<parallel>], iteration_bounds = array<i64: 1>, scalar_prefetch = 0 : i64, scratch_operands = 0 : i64, tpu.core_type = #tpu.core_type<tc>, window_params = [{transform_indices = @transform_0, window_bounds = array<i64: 8, 4>}, {pipeline_mode = #tpu.pipeline_mode<synchronous>, transform_indices = @transform_1, window_bounds = array<i64: 512, 128>}, {transform_indices = @transform_2, window_bounds = array<i64: 8, 128>}]} {
    %0 = tpu.iota {dimensions = array<i32: 1>} : vector<8x512xi32>
    %c0 = arith.constant 0 : index
    %c0_0 = arith.constant 0 : index
    %1 = vector.load %arg1[%c0, %c0_0] : memref<8x4xi32, #tpu.memory_space<vmem>>, vector<8x4xi32>
    %cst = arith.constant 0.000000e+00 : f32
    %2 = vector.broadcast %cst : f32 to vector<8x512xf32>
    %3 = vector.extract_strided_slice %1 {offsets = [0, 0], sizes = [8, 1], strides = [1, 1]} : vector<8x4xi32> to vector<8x1xi32>
    %c0_i32 = arith.constant 0 : i32
    %4 = vector.broadcast %c0_i32 : i32 to vector<8x1xi32>
    %5 = arith.addi %3, %4 : vector<8x1xi32>
    %6 = vector.broadcast %5 : vector<8x1xi32> to vector<8x512xi32>
    %7 = arith.cmpi eq, %0, %6 : vector<8x512xi32>
    %8 = arith.extui %7 : vector<8x512xi1> to vector<8x512xi32>
    %9 = arith.sitofp %8 : vector<8x512xi32> to vector<8x512xf32>
    %10 = arith.addf %2, %9 : vector<8x512xf32>
    %11 = vector.extract_strided_slice %1 {offsets = [0, 1], sizes = [8, 1], strides = [1, 1]} : vector<8x4xi32> to vector<8x1xi32>
    %c128_i32 = arith.constant 128 : i32
    %12 = vector.broadcast %c128_i32 : i32 to vector<8x1xi32>
    %13 = arith.addi %11, %12 : vector<8x1xi32>
    %14 = vector.broadcast %13 : vector<8x1xi32> to vector<8x512xi32>
    %15 = arith.cmpi eq, %0, %14 : vector<8x512xi32>
    %16 = arith.extui %15 : vector<8x512xi1> to vector<8x512xi32>
    %17 = arith.sitofp %16 : vector<8x512xi32> to vector<8x512xf32>
    %18 = arith.addf %10, %17 : vector<8x512xf32>
    %19 = vector.extract_strided_slice %1 {offsets = [0, 2], sizes = [8, 1], strides = [1, 1]} : vector<8x4xi32> to vector<8x1xi32>
    %c256_i32 = arith.constant 256 : i32
    %20 = vector.broadcast %c256_i32 : i32 to vector<8x1xi32>
    %21 = arith.addi %19, %20 : vector<8x1xi32>
    %22 = vector.broadcast %21 : vector<8x1xi32> to vector<8x512xi32>
    %23 = arith.cmpi eq, %0, %22 : vector<8x512xi32>
    %24 = arith.extui %23 : vector<8x512xi1> to vector<8x512xi32>
    %25 = arith.sitofp %24 : vector<8x512xi32> to vector<8x512xf32>
    %26 = arith.addf %18, %25 : vector<8x512xf32>
    %27 = vector.extract_strided_slice %1 {offsets = [0, 3], sizes = [8, 1], strides = [1, 1]} : vector<8x4xi32> to vector<8x1xi32>
    %c384_i32 = arith.constant 384 : i32
    %28 = vector.broadcast %c384_i32 : i32 to vector<8x1xi32>
    %29 = arith.addi %27, %28 : vector<8x1xi32>
    %30 = vector.broadcast %29 : vector<8x1xi32> to vector<8x512xi32>
    %31 = arith.cmpi eq, %0, %30 : vector<8x512xi32>
    %32 = arith.extui %31 : vector<8x512xi1> to vector<8x512xi32>
    %33 = arith.sitofp %32 : vector<8x512xi32> to vector<8x512xf32>
    %34 = arith.addf %26, %33 : vector<8x512xf32>
    %c0_1 = arith.constant 0 : index
    %c0_2 = arith.constant 0 : index
    %35 = vector.load %arg2[%c0_1, %c0_2] : memref<512x128xf32, #tpu.memory_space<vmem>>, vector<512x128xf32>
    %cst_3 = arith.constant dense<0.000000e+00> : vector<8x128xf32>
    %36 = tpu.matmul %34, %35, %cst_3 {dimension_numbers = #tpu.dot_dimension_numbers<[1], [0], [0], [1], [0, 0, 1, 1], [], []>, precision = #tpu.contract_precision<fp32>} : vector<8x512xf32>, vector<512x128xf32>, vector<8x128xf32> -> vector<8x128xf32>
    %c0_4 = arith.constant 0 : index
    %c0_5 = arith.constant 0 : index
    %37 = vector.load %arg3[%c0_4, %c0_5] : memref<8x128xf32, #tpu.memory_space<vmem>>, vector<8x128xf32>
    tpu.vector_store %arg3[%c0_4, %c0_5], %36 {strides = array<i32>} : memref<8x128xf32, #tpu.memory_space<vmem>>, vector<8x128xf32>,
    return
  }
  func.func @transform_0(%arg0: i32) -> (i32, i32) {
    %c0_i32 = arith.constant 0 : i32
    %c0_i32_0 = arith.constant 0 : i32
    return %arg0, %c0_i32 : i32, i32
  }
  func.func @transform_1(%arg0: i32) -> (i32, i32) {
    %c0_i32 = arith.constant 0 : i32
    %c0_i32_0 = arith.constant 0 : i32
    %c0_i32_1 = arith.constant 0 : i32
    return %c0_i32, %c0_i32_0 : i32, i32
  }
  func.func @transform_2(%arg0: i32) -> (i32, i32) {
    %c0_i32 = arith.constant 0 : i32
    %c0_i32_0 = arith.constant 0 : i32
    return %arg0, %c0_i32 : i32, i32
  }
}

</mosaic_0001>

<bundles_post_ra>
// kernel: tpu_custom_call.1
= control target key start
LH: loop header
LB: loop body
LE: loop exit
PB: predicated region body
PF: predicated region fallthrough
CT: control target
= control target key end

     0   :  { %7 = vsyncpa [#allocation3], 0  ;;  %s4129_s0 = inlined_call_operand.vmem [shape: s32[8,4], index: 0, kind: input, shape index: {}]   ;;  %s4130_s1 = inlined_call_operand.hbm [shape: f32[512,128], index: 1, kind: input, shape index: {}]   ;;  %s4131_s2 = inlined_call_operand.hbm [shape: f32[8,128], index: 2, kind: output, shape index: {}]  }
   0x1   :  { %8 = vsyncpa [#allocation4], 0  ;;  %s2797_s9 = smov [#allocation2]   ;;  %s2749_s13 = scalar_lea.hbm %s4130_s1, 8192 }
   0x2   :  { %s16_s10 = sshll.u32 %s2797_s9, 4  ;;  %p2750_p0 = scmp.ne.s32.totalorder %s4130_s1, %s2749_s13  ;;  %s17_s10 = int_to_ptr.vmem [resolvable:$true] %s16_s10 }
   0x3   :  { %p2753_p1 = scmp.lt.u32.totalorder %s2749_s13, %s4130_s1 }
   0x5   :  { %p2755_p2 = pnand %p2753_p1, %p2750_p0 }
   0x7   :  { %2758 = shalt.err (!%p2755_p2)
}
   0x8   :  { %s2759_s18 = scalar_lea.vmem %s17_s10, 8192  ;;  %p2764_p4 = scmp.lt.s32.totalorder %s17_s10, %s17_s10 }
   0x9   :  { %p2760_p3 = scmp.ne.s32.totalorder %s17_s10, %s2759_s18  ;;  %p2765_p5 = scmp.lt.s32.totalorder %s2759_s18, %s2759_s18 }
   0xb   :  { %p2766_p6 = por %p2765_p5, %p2764_p4 }
   0xd   :  { %p2767_p7 = pnand %p2766_p6, %p2760_p3 }
   0xf   :  { %2770 = shalt.err (!%p2767_p7)
}
  0x10   :  { %s2798_s19 = smov 128   ;;  %s2799_s20 = smov 8  }
  0x11   :  { %22 = dma.hbm_to_vmem [thread:$0]  %s4130_s1, 8192, %s17_s10, [#allocation3], %s2798_s19, %s2798_s19, %s2799_s20  }
  0x12   :  { %2793 = dma.done.wait [#allocation3], 8192  }
  0x13   :  { %2794 = vsyncadd [#allocation3], 4294959104  ;;  %v2800_v0 = vmov 0   ;;  %v2801_v1 = vmov 2   ;;  %v31_v2 = vld [vmem:[%s4129_s0] sm:$0xff]  ;;  %v128_v4 = vld [vmem:[#allocation2 + $0x88] sm:$0xff] }
  0x14   :  { %2744 = vset.pattern.permute.xlu0 %v2800_v0  ;;  %2746 = vset.pattern.permute.xlu1 %v2801_v1  ;;  %v2836_v3 = vld [vmem:[#allocation2 + $0x80] sm:$0xff]  ;;  %v71_v5 = vadd.s32 256, %v31_v2  ;;  %v51_v6 = vadd.s32 128, %v31_v2  ;;  %v91_v7 = vadd.s32 384, %v31_v2  ;;  %v2841_v10 = vld [vmem:[#allocation2 + $0x8] sm:$0xff]  ;;  %v227_v11 = vand.u32 4294901760, %v128_v4 }
  0x15   :  { %33 = vperm.xlu0 %2744, %v31_v2   ;;  %v224_v8 = vand.u32 4294901760, %v2836_v3  ;;  %v2839_v9 = vld [vmem:[#allocation2] sm:$0xff]  ;;  %v179_v13 = vand.u32 4294901760, %v2841_v10  ;;  %v2845_v14 = vld [vmem:[#allocation2 + $0x90] sm:$0xff]  ;;  %v2847_v15 = vld [vmem:[#allocation2 + $0x98] sm:$0xff]  ;;  %v2802_v26 = vmov 1  }
  0x16   :  { %v176_v12 = vand.u32 4294901760, %v2839_v9  ;;  %v2849_v16 = vld [vmem:[#allocation2 + $0x10] sm:$0xff]  ;;  %73 = vperm.xlu1 %2746, %v71_v5   ;;  %v230_v18 = vand.u32 4294901760, %v2845_v14  ;;  %v233_v19 = vand.u32 4294901760, %v2847_v15  ;;  %v2856_v20 = vld [vmem:[#allocation2 + $0x18] sm:$0xff]  ;;  %v2859_v22 = vsub.f32 %v128_v4, %v227_v11  ;;  %v2917_v48 = vld [vmem:[#allocation2 + $0xa0] sm:$0xff] }
  0x17   :  { %v2852_v17 = vsub.f32 %v2836_v3, %v224_v8  ;;  %v182_v21 = vand.u32 4294901760, %v2849_v16  ;;  %v2867_v24 = vsub.f32 %v2841_v10, %v179_v13  ;;  %v185_v25 = vand.u32 4294901760, %v2856_v20  ;;  %v2922_v53 = vld [vmem:[#allocation2 + $0xa8] sm:$0xff]  ;;  %v2924_v54 = vld [vmem:[#allocation2 + $0x20] sm:$0xff]  ;;  %v2931_v0 = vld [vmem:[#allocation2 + $0xb0] sm:$0xff]  ;;  %s2805_s0 = smov [#allocation5]  }
  0x18   :  { %v2864_v23 = vsub.f32 %v2839_v9, %v176_v12  ;;  %v2874_v28 = vsub.f32 %v2845_v14, %v230_v18  ;;  %v2877_v29 = vsub.f32 %v2847_v15, %v233_v19  ;;  %v4154_v31 = vand.u32 4294901760, %v2859_v22  ;;  %v2928_v59 = vld [vmem:[#allocation2 + $0x28] sm:$0xff]  ;;  %v2933_v1 = vld [vmem:[#allocation2 + $0xb8] sm:$0xff]  ;;  %s1906_s1 = sshll.u32 %s2805_s0, 4  ;;  %s1907_s1 = int_to_ptr.vmem [resolvable:$true] %s1906_s1 }
  0x19   :  { %2745 = vset.pattern.permute.xlu0 %v2802_v26  ;;  %v4155_v27 = vand.u32 4294901760, %v2852_v17  ;;  %v2882_v30 = vsub.f32 %v2849_v16, %v182_v21  ;;  %v4152_v33 = vand.u32 4294901760, %v2867_v24  ;;  %v2890_v34 = vsub.f32 %v2856_v20, %v185_v25  ;;  %v2963_v26 = vld [vmem:[#allocation2 + $0x38] sm:$0xff]  ;;  %s2771_s25 = scalar_lea.vmem %s1907_s1, 128  ;;  %p2776_p9 = scmp.lt.s32.totalorder %s1907_s1, %s1907_s1 }
  0x1a   :  { %53 = vperm.xlu0 %2745, %v51_v6   ;;  %v4153_v32 = vand.u32 4294901760, %v2864_v23  ;;  %v2803_v35 = vmov 3   ;;  %v4148_v37 = vand.u32 4294901760, %v2874_v28  ;;  %v4147_v38 = vand.u32 4294901760, %v2877_v29  ;;  %v2942_v6 = vld [vmem:[#allocation2 + $0x30] sm:$0xff]  ;;  %p2772_p8 = scmp.ne.s32.totalorder %s1907_s1, %s2771_s25  ;;  %p2777_p10 = scmp.lt.s32.totalorder %s2771_s25, %s2771_s25 }
  0x1b   :  { %2747 = vset.pattern.permute.xlu1 %v2803_v35  ;;  %v403_v36 = vsub.f32 %v2852_v17, %v4155_v27  ;;  %v4145_v39 = vand.u32 4294901760, %v2882_v30  ;;  %v410_v40 = vsub.f32 %v2859_v22, %v4154_v31  ;;  %v298_v42 = vsub.f32 %v2867_v24, %v4152_v33 }
  0x1c   :  { %93 = vperm.xlu1 %2747, %v91_v7   ;;  %v291_v41 = vsub.f32 %v2864_v23, %v4153_v32  ;;  %v4144_v43 = vand.u32 4294901760, %v2890_v34  ;;  %v417_v45 = vsub.f32 %v2874_v28, %v4148_v37  ;;  %v424_v46 = vsub.f32 %v2877_v29, %v4147_v38  ;;  %v124_v37 = vld [vmem:[#allocation2 + $0x68] sm:$0xff]  ;;  %p2778_p11 = por %p2777_p10, %p2776_p9 }
  0x1d   :  { %v404_v44 = vand.u32 4294901760, %v403_v36  ;;  %v305_v47 = vsub.f32 %v2882_v30, %v4145_v39  ;;  %v411_v49 = vand.u32 4294901760, %v410_v40  ;;  %v299_v51 = vand.u32 4294901760, %v298_v42 }
  0x1e   :  { %v292_v50 = vand.u32 4294901760, %v291_v41  ;;  %v312_v52 = vsub.f32 %v2890_v34, %v4144_v43  ;;  %2748 = vset.pattern.permute.xlu0 %v2803_v35  ;;  %v418_v55 = vand.u32 4294901760, %v417_v45  ;;  %v425_v56 = vand.u32 4294901760, %v424_v46  ;;  %v3119_v43 = vld [vmem:[#allocation2 + $0x60] sm:$0xff]  ;;  %p2779_p12 = pnand %p2778_p11, %p2772_p8 }
  0x1f   :  { %v306_v57 = vand.u32 4294901760, %v305_v47  ;;  %v2926_v58 = vpack.c.bf16 %v227_v11, %v224_v8  ;;  %v2383_v60 = vpack.c.bf16 %v411_v49, %v404_v44  ;;  %v236_v63 = vand.u32 4294901760, %v2917_v48 }
  0x20   :  { %v2385_v61 = vpack.c.bf16 %v299_v51, %v292_v50  ;;  %v313_v62 = vand.u32 4294901760, %v312_v52  ;;  %v2387_v2 = vpack.c.bf16 %v425_v56, %v418_v55  ;;  %v239_v3 = vand.u32 4294901760, %v2922_v53  ;;  %v3013_v52 = vld [vmem:[#allocation2 + $0xc0] sm:$0xff] }
  0x21   :  { %4249 = vst [vmem:[#allocation8_spill] sm:$0xff] %v2926_v58  ;;  %2352 = vmatprep.subr.bf16.mxu0 %v2926_v58  ;;  %v2939_v4 = vpack.c.bf16 %v179_v13, %v176_v12  ;;  %v188_v5 = vand.u32 4294901760, %v2924_v54  ;;  %2384 = vmatprep.subr.bf16.mxu1 %v2383_v60  ;;  %v2945_v8 = vsub.f32 %v2917_v48, %v236_v63  ;;  %v191_v10 = vand.u32 4294901760, %v2928_v59 }
  0x22   :  { %v2389_v7 = vpack.c.bf16 %v313_v62, %v306_v57  ;;  %v2950_v11 = vpack.c.bf16 %v233_v19, %v230_v18  ;;  %2386 = vmatpush3.bf16.msra.mxu1 %v2385_v61  ;;  %v2953_v9 = vsub.f32 %v2922_v53, %v239_v3  ;;  %v242_v13 = vand.u32 4294901760, %v2931_v0 }
  0x23   :  { %2354 = vmatpush3.bf16.msra.mxu0 %v2939_v4  ;;  %v2959_v12 = vsub.f32 %v2924_v54, %v188_v5  ;;  %v245_v15 = vand.u32 4294901760, %v2933_v1  ;;  %2388 = vmatprep.subr.bf16.mxu1 %v2387_v2  ;;  %v4143_v14 = vand.u32 4294901760, %v2945_v8  ;;  %v2967_v18 = vsub.f32 %v2928_v59, %v191_v10  ;;  %v3021_v59 = vld [vmem:[#allocation2 + $0xc8] sm:$0xff] }
  0x24   :  { %2356 = vmatprep.subr.bf16.mxu0 %v2950_v11  ;;  %v2974_v19 = vpack.c.bf16 %v185_v25, %v182_v21  ;;  %v194_v35 = vand.u32 4294901760, %v2942_v6  ;;  %v4142_v36 = vand.u32 4294901760, %v2953_v9  ;;  %v2980_v41 = vsub.f32 %v2931_v0, %v242_v13 }
  0x25   :  { %v4141_v40 = vand.u32 4294901760, %v2959_v12  ;;  %v2983_v42 = vsub.f32 %v2933_v1, %v245_v15  ;;  %v431_v16 = vsub.f32 %v2945_v8, %v4143_v14  ;;  %v4139_v20 = vand.u32 4294901760, %v2967_v18  ;;  %v3029_v1 = vld [vmem:[#allocation2 + $0x40] sm:$0xff] }
  0x26   :  { %v197_v21 = vand.u32 4294901760, %v2963_v26  ;;  %v2993_v25 = vsub.f32 %v2942_v6, %v194_v35  ;;  %2390 = vmatpush3.bf16.msra.mxu1 %v2389_v7  ;;  %v438_v44 = vsub.f32 %v2953_v9, %v4142_v36  ;;  %v4133_v46 = vand.u32 4294901760, %v2980_v41 }
  0x27   :  { %v319_v45 = vsub.f32 %v2959_v12, %v4141_v40  ;;  %v4132_v47 = vand.u32 4294901760, %v2983_v42  ;;  %2358 = vmatpush3.bf16.msra.mxu0 %v2974_v19  ;;  %v432_v48 = vand.u32 4294901760, %v431_v16  ;;  %v326_v49 = vsub.f32 %v2967_v18, %v4139_v20 }
  0x28   :  { %v4134_v50 = vand.u32 4294901760, %v2993_v25  ;;  %v3011_v51 = vsub.f32 %v2963_v26, %v197_v21  ;;  %v439_v53 = vand.u32 4294901760, %v438_v44  ;;  %v445_v56 = vsub.f32 %v2980_v41, %v4133_v46 }
  0x29   :  { %v320_v55 = vand.u32 4294901760, %v319_v45  ;;  %v452_v57 = vsub.f32 %v2983_v42, %v4132_v47  ;;  %v327_v60 = vand.u32 4294901760, %v326_v49  ;;  %v3027_v0 = vpack.c.bf16 %v239_v3, %v236_v63  ;;  %v3032_v45 = vld [vmem:[#allocation2 + $0x48] sm:$0xff]  ;;  %v3039_v3 = vld [vmem:[#allocation2 + $0xd0] sm:$0xff] }
  0x2a   :  { %v333_v61 = vsub.f32 %v2993_v25, %v4134_v50  ;;  %v4135_v62 = vand.u32 4294901760, %v3011_v51  ;;  %v2391_v2 = vpack.c.bf16 %v439_v53, %v432_v48  ;;  %v446_v7 = vand.u32 4294901760, %v445_v56  ;;  %v3041_v50 = vld [vmem:[#allocation2 + $0xd8] sm:$0xff] }
  0x2b   :  { %v453_v16 = vand.u32 4294901760, %v452_v57  ;;  %v248_v44 = vand.u32 4294901760, %v3013_v52  ;;  %v2393_v47 = vpack.c.bf16 %v327_v60, %v320_v55  ;;  %2360 = vmatprep.subr.bf16.mxu0 %v3027_v0  ;;  %v251_v63 = vand.u32 4294901760, %v3021_v59 }
  0x2c   :  { %v334_v46 = vand.u32 4294901760, %v333_v61  ;;  %v340_v49 = vsub.f32 %v3011_v51, %v4135_v62  ;;  %2392 = vmatprep.subr.bf16.mxu1 %v2391_v2  ;;  %v3048_v55 = vpack.c.bf16 %v191_v10, %v188_v5  ;;  %v200_v56 = vand.u32 4294901760, %v3029_v1 }
  0x2d   :  { %v2395_v48 = vpack.c.bf16 %v453_v16, %v446_v7  ;;  %v3044_v53 = vsub.f32 %v3013_v52, %v248_v44  ;;  %2394 = vmatpush3.bf16.msra.mxu1 %v2393_v47  ;;  %v3052_v60 = vsub.f32 %v3021_v59, %v251_v63  ;;  %v203_v61 = vand.u32 4294901760, %v3032_v45  ;;  %v3064_v47 = vld [vmem:[#allocation2 + $0x50] sm:$0xff] }
  0x2e   :  { %v341_v57 = vand.u32 4294901760, %v340_v49  ;;  %v3055_v62 = vpack.c.bf16 %v245_v15, %v242_v13  ;;  %2362 = vmatpush3.bf16.msra.mxu0 %v3048_v55  ;;  %v3060_v54 = vsub.f32 %v3029_v1, %v200_v56  ;;  %v254_v5 = vand.u32 4294901760, %v3039_v3 }
  0x2f   :  { %2396 = vmatprep.subr.bf16.mxu1 %v2395_v48  ;;  %v4136_v2 = vand.u32 4294901760, %v3044_v53  ;;  %v257_v10 = vand.u32 4294901760, %v3041_v50  ;;  %v4137_v59 = vand.u32 4294901760, %v3052_v60  ;;  %v3068_v13 = vsub.f32 %v3032_v45, %v203_v61 }
  0x30   :  { %v2397_v52 = vpack.c.bf16 %v341_v57, %v334_v46  ;;  %2364 = vmatprep.subr.bf16.mxu0 %v3055_v62  ;;  %v4138_v1 = vand.u32 4294901760, %v3060_v54  ;;  %v3076_v7 = vsub.f32 %v3039_v3, %v254_v5  ;;  %v122_v46 = vld [vmem:[#allocation2 + $0x58] sm:$0xff]  ;;  %v3089_v48 = vpack.c.bf16 %v197_v21, %v194_v35  ;;  %v3104_v21 = vld [vmem:[#allocation2 + $0xe0] sm:$0xff] }
  0x31   :  { %v459_v15 = vsub.f32 %v3044_v53, %v4136_v2  ;;  %v3079_v16 = vsub.f32 %v3041_v50, %v257_v10  ;;  %v466_v45 = vsub.f32 %v3052_v60, %v4137_v59  ;;  %v4140_v49 = vand.u32 4294901760, %v3068_v13 }
  0x32   :  { %2398 = vmatpush3.bf16.msra.mxu1 %v2397_v52  ;;  %v206_v3 = vand.u32 4294901760, %v3064_v47  ;;  %v347_v50 = vsub.f32 %v3060_v54, %v4138_v1  ;;  %v4146_v52 = vand.u32 4294901760, %v3076_v7  ;;  %2366 = vmatpush3.bf16.msra.mxu0 %v3089_v48  ;;  %v209_v26 = vand.u32 4294901760, %v122_v46 }
  0x33   :  { %v460_v57 = vand.u32 4294901760, %v459_v15  ;;  %v4149_v2 = vand.u32 4294901760, %v3079_v16  ;;  %v467_v59 = vand.u32 4294901760, %v466_v45  ;;  %v354_v6 = vsub.f32 %v3068_v13, %v4140_v49  ;;  %v3106_v15 = vld [vmem:[#allocation2 + $0xe8] sm:$0xff] }
  0x34   :  { %v3102_v35 = vsub.f32 %v3064_v47, %v206_v3  ;;  %v348_v1 = vand.u32 4294901760, %v347_v50  ;;  %v473_v20 = vsub.f32 %v3076_v7, %v4146_v52  ;;  %v3114_v49 = vpack.c.bf16 %v251_v63, %v248_v44 }
  0x35   :  { %v480_v45 = vsub.f32 %v3079_v16, %v4149_v2  ;;  %v2399_v40 = vpack.c.bf16 %v467_v59, %v460_v57  ;;  %v355_v36 = vand.u32 4294901760, %v354_v6  ;;  %v3117_v14 = vsub.f32 %v122_v46, %v209_v26  ;;  %v141_v57 = vld [vmem:[#allocation2 + $0xf0] sm:$0xff] }
  0x36   :  { %4250 = vst [vmem:[#allocation9_spill] sm:$0xff] %v3102_v35  ;;  %v4150_v47 = vand.u32 4294901760, %v3102_v35  ;;  %v474_v39 = vand.u32 4294901760, %v473_v20  ;;  %2368 = vmatprep.subr.bf16.mxu0 %v3114_v49  ;;  %v260_v52 = vand.u32 4294901760, %v3104_v21  ;;  %v263_v38 = vand.u32 4294901760, %v3106_v15 }
  0x37   :  { %4251 = vst [vmem:[#allocation10_spill] sm:$0xff] %v3117_v14  ;;  %v481_v50 = vand.u32 4294901760, %v480_v45  ;;  %2400 = vmatprep.subr.bf16.mxu1 %v2399_v40  ;;  %v2401_v44 = vpack.c.bf16 %v355_v36, %v348_v1  ;;  %v4151_v59 = vand.u32 4294901760, %v3117_v14  ;;  %v3128_v46 = vpack.c.bf16 %v203_v61, %v200_v56  ;;  %v142_v40 = vld [vmem:[#allocation2 + $0xf8] sm:$0xff] }
  0x38   :  { %v361_v63 = vsub.f32 %v3102_v35, %v4150_v47  ;;  %v3131_v6 = vsub.f32 %v3104_v21, %v260_v52  ;;  %v3134_v45 = vsub.f32 %v3106_v15, %v263_v38  ;;  %v212_v2 = vand.u32 4294901760, %v3119_v43 }
  0x39   :  { %4252 = vst [vmem:[#allocation11_spill] sm:$0xff] %v3128_v46  ;;  %v2403_v20 = vpack.c.bf16 %v481_v50, %v474_v39  ;;  %2402 = vmatpush3.bf16.msra.mxu1 %v2401_v44  ;;  %v368_v1 = vsub.f32 %v3117_v14, %v4151_v59  ;;  %2370 = vmatpush3.bf16.msra.mxu0 %v3128_v46  ;;  %v215_v56 = vand.u32 4294901760, %v124_v37  ;;  %v266_v50 = vand.u32 4294901760, %v141_v57  ;;  %v125_v44 = vld [vmem:[#allocation2 + $0x70] sm:$0xff] }
  0x3a   :  { %4253 = vst [vmem:[#allocation12_spill] sm:$0xff] %v3131_v6  ;;  %4254 = vst [vmem:[#allocation13_spill] sm:$0xff] %v3134_v45  ;;  %v362_v36 = vand.u32 4294901760, %v361_v63  ;;  %v3141_v61 = vpack.c.bf16 %v257_v10, %v254_v5  ;;  %v4156_v39 = vand.u32 4294901760, %v3131_v6  ;;  %v4157_v21 = vand.u32 4294901760, %v3134_v45 }
  0x3b   :  { %2404 = vmatprep.subr.bf16.mxu1 %v2403_v20  ;;  %v3146_v15 = vsub.f32 %v3119_v43, %v212_v2  ;;  %v369_v63 = vand.u32 4294901760, %v368_v1  ;;  %v3148_v47 = vsub.f32 %v124_v37, %v215_v56  ;;  %v269_v59 = vand.u32 4294901760, %v142_v40  ;;  %v126_v1 = vld [vmem:[#allocation2 + $0x78] sm:$0xff] }
  0x3c   :  { %4255 = vst [vmem:[#allocation14_spill] sm:$0xff] %v3141_v61  ;;  %2372 = vmatprep.subr.bf16.mxu0 %v3141_v61  ;;  %v3151_v33 = vpack.c.bf16 %v209_v26, %v206_v3  ;;  %v487_v5 = vsub.f32 %v3131_v6, %v4156_v39  ;;  %v494_v10 = vsub.f32 %v3134_v45, %v4157_v21  ;;  %v218_v3 = vand.u32 4294901760, %v125_v44 }
  0x3d   :  { %4256 = vst [vmem:[#allocation15_spill] sm:$0xff] %v3146_v15  ;;  %4257 = vst [vmem:[#allocation16_spill] sm:$0xff] %v3148_v47  ;;  %v4162_v43 = vand.u32 4294901760, %v3146_v15  ;;  %v3160_v20 = vsub.f32 %v141_v57, %v266_v50  ;;  %v2405_v37 = vpack.c.bf16 %v369_v63, %v362_v36  ;;  %v4163_v32 = vand.u32 4294901760, %v3148_v47 }
  0x3e   :  { %4258 = vst [vmem:[#allocation17_spill] sm:$0xff] %v3151_v33  ;;  %v3163_v31 = vsub.f32 %v142_v40, %v269_v59  ;;  %2374 = vmatpush3.bf16.msra.mxu0 %v3151_v33  ;;  %v488_v26 = vand.u32 4294901760, %v487_v5  ;;  %v495_v27 = vand.u32 4294901760, %v494_v10  ;;  %v221_v40 = vand.u32 4294901760, %v126_v1 }
  0x3f   :  { %4259 = vst [vmem:[#allocation18_spill] sm:$0xff] %v3160_v20  ;;  %v375_v39 = vsub.f32 %v3146_v15, %v4162_v43  ;;  %v4167_v21 = vand.u32 4294901760, %v3160_v20  ;;  %2406 = vmatpush3.bf16.msra.mxu1 %v2405_v37  ;;  %v382_v57 = vsub.f32 %v3148_v47, %v4163_v32  ;;  %v3174_v63 = vsub.f32 %v125_v44, %v218_v3 }
  0x40   :  { %4260 = vst [vmem:[#allocation19_spill] sm:$0xff] %v3163_v31  ;;  %v4166_v36 = vand.u32 4294901760, %v3163_v31  ;;  %v2407_v33 = vpack.c.bf16 %v495_v27, %v488_v26  ;;  %v3179_v10 = vpack.c.bf16 %v263_v38, %v260_v52  ;;  %v3185_v46 = vsub.f32 %v126_v1, %v221_v40 }
  0x41   :  { %4261 = vst [vmem:[#allocation20_spill] sm:$0xff] %v3174_v63  ;;  %v376_v61 = vand.u32 4294901760, %v375_v39  ;;  %v501_v5 = vsub.f32 %v3160_v20, %v4167_v21  ;;  %v383_v43 = vand.u32 4294901760, %v382_v57  ;;  %v388_v32 = vand.u32 4294901760, %v3174_v63 }
  0x42   :  { %v508_v37 = vsub.f32 %v3163_v31, %v4166_v36  ;;  %4262 = vst [vmem:[#allocation21_spill] sm:$0xff] %v3185_v46  ;;  %2408 = vmatprep.subr.bf16.mxu1 %v2407_v33  ;;  %2376 = vmatprep.subr.bf16.mxu0 %v3179_v10  ;;  %v3188_v27 = vpack.c.bf16 %v215_v56, %v212_v2  ;;  %v395_v36 = vand.u32 4294901760, %v3185_v46 }
  0x43   :  { %v502_v44 = vand.u32 4294901760, %v501_v5  ;;  %v3190_v39 = vpack.c.bf16 %v269_v59, %v266_v50  ;;  %v3192_v26 = vpack.c.bf16 %v221_v40, %v218_v3  ;;  %v2409_v38 = vpack.c.bf16 %v383_v43, %v376_v61 }
  0x44   :  { %v509_v52 = vand.u32 4294901760, %v508_v37  ;;  %v389_v57 = vsub.f32 %v3174_v63, %v388_v32  ;;  %2378 = vmatpush3.bf16.msra.mxu0 %v3188_v27  ;;  %v2415_v33 = vpack.c.bf16 %v2859_v22, %v2852_v17  ;;  %v396_v50 = vsub.f32 %v3185_v46, %v395_v36 }
  0x45   :  { %4263 = vst [vmem:[#allocation22_spill] sm:$0xff] %v3192_v26  ;;  %2410 = vmatpush3.bf16.msra.mxu1 %v2409_v38  ;;  %2380 = vmatprep.subr.bf16.mxu0 %v3190_v39  ;;  %v4267_v40 = vand.u32 4294901760, %v2864_v23  ;;  %v4268_v5 = vand.u32 4294901760, %v2867_v24 }
  0x46   :  { %v2411_v56 = vpack.c.bf16 %v509_v52, %v502_v44  ;;  %v390_v61 = vand.u32 4294901760, %v389_v57  ;;  %v397_v44 = vand.u32 4294901760, %v396_v50  ;;  %v4264_v52 = vand.u32 4294901760, %v2852_v17 }
  0x47   :  { %v4265_v57 = vand.u32 4294901760, %v2859_v22  ;;  %v3243_v3 = vpack.c.bf16 %v4268_v5, %v4267_v40  ;;  %v4273_v17 = vand.u32 4294901760, %v2882_v30  ;;  %v4274_v22 = vand.u32 4294901760, %v2890_v34 }
  0x48   :  { %2412 = vmatprep.subr.bf16.mxu1 %v2411_v56  ;;  %2382 = vmatpush3.bf16.msra.mxu0 %v3192_v26  ;;  %v2413_v38 = vpack.c.bf16 %v397_v44, %v390_v61  ;;  %v4270_v56 = vand.u32 4294901760, %v2874_v28  ;;  %v4271_v61 = vand.u32 4294901760, %v2877_v29  ;;  %v4279_v40 = vand.u32 4294901760, %v2959_v12 }
  0x49   :  { %2416 = vmatprep.subr.bf16.mxu0 %v2415_v33  ;;  %v3236_v37 = vpack.c.bf16 %v4265_v57, %v4264_v52  ;;  %4269 = vst [vmem:[#allocation24_spill] sm:$0xff] %v3243_v3  ;;  %v3255_v44 = vpack.c.bf16 %v4274_v22, %v4273_v17  ;;  %v4277_v52 = vand.u32 4294901760, %v2953_v9  ;;  %v4280_v5 = vand.u32 4294901760, %v2967_v18 }
  0x4a   :  { %2414 = vmatpush3.bf16.msra.mxu1 %v2413_v38  ;;  %v3249_v33 = vpack.c.bf16 %v4271_v61, %v4270_v56  ;;  %v4276_v38 = vand.u32 4294901760, %v2945_v8  ;;  %v4282_v56 = vand.u32 4294901760, %v2980_v41  ;;  %v4283_v61 = vand.u32 4294901760, %v2983_v42 }
  0x4b   :  { %4266 = vst [vmem:[#allocation23_spill] sm:$0xff] %v3236_v37  ;;  %2448 = vmatprep.subr.bf16.mxu1 %v2926_v58  ;;  %4275 = vst [vmem:[#allocation26_spill] sm:$0xff] %v3255_v44  ;;  %v3267_v50 = vpack.c.bf16 %v4280_v5, %v4279_v40  ;;  %v4285_v17 = vand.u32 4294901760, %v2993_v25  ;;  %v4286_v22 = vand.u32 4294901760, %v3011_v51  ;;  %v4291_v40 = vand.u32 4294901760, %v3060_v54 }
  0x4c   :  { %4272 = vst [vmem:[#allocation25_spill] sm:$0xff] %v3249_v33  ;;  %v3261_v57 = vpack.c.bf16 %v4277_v52, %v4276_v38  ;;  %v3273_v43 = vpack.c.bf16 %v4283_v61, %v4282_v56  ;;  %v4288_v38 = vand.u32 4294901760, %v3044_v53  ;;  %v4289_v52 = vand.u32 4294901760, %v3052_v60 }
  0x4d   :  { %4281 = vst [vmem:[#allocation28_spill] sm:$0xff] %v3267_v50  ;;  %v3279_v59 = vpack.c.bf16 %v4286_v22, %v4285_v17  ;;  %v4292_v5 = vand.u32 4294901760, %v3068_v13  ;;  %v4294_v56 = vand.u32 4294901760, %v3076_v7  ;;  %v4295_v61 = vand.u32 4294901760, %v3079_v16 }
  0x4e   :  { %4278 = vst [vmem:[#allocation27_spill] sm:$0xff] %v3261_v57  ;;  %4284 = vst [vmem:[#allocation29_spill] sm:$0xff] %v3273_v43  ;;  %v3285_v2 = vpack.c.bf16 %v4289_v52, %v4288_v38  ;;  %v4297_v17 = vand.u32 4294901760, %v3102_v35  ;;  %v4298_v22 = vand.u32 4294901760, %v3117_v14  ;;  %v4300_v38 = vand.u32 4294901760, %v3131_v6 }
  0x4f   :  { %4287 = vst [vmem:[#allocation30_spill] sm:$0xff] %v3279_v59  ;;  %v3291_v1 = vpack.c.bf16 %v4292_v5, %v4291_v40  ;;  %v3297_v21 = vpack.c.bf16 %v4295_v61, %v4294_v56  ;;  %v4301_v52 = vand.u32 4294901760, %v3134_v45  ;;  %v4303_v40 = vand.u32 4294901760, %v3146_v15 }
  0x50   :  { %4290 = vst [vmem:[#allocation31_spill] sm:$0xff] %v3285_v2  ;;  %v3303_v59 = vpack.c.bf16 %v4298_v22, %v4297_v17  ;;  %v4304_v5 = vand.u32 4294901760, %v3148_v47  ;;  %v4306_v56 = vand.u32 4294901760, %v3160_v20  ;;  %v4307_v61 = vand.u32 4294901760, %v3163_v31 }
  0x51   :  { %4293 = vst [vmem:[#allocation32_spill] sm:$0xff] %v3291_v1  ;;  %4296 = vst [vmem:[#allocation33_spill] sm:$0xff] %v3297_v21  ;;  %v3309_v2 = vpack.c.bf16 %v4301_v52, %v4300_v38  ;;  %v3323_v17 = vpack.c.bf16 %v395_v36, %v388_v32  ;;  %v26_v22 = vlaneseq }
  0x52   :  { %4299 = vst [vmem:[#allocation34_spill] sm:$0xff] %v3303_v59  ;;  %v3315_v1 = vpack.c.bf16 %v4304_v5, %v4303_v40  ;;  %v3321_v21 = vpack.c.bf16 %v4307_v61, %v4306_v56  ;;  %v2804_v5 = vmov 0.0  }
  0x53   :  { %4302 = vst [vmem:[#allocation35_spill] sm:$0xff] %v3309_v2  ;;  %4309 = vst [vmem:[#allocation38_spill] sm:$0xff] %v3323_v17  ;;  %v27_v59 = vand.u32 127, %v26_v22 }
  0x54   :  { %4305 = vst [vmem:[#allocation36_spill] sm:$0xff] %v3315_v1  ;;  %4308 = vst [vmem:[#allocation37_spill] sm:$0xff] %v3321_v21 }
  0x55   :  { %v29_v43 = vadd.s32 256, %v27_v59  ;;  %v30_v50 = vadd.s32 384, %v27_v59  ;;  %v28_v38 = vadd.s32 128, %v27_v59 }
  0x94   :  { %v34_v52 = vpop.permute.xlu0 %33 }
  0x95   :  { %vm37_vm0 = vcmp.eq.s32.totalorder %v29_v43, %v34_v52  ;;  %vm38_vm1 = vcmp.eq.s32.totalorder %v30_v50, %v34_v52  ;;  %vm35_vm2 = vcmp.eq.s32.totalorder %v27_v59, %v34_v52  ;;  %vm36_vm3 = vcmp.eq.s32.totalorder %v28_v38, %v34_v52  ;;  %v74_v40 = vpop.permute.xlu1 %73 }
  0x96   :  { %v1917_v1 = vsel %vm37_vm0, 1.0, %v2804_v5  ;;  %v1918_v2 = vsel %vm38_vm1, 1.0, %v2804_v5  ;;  %vm75_vm4 = vcmp.eq.s32.totalorder %v27_v59, %v74_v40  ;;  %vm76_vm5 = vcmp.eq.s32.totalorder %v28_v38, %v74_v40 }
  0x97   :  { %vm77_vm6 = vcmp.eq.s32.totalorder %v29_v43, %v74_v40  ;;  %vm78_vm7 = vcmp.eq.s32.totalorder %v30_v50, %v74_v40  ;;  %v1923_v56 = vsel %vm75_vm4, 1.0, %v2804_v5  ;;  %v1924_v61 = vsel %vm76_vm5, 1.0, %v2804_v5 }
  0x98   :  { %v1925_v32 = vsel %vm77_vm6, 1.0, %v2804_v5  ;;  %v1926_v36 = vsel %vm78_vm7, 1.0, %v2804_v5  ;;  %v1915_v22 = vsel %vm35_vm2, 1.0, %v2804_v5  ;;  %v1916_v17 = vsel %vm36_vm3, 1.0, %v2804_v5 }
  0x99   :  { %v54_v21 = vpop.permute.xlu0 %53 }
  0x9a   :  { %vm55_vm8 = vcmp.eq.s32.totalorder %v27_v59, %v54_v21  ;;  %vm56_vm9 = vcmp.eq.s32.totalorder %v28_v38, %v54_v21  ;;  %vm57_vm10 = vcmp.eq.s32.totalorder %v29_v43, %v54_v21  ;;  %vm58_vm11 = vcmp.eq.s32.totalorder %v30_v50, %v54_v21 }
  0x9b   :  { %v1919_v52 = vsel %vm55_vm8, 1.0, %v2804_v5  ;;  %v1920_v57 = vsel %vm56_vm9, 1.0, %v2804_v5  ;;  %v1921_v44 = vsel %vm57_vm10, 1.0, %v2804_v5  ;;  %v1922_v33 = vsel %vm58_vm11, 1.0, %v2804_v5  ;;  %v94_v3 = vpop.permute.xlu1 %93 }
  0x9c   :  { %v67_v37 = vadd.f32 %v1919_v52, %v1915_v22  ;;  %v68_v63 = vadd.f32 %v1920_v57, %v1916_v17  ;;  %v69_v46 = vadd.f32 %v1921_v44, %v1917_v1  ;;  %v70_v40 = vadd.f32 %v1922_v33, %v1918_v2  ;;  %v3387_v33 = vld [vmem:[#allocation2 + $0x1f0] sm:$0xff]  ;;  %v3389_v44 = vld [vmem:[#allocation2 + $0x1f8] sm:$0xff] }
  0x9d   :  { %vm95_vm12 = vcmp.eq.s32.totalorder %v27_v59, %v94_v3  ;;  %vm96_vm13 = vcmp.eq.s32.totalorder %v28_v38, %v94_v3  ;;  %vm97_vm14 = vcmp.eq.s32.totalorder %v29_v43, %v94_v3  ;;  %vm98_vm15 = vcmp.eq.s32.totalorder %v30_v50, %v94_v3  ;;  %v3373_v43 = vld [vmem:[#allocation2 + $0x1e0] sm:$0xff]  ;;  %v4322_v3 = vld [vmem:[#allocation14_spill] sm:$0xff]  ;;  %4325 = vst [vmem:[#allocation44_spill] sm:$0xff] %v3387_v33  ;;  %v3405_v38 = vld [vmem:[#allocation2 + $0x170] sm:$0xff] }
  0x9e   :  { %v87_v20 = vadd.f32 %v1923_v56, %v67_v37  ;;  %v88_v31 = vadd.f32 %v1924_v61, %v68_v63  ;;  %v89_v15 = vadd.f32 %v1925_v32, %v69_v46  ;;  %v90_v47 = vadd.f32 %v1926_v36, %v70_v40  ;;  %v3381_v37 = vld [vmem:[#allocation2 + $0x160] sm:$0xff]  ;;  %4326 = vst [vmem:[#allocation45_spill] sm:$0xff] %v3389_v44 }
  0x9f   :  { %v1927_v58 = vsel %vm95_vm12, 1.0, %v2804_v5  ;;  %v1928_v6 = vsel %vm96_vm13, 1.0, %v2804_v5  ;;  %v1929_v21 = vsel %vm97_vm14, 1.0, %v2804_v5  ;;  %v1930_v45 = vsel %vm98_vm15, 1.0, %v2804_v5  ;;  %4323 = vst [vmem:[#allocation14_spill] sm:$0xff] %v3381_v37  ;;  %v3407_v5 = vld [vmem:[#allocation2 + $0x178] sm:$0xff] }
  0xa0   :  { %v107_v26 = vadd.f32 %v1927_v58, %v87_v20  ;;  %v108_v35 = vadd.f32 %v1928_v6, %v88_v31  ;;  %v3325_v14 = vadd.f32 %v1929_v21, %v89_v15  ;;  %v3327_v22 = vadd.f32 %v1930_v45, %v90_v47  ;;  %4330 = vst [vmem:[#allocation46_spill] sm:$0xff] %v3407_v5 }
  0xa1   :  { %v4311_v45 = vpack.c.bf16 %v2867_v24, %v2864_v23  ;;  %v4312_v15 = vpack.c.bf16 %v2877_v29, %v2874_v28  ;;  %v4313_v20 = vpack.c.bf16 %v2890_v34, %v2882_v30  ;;  %v3363_v23 = vld [vmem:[#allocation2 + $0x150] sm:$0xff]  ;;  %v3365_v24 = vld [vmem:[#allocation2 + $0x158] sm:$0xff]  ;;  %v4317_v28 = vpack.c.bf16 %v2967_v18, %v2959_v12  ;;  %v4318_v29 = vld [vmem:[#allocation11_spill] sm:$0xff] }
  0xa2   :  { %4310 = vst [vmem:[#allocation39_spill] sm:$0xff] %v3325_v14  ;;  %v3329_v1 = vand.u32 4294901760, %v108_v35  ;;  %v3331_v2 = vand.u32 4294901760, %v107_v26  ;;  %4315 = vst [vmem:[#allocation40_spill] sm:$0xff] %v3363_v23  ;;  %v4190_v30 = vand.u32 4294901760, %v3363_v23  ;;  %v4189_v34 = vand.u32 4294901760, %v3365_v24 }
  0xa3   :  { %4316 = vst [vmem:[#allocation41_spill] sm:$0xff] %v3365_v24  ;;  %4319 = vst [vmem:[#allocation11_spill] sm:$0xff] %v3373_v43  ;;  %v3383_v12 = vld [vmem:[#allocation2 + $0x168] sm:$0xff]  ;;  %v4188_v18 = vand.u32 4294901760, %v3373_v43  ;;  %v4327_v57 = vpack.c.bf16 %v3011_v51, %v2993_v25  ;;  %v4331_v25 = vpack.c.bf16 %v3052_v60, %v3044_v53  ;;  %v4186_v51 = vand.u32 4294901760, %v3381_v37 }
  0xa4   :  { %v272_v59 = vsub.f32 %v108_v35, %v3329_v1  ;;  %v3335_v63 = vsub.f32 %v107_v26, %v3331_v2  ;;  %512 = vmatprep.mubr.f32.mxu1 %v3329_v1  ;;  %v4314_v26 = vpack.c.bf16 %v2953_v9, %v2945_v8  ;;  %v3375_v8 = vld [vmem:[#allocation2 + $0x1e8] sm:$0xff]  ;;  %v4321_v9 = vpack.c.bf16 %v2983_v42, %v2980_v41  ;;  %v4328_v41 = vld [vmem:[#allocation17_spill] sm:$0xff] }
  0xa5   :  { %514 = vmatmul.mubr.f32.vlgmr.msra.gmra.mrb[0].mxu1 %v3331_v2  ;;  %4320 = vst [vmem:[#allocation42_spill] sm:$0xff] %v3375_v8  ;;  %4324 = vst [vmem:[#allocation43_spill] sm:$0xff] %v3383_v12  ;;  %v4187_v50 = vand.u32 4294901760, %v3375_v8  ;;  %v3398_v42 = vsub.f32 %v3363_v23, %v4190_v30  ;;  %v3403_v17 = vsub.f32 %v3365_v24, %v4189_v34  ;;  %v4184_v32 = vand.u32 4294901760, %v3383_v12  ;;  %v4346_v34 = vld [vmem:[#allocation15_spill] sm:$0xff] }
  0xa6   :  { %2450 = vmatpush3.bf16.msra.mxu1 %v2939_v4  ;;  %v273_v31 = vand.u32 4294901760, %v272_v59  ;;  %v279_v58 = vand.u32 4294901760, %v3335_v63  ;;  %4329 = vst [vmem:[#allocation17_spill] sm:$0xff] %v3405_v38  ;;  %v4182_v36 = vand.u32 4294901760, %v3387_v33  ;;  %v4181_v56 = vand.u32 4294901760, %v3389_v44 }
  0xa7   :  { %2452 = vmatprep.subr.bf16.mxu1 %v2950_v11  ;;  %v3420_v61 = vsub.f32 %v3373_v43, %v4188_v18  ;;  %v3425_v53 = vsub.f32 %v3375_v8, %v4187_v50  ;;  %v4183_v60 = vand.u32 4294901760, %v3405_v38  ;;  %v4185_v52 = vand.u32 4294901760, %v3407_v5  ;;  %v4345_v18 = vld [vmem:[#allocation16_spill] sm:$0xff] }
  0xa8   :  { %756 = vmatprep.mubr.f32.mxu1 %v273_v31  ;;  %v274_v47 = vsub.f32 %v272_v59, %v273_v31  ;;  %v280_v35 = vsub.f32 %v3335_v63, %v279_v58  ;;  %v4332_v40 = vpack.c.bf16 %v3068_v13, %v3060_v54  ;;  %v4200_v21 = vand.u32 4294901760, %v3398_v42 }
  0xa9   :  { %v4333_v31 = vpack.c.bf16 %v3079_v16, %v3076_v7  ;;  %v3447_v54 = vsub.f32 %v3383_v12, %v4184_v32  ;;  %v3452_v13 = vsub.f32 %v3387_v33, %v4182_v36  ;;  %v3457_v7 = vsub.f32 %v3389_v44, %v4181_v56  ;;  %v4342_v56 = vld [vmem:[#allocation8_spill] sm:$0xff]  ;;  %v3489_v36 = vld [vmem:[#allocation2 + $0x100] sm:$0xff] }
  0xaa   :  { %2454 = vmatpush3.bf16.msra.mxu1 %v2974_v19  ;;  %v275_v46 = vand.u32 4294901760, %v274_v47  ;;  %v281_v6 = vand.u32 4294901760, %v280_v35  ;;  %v3442_v47 = vsub.f32 %v3381_v37, %v4186_v51  ;;  %v3465_v35 = vld [vmem:[#allocation2 + $0x180] sm:$0xff]  ;;  %v4347_v30 = vpack.c.bf16 %v4345_v18, %v4346_v34  ;;  %v4396_v37 = vld [vmem:[#allocation32_spill] sm:$0xff] }
  0xab   :  { %2456 = vmatprep.subr.bf16.mxu1 %v3027_v0 }
  0xac   :  { %276 = vmatprep.mubr.f32.mxu0 %v275_v46  ;;  %v3467_v46 = vld [vmem:[#allocation2 + $0x188] sm:$0xff]  ;;  %v4195_v32 = vand.u32 4294901760, %v3442_v47 }
  0xad   :  { %282 = vmatmul.mubr.f32.vlgmr.msra.gmra.mrb[0].mxu0 %v281_v6  ;;  %v4192_v6 = vand.u32 4294901760, %v3420_v61  ;;  %v4413_v23 = vand.u32 4294901760, %v3467_v46 }
  0xae   :  { %2418 = vmatpush3.bf16.msra.mxu0 %v4311_v45  ;;  %2458 = vmatpush3.bf16.msra.mxu1 %v3048_v55  ;;  %v4191_v45 = vand.u32 4294901760, %v3425_v53 }
  0xaf   :  { %649 = vmatprep.mubr.f32.mxu0 %v272_v59  ;;  %2420 = vmatprep.subr.bf16.mxu0 %v4312_v15  ;;  %v4193_v59 = vand.u32 4294901760, %v3403_v17  ;;  %v3474_v15 = vsub.f32 %v3405_v38, %v4183_v60  ;;  %v3491_v60 = vld [vmem:[#allocation2 + $0x108] sm:$0xff] }
  0xb0   :  { %2460 = vmatprep.subr.bf16.mxu1 %v3055_v62 }
  0xb1   :  { %v3463_v16 = vpack.c.bf16 %v4193_v59, %v4200_v21  ;;  %v4360_v21 = vld [vmem:[#allocation23_spill] sm:$0xff] }
  0xb2   :  { %2422 = vmatpush3.bf16.msra.mxu0 %v4313_v20  ;;  %2462 = vmatpush3.bf16.msra.mxu1 %v3089_v48  ;;  %v3479_v20 = vsub.f32 %v3407_v5, %v4185_v52  ;;  %v4194_v52 = vand.u32 4294901760, %v3447_v54 }
  0xb3   :  { %2424 = vmatprep.subr.bf16.mxu0 %v4314_v26  ;;  %2464 = vmatprep.subr.bf16.mxu1 %v3114_v49  ;;  %4334 = vst [vmem:[#allocation47_spill] sm:$0xff] %v3463_v16  ;;  %v4335_v26 = vld [vmem:[#allocation10_spill] sm:$0xff] }
  0xb4   :  { %v4196_v51 = vand.u32 4294901760, %v3479_v20  ;;  %v3515_v50 = vpack.c.bf16 %v4194_v52, %v4195_v32  ;;  %v4349_v52 = vld [vmem:[#allocation19_spill] sm:$0xff]  ;;  %v4350_v32 = vld [vmem:[#allocation18_spill] sm:$0xff] }
  0xb5   :  { %v4351_v34 = vpack.c.bf16 %v4349_v52, %v4350_v32  ;;  %v3553_v52 = vld [vmem:[#allocation2 + $0x110] sm:$0xff] }
  0xb6   :  { %2426 = vmatpush3.bf16.msra.mxu0 %v4317_v28  ;;  %2466 = vmatpush3.bf16.msra.mxu1 %v4318_v29  ;;  %v4336_v28 = vld [vmem:[#allocation9_spill] sm:$0xff] }
  0xb7   :  { %2428 = vmatprep.subr.bf16.mxu0 %v4321_v9  ;;  %2468 = vmatprep.subr.bf16.mxu1 %v4322_v3  ;;  %v4337_v9 = vpack.c.bf16 %v4335_v26, %v4336_v28  ;;  %v3499_v26 = vpack.c.bf16 %v4191_v45, %v4192_v6  ;;  %v4204_v28 = vand.u32 4294901760, %v3465_v35  ;;  %4344 = vst [vmem:[#allocation9_spill] sm:$0xff] %v3515_v50  ;;  %v4202_v45 = vand.u32 4294901760, %v3491_v60  ;;  %v3523_v6 = vld [vmem:[#allocation2 + $0x198] sm:$0xff]  ;;  %v3622_v50 = vld [vmem:[#allocation2 + $0x120] sm:$0xff] }
  0xb9   :  { %4343 = vst [vmem:[#allocation10_spill] sm:$0xff] %v3499_v26 }
  0xba   :  { %2430 = vmatpush3.bf16.msra.mxu0 %v4327_v57  ;;  %2470 = vmatpush3.bf16.msra.mxu1 %v4328_v41  ;;  %v4338_v57 = vld [vmem:[#allocation22_spill] sm:$0xff] }
  0xbb   :  { %2432 = vmatprep.subr.bf16.mxu0 %v4331_v25  ;;  %2472 = vmatprep.subr.bf16.mxu1 %v3179_v10  ;;  %v4339_v25 = vld [vmem:[#allocation13_spill] sm:$0xff] }
  0xbe   :  { %2434 = vmatpush3.bf16.msra.mxu0 %v4332_v40  ;;  %2474 = vmatpush3.bf16.msra.mxu1 %v3188_v27  ;;  %v4340_v40 = vld [vmem:[#allocation12_spill] sm:$0xff] }
  0xbf   :  { %2436 = vmatprep.subr.bf16.mxu0 %v4333_v31  ;;  %2476 = vmatprep.subr.bf16.mxu1 %v3190_v39  ;;  %v4341_v31 = vpack.c.bf16 %v4339_v25, %v4340_v40  ;;  %v4198_v25 = vand.u32 4294901760, %v3457_v7  ;;  %v3507_v40 = vld [vmem:[#allocation2 + $0x190] sm:$0xff] }
  0xc0   :  { %v4205_v32 = vand.u32 4294901760, %v3507_v40 }
  0xc2   :  { %2438 = vmatpush3.bf16.msra.mxu0 %v4337_v9  ;;  %2478 = vmatpush3.bf16.msra.mxu1 %v4338_v57  ;;  %v4201_v9 = vand.u32 4294901760, %v3467_v46 }
  0xc3   :  { %2440 = vmatprep.subr.bf16.mxu0 %v4341_v31  ;;  %2512 = vmatprep.subr.bf16.mxu1 %v4342_v56  ;;  %v4199_v56 = vand.u32 4294901760, %v3452_v13  ;;  %v4197_v31 = vand.u32 4294901760, %v3474_v15 }
  0xc4   :  { %v3550_v18 = vsub.f32 %v3467_v46, %v4201_v9  ;;  %v4207_v9 = vand.u32 4294901760, %v3553_v52 }
  0xc5   :  { %760 = vmatmul.mubr.f32.vlgmr.msra.gmra.mrb[2].mxu1 %v279_v58  ;;  %v4203_v58 = vand.u32 4294901760, %v3489_v36  ;;  %v3529_v59 = vpack.c.bf16 %v4198_v25, %v4199_v56  ;;  %v3568_v56 = vsub.f32 %v3491_v60, %v4202_v45 }
  0xc6   :  { %2442 = vmatpush3.bf16.msra.mxu0 %v4347_v30  ;;  %2514 = vmatpush3.bf16.msra.mxu1 %v2939_v4  ;;  %v3539_v4 = vpack.c.bf16 %v4196_v51, %v4197_v31  ;;  %v3545_v30 = vsub.f32 %v3465_v35, %v4204_v28  ;;  %4354 = vst [vmem:[#allocation8_spill] sm:$0xff] %v3550_v18  ;;  %v4355_v51 = vld [vmem:[#allocation21_spill] sm:$0xff]  ;;  %v4356_v31 = vld [vmem:[#allocation20_spill] sm:$0xff]  ;;  %v3592_v28 = vld [vmem:[#allocation2 + $0x1a0] sm:$0xff] }
  0xc7   :  { %4348 = vst [vmem:[#allocation22_spill] sm:$0xff] %v3529_v59  ;;  %1030 = vmatprep.mubr.f32.mxu1 %v3329_v1  ;;  %2444 = vmatprep.subr.bf16.mxu0 %v4351_v34  ;;  %v4206_v34 = vand.u32 4294901760, %v3523_v6  ;;  %v4357_v25 = vpack.c.bf16 %v4355_v51, %v4356_v31  ;;  %4359 = vst [vmem:[#allocation15_spill] sm:$0xff] %v3568_v56  ;;  %v3580_v31 = vld [vmem:[#allocation2 + $0x118] sm:$0xff]  ;;  %v4375_v16 = vand.u32 4294901760, %v3592_v28 }
  0xc8   :  { %4352 = vst [vmem:[#allocation13_spill] sm:$0xff] %v3539_v4  ;;  %2516 = vmatprep.subr.bf16.mxu1 %v2950_v11  ;;  %4353 = vst [vmem:[#allocation12_spill] sm:$0xff] %v3545_v30  ;;  %v3563_v11 = vsub.f32 %v3489_v36, %v4203_v58  ;;  %v4208_v51 = vand.u32 4294901760, %v3545_v30  ;;  %v4371_v45 = vand.u32 4294901760, %v3580_v31 }
  0xca   :  { %2446 = vmatpush3.bf16.msra.mxu0 %v4357_v25  ;;  %2518 = vmatpush3.bf16.msra.mxu1 %v2974_v19  ;;  %4358 = vst [vmem:[#allocation16_spill] sm:$0xff] %v3563_v11  ;;  %v3578_v25 = vsub.f32 %v3507_v40, %v4205_v32  ;;  %v3594_v32 = vld [vmem:[#allocation2 + $0x1a8] sm:$0xff] }
  0xcb   :  { %2480 = vmatprep.subr.bf16.mxu0 %v4360_v21  ;;  %2520 = vmatprep.subr.bf16.mxu1 %v3027_v0  ;;  %v3586_v21 = vsub.f32 %v3523_v6, %v4206_v34  ;;  %v4363_v0 = vld [vmem:[#allocation24_spill] sm:$0xff]  ;;  %v4366_v34 = vand.u32 4294901760, %v3550_v18 }
  0xcc   :  { %4361 = vst [vmem:[#allocation19_spill] sm:$0xff] %v3578_v25  ;;  %v4373_v26 = vand.u32 4294901760, %v3578_v25 }
  0xcd   :  { %652 = vmatmul.mubr.f32.vlgmr.msra.gmra.mrb[2].mxu0 %v3335_v63  ;;  %4362 = vst [vmem:[#allocation18_spill] sm:$0xff] %v3586_v21  ;;  %v4364_v63 = vld [vmem:[#allocation25_spill] sm:$0xff]  ;;  %v1272_v58 = vsub.f32 %v3550_v18, %v4366_v34  ;;  %v4370_v34 = vld [vmem:[#allocation27_spill] sm:$0xff] }
  0xce   :  { %2482 = vmatpush3.bf16.msra.mxu0 %v4363_v0  ;;  %926 = vmatprep.mubr.f32.mxu0 %v3329_v1  ;;  %v3602_v0 = vsub.f32 %v3553_v52, %v4207_v9  ;;  %v1265_v1 = vsub.f32 %v3545_v30, %v4208_v51  ;;  %v4367_v9 = vld [vmem:[#allocation26_spill] sm:$0xff]  ;;  %v4369_v51 = vand.u32 4294901760, %v3568_v56  ;;  %v4382_v30 = vand.u32 4294901760, %v3622_v50 }
  0xcf   :  { %2522 = vmatpush3.bf16.msra.mxu1 %v3048_v55  ;;  %2484 = vmatprep.subr.bf16.mxu0 %v4364_v63  ;;  %v3632_v63 = vld [vmem:[#allocation2 + $0x128] sm:$0xff]  ;;  %v1273_v55 = vand.u32 4294901760, %v1272_v58  ;;  %v3654_v58 = vld [vmem:[#allocation2 + $0x1b8] sm:$0xff] }
  0xd0   :  { %4365 = vst [vmem:[#allocation21_spill] sm:$0xff] %v3602_v0  ;;  %2524 = vmatprep.subr.bf16.mxu1 %v3055_v62  ;;  %v4368_v62 = vand.u32 4294901760, %v3563_v11  ;;  %v1160_v59 = vsub.f32 %v3568_v56, %v4369_v51  ;;  %v1266_v51 = vand.u32 4294901760, %v1265_v1  ;;  %v4377_v56 = vand.u32 4294901760, %v3594_v32  ;;  %v4379_v1 = vld [vmem:[#allocation28_spill] sm:$0xff] }
  0xd1   :  { %v4381_v18 = vand.u32 4294901760, %v3602_v0 }
  0xd2   :  { %2486 = vmatpush3.bf16.msra.mxu0 %v4367_v9  ;;  %v1153_v4 = vsub.f32 %v3563_v11, %v4368_v62  ;;  %v3630_v9 = vsub.f32 %v3580_v31, %v4371_v45  ;;  %v3634_v62 = vld [vmem:[#allocation2 + $0x1b0] sm:$0xff]  ;;  %v3646_v45 = vsub.f32 %v3592_v28, %v4375_v16  ;;  %v3651_v11 = vsub.f32 %v3594_v32, %v4377_v56 }
  0xd3   :  { %2526 = vmatpush3.bf16.msra.mxu1 %v3089_v48  ;;  %2488 = vmatprep.subr.bf16.mxu0 %v4370_v34  ;;  %v1279_v48 = vsub.f32 %v3578_v25, %v4373_v26  ;;  %v4374_v34 = vand.u32 4294901760, %v3586_v21  ;;  %v1161_v25 = vand.u32 4294901760, %v1160_v59  ;;  %v4380_v16 = vld [vmem:[#allocation29_spill] sm:$0xff]  ;;  %v3664_v56 = vsub.f32 %v3602_v0, %v4381_v18 }
  0xd4   :  { %4372 = vst [vmem:[#allocation20_spill] sm:$0xff] %v3630_v9  ;;  %2528 = vmatprep.subr.bf16.mxu1 %v3114_v49  ;;  %4376 = vst [vmem:[#allocation23_spill] sm:$0xff] %v3646_v45  ;;  %v1154_v26 = vand.u32 4294901760, %v1153_v4  ;;  %v3669_v4 = vld [vmem:[#allocation2 + $0x130] sm:$0xff]  ;;  %v3678_v18 = vsub.f32 %v3622_v50, %v4382_v30  ;;  %v3680_v49 = vld [vmem:[#allocation2 + $0x1c0] sm:$0xff]  ;;  %v2575_v59 = vpack.c.bf16 %v1273_v55, %v1266_v51  ;;  %v4390_v55 = vand.u32 4294901760, %v3630_v9 }
  0xd5   :  { %v1286_v19 = vsub.f32 %v3586_v21, %v4374_v34  ;;  %4378 = vst [vmem:[#allocation24_spill] sm:$0xff] %v3651_v11  ;;  %v3671_v34 = vld [vmem:[#allocation2 + $0x138] sm:$0xff]  ;;  %v4389_v30 = vld [vmem:[#allocation31_spill] sm:$0xff]  ;;  %v1168_v38 = vand.u32 4294901760, %v3664_v56  ;;  %v3720_v51 = vld [vmem:[#allocation2 + $0x1d0] sm:$0xff]  ;;  %v4394_v44 = vand.u32 4294901760, %v3646_v45 }
  0xd6   :  { %2490 = vmatpush3.bf16.msra.mxu0 %v4379_v1  ;;  %v1280_v1 = vand.u32 4294901760, %v1279_v48  ;;  %4383 = vst [vmem:[#allocation25_spill] sm:$0xff] %v3678_v18  ;;  %v4384_v48 = vld [vmem:[#allocation30_spill] sm:$0xff]  ;;  %v3685_v0 = vpack.c.bf16 %v1161_v25, %v1154_v26  ;;  %v1174_v25 = vsub.f32 %v3630_v9, %v4390_v55  ;;  %4392 = vst [vmem:[#allocation28_spill] sm:$0xff] %v3720_v51 }
  0xd7   :  { %2530 = vmatpush3.bf16.msra.mxu1 %v4318_v29  ;;  %2492 = vmatprep.subr.bf16.mxu0 %v4380_v16  ;;  %v1287_v21 = vand.u32 4294901760, %v1286_v19  ;;  %v4385_v19 = vand.u32 4294901760, %v3632_v63  ;;  %v4387_v16 = vand.u32 4294901760, %v3634_v62  ;;  %v3722_v26 = vld [vmem:[#allocation2 + $0x1d8] sm:$0xff]  ;;  %v1293_v33 = vsub.f32 %v3646_v45, %v4394_v44 }
  0xd8   :  { %2532 = vmatprep.subr.bf16.mxu1 %v4322_v3  ;;  %v3682_v3 = vld [vmem:[#allocation2 + $0x1c8] sm:$0xff]  ;;  %4393 = vst [vmem:[#allocation29_spill] sm:$0xff] %v3722_v26  ;;  %v4398_v44 = vand.u32 4294901760, %v3669_v4  ;;  %v1175_v55 = vand.u32 4294901760, %v1174_v25 }
  0xd9   :  { %v3690_v29 = vsub.f32 %v3632_v63, %v4385_v19  ;;  %v3695_v5 = vsub.f32 %v3634_v62, %v4387_v16  ;;  %v3707_v19 = vld [vmem:[#allocation2 + $0x148] sm:$0xff]  ;;  %v3710_v16 = vand.u32 4294901760, %v3327_v22  ;;  %v2579_v9 = vpack.c.bf16 %v1287_v21, %v1280_v1  ;;  %v4397_v1 = vld [vmem:[#allocation33_spill] sm:$0xff] }
  0xda   :  { %2494 = vmatpush3.bf16.msra.mxu0 %v4384_v48  ;;  %v3705_v48 = vld [vmem:[#allocation2 + $0x140] sm:$0xff]  ;;  %v1294_v8 = vand.u32 4294901760, %v1293_v33 }
  0xdb   :  { %4386 = vst [vmem:[#allocation26_spill] sm:$0xff] %v3690_v29  ;;  %4388 = vst [vmem:[#allocation27_spill] sm:$0xff] %v3695_v5  ;;  %2534 = vmatpush3.bf16.msra.mxu1 %v4328_v41  ;;  %2496 = vmatprep.subr.bf16.mxu0 %v4389_v30  ;;  %v4391_v41 = vand.u32 4294901760, %v3654_v58  ;;  %v3752_v21 = vsub.f32 %v3327_v22, %v3710_v16  ;;  %v4402_v22 = vand.u32 4294901760, %v3678_v18 }
  0xdc   :  { %2536 = vmatprep.subr.bf16.mxu1 %v3179_v10  ;;  %v4395_v10 = vand.u32 4294901760, %v3651_v11 }
  0xdd   :  { %v3716_v56 = vsub.f32 %v3654_v58, %v4391_v41  ;;  %v4399_v41 = vand.u32 4294901760, %v3671_v34  ;;  %v1181_v45 = vsub.f32 %v3678_v18, %v4402_v22  ;;  %v4408_v22 = vld [vmem:[#allocation35_spill] sm:$0xff]  ;;  %v2581_v18 = vpack.c.bf16 %v1175_v55, %v1168_v38 }
  0xde   :  { %v1300_v12 = vsub.f32 %v3651_v11, %v4395_v10  ;;  %2498 = vmatpush3.bf16.msra.mxu0 %v4396_v37  ;;  %v3741_v10 = vsub.f32 %v3669_v4, %v4398_v44 }
  0xdf   :  { %2538 = vmatpush3.bf16.msra.mxu1 %v3188_v27  ;;  %2500 = vmatprep.subr.bf16.mxu0 %v4397_v1  ;;  %v3746_v37 = vsub.f32 %v3671_v34, %v4399_v41  ;;  %v4400_v1 = vand.u32 4294901760, %v3680_v49  ;;  %v4401_v41 = vand.u32 4294901760, %v3682_v3  ;;  %v4404_v27 = vand.u32 4294901760, %v3690_v29 }
  0xe0   :  { %2540 = vmatprep.subr.bf16.mxu1 %v3190_v39  ;;  %v1301_v11 = vand.u32 4294901760, %v1300_v12  ;;  %v4403_v39 = vld [vmem:[#allocation34_spill] sm:$0xff]  ;;  %v4407_v12 = vand.u32 4294901760, %v3707_v19  ;;  %v4415_v38 = vand.u32 4294901760, %v3741_v10 }
  0xe1   :  { %v3759_v44 = vsub.f32 %v3680_v49, %v4400_v1  ;;  %v3764_v30 = vsub.f32 %v3682_v3, %v4401_v41  ;;  %v1188_v43 = vsub.f32 %v3690_v29, %v4404_v27  ;;  %v4405_v1 = vand.u32 4294901760, %v3695_v5 }
  0xe2   :  { %2502 = vmatpush3.bf16.msra.mxu0 %v4403_v39  ;;  %v4406_v41 = vand.u32 4294901760, %v3705_v48  ;;  %v3784_v33 = vsub.f32 %v3707_v19, %v4407_v12 }
  0xe3   :  { %v1307_v24 = vsub.f32 %v3695_v5, %v4405_v1  ;;  %2542 = vmatpush3.bf16.msra.mxu1 %v4338_v57  ;;  %2504 = vmatprep.subr.bf16.mxu0 %v4408_v22  ;;  %v4409_v1 = vand.u32 4294901760, %v3720_v51  ;;  %v4411_v57 = vand.u32 4294901760, %v3716_v56  ;;  %v1327_v39 = vand.u32 4294901760, %v3764_v30 }
  0xe4   :  { %v3779_v25 = vsub.f32 %v3705_v48, %v4406_v41  ;;  %v4410_v41 = vand.u32 4294901760, %v3722_v26  ;;  %2576 = vmatprep.subr.bf16.mxu1 %v2575_v59  ;;  %v4414_v59 = vld [vmem:[#allocation36_spill] sm:$0xff]  ;;  %v1189_v12 = vand.u32 4294901760, %v1188_v43  ;;  %v4248_v27 = vand.u32 4294901760, %v3784_v33  ;;  %v4417_v43 = vld [vmem:[#allocation37_spill] sm:$0xff] }
  0xe5   :  { %v3793_v5 = vsub.f32 %v3720_v51, %v4409_v1  ;;  %v1314_v22 = vsub.f32 %v3716_v56, %v4411_v57  ;;  %v4412_v1 = vand.u32 4294901760, %v3465_v35  ;;  %v1308_v51 = vand.u32 4294901760, %v1307_v24 }
  0xe6   :  { %v3798_v29 = vsub.f32 %v3722_v26, %v4410_v41  ;;  %v2583_v41 = vpack.c.bf16 %v1301_v11, %v1294_v8  ;;  %v1182_v26 = vand.u32 4294901760, %v1181_v45  ;;  %1032 = vmatmul.mubr.f32.vlgmr.msra.gmra.mrb[4].mxu1 %v3331_v2  ;;  %2506 = vmatpush3.bf16.msra.mxu0 %v4414_v59  ;;  %v1208_v57 = vand.u32 4294901760, %v3779_v25 }
  0xe7   :  { %v3810_v14 = vpack.c.bf16 %v4413_v23, %v4412_v1  ;;  %2578 = vmatpush3.bf16.msra.mxu1 %v3685_v0  ;;  %1374 = vmatprep.mubr.f32.mxu1 %v3710_v16  ;;  %v1195_v23 = vsub.f32 %v3741_v10, %v4415_v38  ;;  %v4416_v8 = vand.u32 4294901760, %v3746_v37  ;;  %v4418_v11 = vand.u32 4294901760, %v3752_v21 }
  0xe8   :  { %2508 = vmatprep.subr.bf16.mxu0 %v4417_v43  ;;  %2580 = vmatprep.subr.bf16.mxu1 %v2579_v9  ;;  %v1315_v45 = vand.u32 4294901760, %v1314_v22  ;;  %v4419_v55 = vand.u32 4294901760, %v3759_v44  ;;  %v1328_v59 = vsub.f32 %v3764_v30, %v1327_v39  ;;  %v4420_v38 = vand.u32 4294901760, %v3489_v36  ;;  %v4422_v9 = vld [vmem:[#allocation38_spill] sm:$0xff] }
  0xe9   :  { %v1202_v35 = vsub.f32 %v3746_v37, %v4416_v8  ;;  %v1136_v0 = vsub.f32 %v3752_v21, %v4418_v11  ;;  %v4421_v8 = vand.u32 4294901760, %v3491_v60  ;;  %v2585_v43 = vpack.c.bf16 %v1189_v12, %v1182_v26 }
  0xea   :  { %v1321_v1 = vsub.f32 %v3759_v44, %v4419_v55  ;;  %2510 = vmatpush3.bf16.msra.mxu0 %v4422_v9  ;;  %v4423_v11 = vand.u32 4294901760, %v3507_v40  ;;  %v4424_v22 = vand.u32 4294901760, %v3523_v6  ;;  %v1209_v55 = vsub.f32 %v3779_v25, %v1208_v57 }
  0xeb   :  { %v3840_v24 = vpack.c.bf16 %v4421_v8, %v4420_v38  ;;  %v1216_v36 = vsub.f32 %v3784_v33, %v4248_v27  ;;  %2582 = vmatpush3.bf16.msra.mxu1 %v2581_v18  ;;  %2544 = vmatprep.subr.bf16.mxu0 %v3810_v14  ;;  %v1196_v60 = vand.u32 4294901760, %v1195_v23  ;;  %v1203_v38 = vand.u32 4294901760, %v1202_v35 }
  0xec   :  { %v3847_v46 = vpack.c.bf16 %v4424_v22, %v4423_v11  ;;  %v4425_v26 = vand.u32 4294901760, %v3793_v5  ;;  %v4426_v6 = vand.u32 4294901760, %v3798_v29  ;;  %2584 = vmatprep.subr.bf16.mxu1 %v2583_v41  ;;  %v1137_v8 = vand.u32 4294901760, %v1136_v0 }
  0xed   :  { %v2587_v9 = vpack.c.bf16 %v1315_v45, %v1308_v51  ;;  %v1322_v11 = vand.u32 4294901760, %v1321_v1  ;;  %v1329_v22 = vand.u32 4294901760, %v1328_v59  ;;  %928 = vmatmul.mubr.f32.vlgmr.msra.gmra.mrb[4].mxu0 %v3331_v2  ;;  %v4427_v18 = vand.u32 4294901760, %v3553_v52 }
  0xee   :  { %v1335_v40 = vsub.f32 %v3793_v5, %v4425_v26  ;;  %v1342_v12 = vsub.f32 %v3798_v29, %v4426_v6  ;;  %v4428_v23 = vand.u32 4294901760, %v3580_v31  ;;  %2546 = vmatpush3.bf16.msra.mxu0 %v3840_v24  ;;  %1138 = vmatprep.mubr.f32.mxu0 %v1137_v8  ;;  %v1210_v26 = vand.u32 4294901760, %v1209_v55 }
  0xef   :  { %v1217_v27 = vand.u32 4294901760, %v1216_v36  ;;  %v4429_v6 = vand.u32 4294901760, %v3398_v42  ;;  %v4430_v51 = vand.u32 4294901760, %v3403_v17  ;;  %2586 = vmatpush3.bf16.msra.mxu1 %v2585_v43  ;;  %2548 = vmatprep.subr.bf16.mxu0 %v3847_v46  ;;  %v2589_v2 = vpack.c.bf16 %v1203_v38, %v1196_v60 }
  0xf0   :  { %v3867_v35 = vpack.c.bf16 %v4428_v23, %v4427_v18  ;;  %v4431_v52 = vand.u32 4294901760, %v3592_v28  ;;  %v4432_v31 = vand.u32 4294901760, %v3594_v32  ;;  %v1336_v1 = vand.u32 4294901760, %v1335_v40  ;;  %2588 = vmatprep.subr.bf16.mxu1 %v2587_v9 }
  0xf1   :  { %v1223_v41 = vsub.f32 %v3398_v42, %v4429_v6  ;;  %v1230_v0 = vsub.f32 %v3403_v17, %v4430_v51  ;;  %v1343_v59 = vand.u32 4294901760, %v1342_v12  ;;  %v2591_v55 = vpack.c.bf16 %v1329_v22, %v1322_v11 }
  0xf2   :  { %v3881_v45 = vpack.c.bf16 %v4432_v31, %v4431_v52  ;;  %v4433_v36 = vand.u32 4294901760, %v3420_v61  ;;  %v4434_v18 = vand.u32 4294901760, %v3425_v53  ;;  %v4435_v60 = vand.u32 4294901760, %v3622_v50  ;;  %2550 = vmatpush3.bf16.msra.mxu0 %v3867_v35 }
  0xf3   :  { %v4436_v28 = vand.u32 4294901760, %v3632_v63  ;;  %v2593_v32 = vpack.c.bf16 %v1217_v27, %v1210_v26  ;;  %v4437_v40 = vand.u32 4294901760, %v3634_v62  ;;  %v4438_v12 = vand.u32 4294901760, %v3654_v58  ;;  %2590 = vmatpush3.bf16.msra.mxu1 %v2589_v2 }
  0xf4   :  { %v1349_v8 = vsub.f32 %v3420_v61, %v4433_v36  ;;  %v1356_v43 = vsub.f32 %v3425_v53, %v4434_v18  ;;  %v1224_v11 = vand.u32 4294901760, %v1223_v41  ;;  %v1231_v22 = vand.u32 4294901760, %v1230_v0  ;;  %2552 = vmatprep.subr.bf16.mxu0 %v3881_v45  ;;  %2592 = vmatprep.subr.bf16.mxu1 %v2591_v55 }
  0xf5   :  { %v3893_v38 = vpack.c.bf16 %v4436_v28, %v4435_v60  ;;  %v3900_v9 = vpack.c.bf16 %v4438_v12, %v4437_v40  ;;  %v2595_v23 = vpack.c.bf16 %v1343_v59, %v1336_v1  ;;  %v4439_v50 = vand.u32 4294901760, %v3442_v47 }
  0xf6   :  { %v4440_v6 = vand.u32 4294901760, %v3447_v54  ;;  %v1350_v62 = vand.u32 4294901760, %v1349_v8  ;;  %v1357_v26 = vand.u32 4294901760, %v1356_v43  ;;  %v4441_v58 = vand.u32 4294901760, %v3452_v13 }
  0xf7   :  { %v1237_v63 = vsub.f32 %v3442_v47, %v4439_v50  ;;  %v4442_v51 = vand.u32 4294901760, %v3457_v7  ;;  %2554 = vmatpush3.bf16.msra.mxu0 %v3893_v38  ;;  %v4443_v2 = vand.u32 4294901760, %v3669_v4  ;;  %v4444_v52 = vand.u32 4294901760, %v3671_v34  ;;  %2594 = vmatpush3.bf16.msra.mxu1 %v2593_v32  ;;  %v4453_v50 = vld [vmem:[#allocation29_spill] sm:$0xff] }
  0xf8   :  { %v1244_v27 = vsub.f32 %v3447_v54, %v4440_v6  ;;  %v1363_v41 = vsub.f32 %v3452_v13, %v4441_v58  ;;  %v2597_v1 = vpack.c.bf16 %v1231_v22, %v1224_v11  ;;  %v4445_v59 = vand.u32 4294901760, %v3680_v49  ;;  %2556 = vmatprep.subr.bf16.mxu0 %v3900_v9  ;;  %2596 = vmatprep.subr.bf16.mxu1 %v2595_v23  ;;  %v4451_v11 = vld [vmem:[#allocation28_spill] sm:$0xff] }
  0xf9   :  { %v1370_v0 = vsub.f32 %v3457_v7, %v4442_v51  ;;  %v3920_v31 = vpack.c.bf16 %v4444_v52, %v4443_v2  ;;  %v4446_v55 = vand.u32 4294901760, %v3682_v3  ;;  %v1238_v8 = vand.u32 4294901760, %v1237_v63  ;;  %v4458_v51 = vld [vmem:[#allocation41_spill] sm:$0xff] }
  0xfa   :  { %v1245_v18 = vand.u32 4294901760, %v1244_v27  ;;  %v4447_v43 = vand.u32 4294901760, %v3474_v15  ;;  %v4448_v34 = vand.u32 4294901760, %v3479_v20  ;;  %v2599_v28 = vpack.c.bf16 %v1357_v26, %v1350_v62  ;;  %v4455_v27 = vld [vmem:[#allocation39_spill] sm:$0xff] }
  0xfb   :  { %v3926_v36 = vpack.c.bf16 %v4446_v55, %v4445_v59  ;;  %v1364_v49 = vand.u32 4294901760, %v1363_v41  ;;  %v1371_v40 = vand.u32 4294901760, %v1370_v0  ;;  %2558 = vmatpush3.bf16.msra.mxu0 %v3920_v31  ;;  %v4449_v3 = vand.u32 4294901760, %v3705_v48  ;;  %2598 = vmatpush3.bf16.msra.mxu1 %v2597_v1  ;;  %v4460_v59 = vld [vmem:[#allocation11_spill] sm:$0xff] }
  0xfc   :  { %v1251_v4 = vsub.f32 %v3474_v15, %v4447_v43  ;;  %v1258_v60 = vsub.f32 %v3479_v20, %v4448_v34  ;;  %v4450_v32 = vand.u32 4294901760, %v3707_v19  ;;  %v4452_v22 = vand.u32 4294901760, %v4451_v11  ;;  %2600 = vmatprep.subr.bf16.mxu1 %v2599_v28  ;;  %v4456_v19 = vld [vmem:[#allocation40_spill] sm:$0xff]  ;;  %v4470_v11 = vld [vmem:[#allocation45_spill] sm:$0xff] }
  0xfd   :  { %v4454_v63 = vand.u32 4294901760, %v4453_v50  ;;  %v3949_v58 = vand.u32 4294901760, %v4455_v27  ;;  %2560 = vmatprep.subr.bf16.mxu0 %v3926_v36  ;;  %v2601_v23 = vpack.c.bf16 %v1245_v18, %v1238_v8  ;;  %v2603_v48 = vpack.c.bf16 %v1371_v40, %v1364_v49  ;;  %v4462_v8 = vld [vmem:[#allocation42_spill] sm:$0xff] }
  0xfe   :  { %v3940_v12 = vpack.c.bf16 %v4450_v32, %v4449_v3  ;;  %v1252_v62 = vand.u32 4294901760, %v1251_v4  ;;  %v1259_v26 = vand.u32 4294901760, %v1258_v60  ;;  %v4457_v41 = vand.u32 4294901760, %v4456_v19  ;;  %v4464_v4 = vld [vmem:[#allocation14_spill] sm:$0xff]  ;;  %v4466_v60 = vld [vmem:[#allocation43_spill] sm:$0xff]  ;;  %v4468_v3 = vld [vmem:[#allocation44_spill] sm:$0xff] }
  0xff   :  { %v3946_v6 = vpack.c.bf16 %v4454_v63, %v4452_v22  ;;  %v4459_v0 = vand.u32 4294901760, %v4458_v51  ;;  %v3961_v52 = vsub.f32 %v4455_v27, %v3949_v58  ;;  %2602 = vmatpush3.bf16.msra.mxu1 %v2601_v23  ;;  %v4461_v55 = vand.u32 4294901760, %v4460_v59  ;;  %v4472_v63 = vld [vmem:[#allocation17_spill] sm:$0xff]  ;;  %v4474_v23 = vld [vmem:[#allocation46_spill] sm:$0xff]  ;;  %v4478_v51 = vld [vmem:[#allocation8_spill] sm:$0xff] }
 0x100   :  { %2562 = vmatpush3.bf16.msra.mxu0 %v3940_v12  ;;  %v2605_v1 = vpack.c.bf16 %v1259_v26, %v1252_v62  ;;  %v4463_v18 = vand.u32 4294901760, %v4462_v8  ;;  %2604 = vmatprep.subr.bf16.mxu1 %v2603_v48  ;;  %v4465_v34 = vand.u32 4294901760, %v4464_v4  ;;  %v4467_v28 = vand.u32 4294901760, %v4466_v60  ;;  %v4480_v59 = vld [vmem:[#allocation15_spill] sm:$0xff]  ;;  %v4482_v4 = vld [vmem:[#allocation18_spill] sm:$0xff]  ;;  %v4483_v60 = vld [vmem:[#allocation21_spill] sm:$0xff] }
 0x101   :  { %v3957_v2 = vpack.c.bf16 %v4459_v0, %v4457_v41  ;;  %2564 = vmatprep.subr.bf16.mxu0 %v3946_v6  ;;  %v1141_v40 = vand.u32 4294901760, %v3961_v52  ;;  %v4469_v32 = vand.u32 4294901760, %v4468_v3  ;;  %v4471_v22 = vand.u32 4294901760, %v4470_v11  ;;  %v4477_v41 = vld [vmem:[#allocation12_spill] sm:$0xff] }
 0x102   :  { %v3968_v43 = vpack.c.bf16 %v4463_v18, %v4461_v55  ;;  %v3975_v49 = vpack.c.bf16 %v4467_v28, %v4465_v34  ;;  %v4473_v27 = vand.u32 4294901760, %v4472_v63  ;;  %v4475_v62 = vand.u32 4294901760, %v4474_v23  ;;  %v4481_v18 = vld [vmem:[#allocation19_spill] sm:$0xff]  ;;  %v4484_v28 = vld [vmem:[#allocation20_spill] sm:$0xff]  ;;  %v4487_v63 = vld [vmem:[#allocation25_spill] sm:$0xff] }
 0x103   :  { %2606 = vmatpush3.bf16.msra.mxu1 %v2605_v1  ;;  %v3984_v50 = vpack.c.bf16 %v4471_v22, %v4469_v32  ;;  %v4476_v48 = vand.u32 4294901760, %v3752_v21  ;;  %v1142_v19 = vsub.f32 %v3961_v52, %v1141_v40  ;;  %v2607_v0 = vpack.c.bf16 %v4478_v51, %v4477_v41  ;;  %v4479_v1 = vld [vmem:[#allocation16_spill] sm:$0xff]  ;;  %v4485_v32 = vld [vmem:[#allocation23_spill] sm:$0xff] }
 0x104   :  { %2566 = vmatpush3.bf16.msra.mxu0 %v3957_v2  ;;  %2640 = vmatprep.subr.bf16.mxu1 %v3810_v14  ;;  %v3992_v26 = vpack.c.bf16 %v4475_v62, %v4473_v27  ;;  %v2609_v55 = vpack.c.bf16 %v4480_v59, %v4479_v1  ;;  %v2611_v34 = vpack.c.bf16 %v4482_v4, %v4481_v18  ;;  %v4486_v11 = vld [vmem:[#allocation24_spill] sm:$0xff]  ;;  %v4488_v27 = vld [vmem:[#allocation26_spill] sm:$0xff]  ;;  %v4489_v62 = vld [vmem:[#allocation27_spill] sm:$0xff] }
 0x105   :  { %2568 = vmatprep.subr.bf16.mxu0 %v3968_v43  ;;  %v1143_v8 = vand.u32 4294901760, %v1142_v19  ;;  %v2613_v3 = vpack.c.bf16 %v4484_v28, %v4483_v60  ;;  %v2615_v22 = vpack.c.bf16 %v4486_v11, %v4485_v32  ;;  %v2617_v23 = vpack.c.bf16 %v4488_v27, %v4487_v63 }
 0x106   :  { %1376 = vmatmul.mubr.f32.vlgmr.msra.gmra.mrb[6].mxu1 %v3949_v58  ;;  %v2623_v19 = vpack.c.bf16 %v3764_v30, %v3759_v44  ;;  %v4510_v30 = vld [vmem:[#allocation47_spill] sm:$0xff] }
 0x107   :  { %2642 = vmatpush3.bf16.msra.mxu1 %v3840_v24  ;;  %1618 = vmatprep.mubr.f32.mxu1 %v4476_v48  ;;  %v2621_v48 = vpack.c.bf16 %v3746_v37, %v3741_v10 }
 0x108   :  { %2570 = vmatpush3.bf16.msra.mxu0 %v3975_v49  ;;  %2644 = vmatprep.subr.bf16.mxu1 %v3847_v46 }
 0x109   :  { %2572 = vmatprep.subr.bf16.mxu0 %v3984_v50 }
 0x10b   :  { %2646 = vmatpush3.bf16.msra.mxu1 %v3867_v35 }
 0x10c   :  { %2574 = vmatpush3.bf16.msra.mxu0 %v3992_v26  ;;  %2648 = vmatprep.subr.bf16.mxu1 %v3881_v45 }
 0x10d   :  { %2608 = vmatprep.subr.bf16.mxu0 %v2607_v0  ;;  %v2625_v0 = vpack.c.bf16 %v3784_v33, %v3779_v25  ;;  %v4514_v25 = vld [vmem:[#allocation13_spill] sm:$0xff] }
 0x10f   :  { %1144 = vmatmul.mubr.f32.vlgmr.msra.gmra.mrb[6].mxu0 %v1143_v8  ;;  %2650 = vmatpush3.bf16.msra.mxu1 %v3893_v38  ;;  %v2629_v8 = vpack.c.bf16 %v3403_v17, %v3398_v42  ;;  %v2635_v42 = vpack.c.bf16 %v3457_v7, %v3452_v13  ;;  %v2637_v17 = vpack.c.bf16 %v3479_v20, %v3474_v15  ;;  %v4494_v7 = vand.u32 4294901760, %v4481_v18 }
 0x110   :  { %2610 = vmatpush3.bf16.msra.mxu0 %v2609_v55  ;;  %1511 = vmatprep.mubr.f32.mxu0 %v3752_v21  ;;  %v2619_v21 = vpack.c.bf16 %v3716_v56, %v4489_v62  ;;  %v2627_v55 = vpack.c.bf16 %v3798_v29, %v3793_v5  ;;  %v4495_v15 = vand.u32 4294901760, %v4482_v4  ;;  %v4504_v18 = vand.u32 4294901760, %v3741_v10 }
 0x111   :  { %2612 = vmatprep.subr.bf16.mxu0 %v2611_v34  ;;  %2652 = vmatprep.subr.bf16.mxu1 %v3900_v9  ;;  %v2631_v34 = vpack.c.bf16 %v3425_v53, %v3420_v61  ;;  %v4490_v61 = vand.u32 4294901760, %v4477_v41  ;;  %v4491_v53 = vand.u32 4294901760, %v4478_v51  ;;  %v4499_v41 = vand.u32 4294901760, %v4486_v11 }
 0x112   :  { %v2675_v20 = vpack.c.bf16 %v4495_v15, %v4494_v7  ;;  %v4508_v10 = vand.u32 4294901760, %v3793_v5  ;;  %v4512_v5 = vld [vmem:[#allocation9_spill] sm:$0xff] }
 0x113   :  { %2654 = vmatpush3.bf16.msra.mxu1 %v3920_v31 }
 0x114   :  { %2614 = vmatpush3.bf16.msra.mxu0 %v2613_v3  ;;  %2656 = vmatprep.subr.bf16.mxu1 %v3926_v36  ;;  %v2633_v3 = vpack.c.bf16 %v3447_v54, %v3442_v47  ;;  %v2671_v47 = vpack.c.bf16 %v4491_v53, %v4490_v61  ;;  %v4493_v54 = vand.u32 4294901760, %v4480_v59 }
 0x115   :  { %2616 = vmatprep.subr.bf16.mxu0 %v2615_v22 }
 0x117   :  { %2658 = vmatpush3.bf16.msra.mxu1 %v3940_v12 }
 0x118   :  { %2618 = vmatpush3.bf16.msra.mxu0 %v2617_v23  ;;  %2660 = vmatprep.subr.bf16.mxu1 %v3946_v6 }
 0x119   :  { %2620 = vmatprep.subr.bf16.mxu0 %v2619_v21 }
 0x11b   :  { %2662 = vmatpush3.bf16.msra.mxu1 %v3957_v2 }
 0x11c   :  { %2622 = vmatpush3.bf16.msra.mxu0 %v2621_v48  ;;  %2664 = vmatprep.subr.bf16.mxu1 %v3968_v43 }
 0x11d   :  { %2624 = vmatprep.subr.bf16.mxu0 %v2623_v19 }
 0x11f   :  { %2666 = vmatpush3.bf16.msra.mxu1 %v3975_v49 }
 0x120   :  { %2626 = vmatpush3.bf16.msra.mxu0 %v2625_v0  ;;  %2668 = vmatprep.subr.bf16.mxu1 %v3984_v50 }
 0x121   :  { %2628 = vmatprep.subr.bf16.mxu0 %v2627_v55 }
 0x123   :  { %2670 = vmatpush3.bf16.msra.mxu1 %v3992_v26 }
 0x124   :  { %2630 = vmatpush3.bf16.msra.mxu0 %v2629_v8  ;;  %2704 = vmatprep.subr.bf16.mxu1 %v3810_v14  ;;  %v4492_v14 = vand.u32 4294901760, %v4479_v1  ;;  %v4502_v1 = vand.u32 4294901760, %v4489_v62 }
 0x125   :  { %2632 = vmatprep.subr.bf16.mxu0 %v2631_v34 }
 0x126   :  { %1622 = vmatmul.mubr.f32.vlgmr.msra.gmra.mrb[8].mxu1 %v1141_v40  ;;  %v2673_v13 = vpack.c.bf16 %v4493_v54, %v4492_v14 }
 0x127   :  { %2706 = vmatpush3.bf16.msra.mxu1 %v3840_v24  ;;  %1892 = vmatprep.mubr.f32.mxu1 %v3710_v16  ;;  %v4497_v24 = vand.u32 4294901760, %v4484_v28 }
 0x128   :  { %2634 = vmatpush3.bf16.msra.mxu0 %v2633_v3  ;;  %2708 = vmatprep.subr.bf16.mxu1 %v3847_v46  ;;  %v4496_v46 = vand.u32 4294901760, %v4483_v60  ;;  %v4506_v60 = vand.u32 4294901760, %v3759_v44  ;;  %v4511_v44 = vld [vmem:[#allocation10_spill] sm:$0xff] }
 0x129   :  { %2636 = vmatprep.subr.bf16.mxu0 %v2635_v42 }
 0x12a   :  { %v2677_v40 = vpack.c.bf16 %v4497_v24, %v4496_v46 }
 0x12b   :  { %2710 = vmatpush3.bf16.msra.mxu1 %v3867_v35  ;;  %v4498_v35 = vand.u32 4294901760, %v4485_v32 }
 0x12c   :  { %2638 = vmatpush3.bf16.msra.mxu0 %v2637_v17  ;;  %2712 = vmatprep.subr.bf16.mxu1 %v3881_v45  ;;  %v4500_v45 = vand.u32 4294901760, %v4487_v63 }
 0x12d   :  { %2672 = vmatprep.subr.bf16.mxu0 %v2671_v47  ;;  %v2679_v51 = vpack.c.bf16 %v4499_v41, %v4498_v35 }
 0x12f   :  { %1514 = vmatmul.mubr.f32.vlgmr.msra.gmra.mrb[8].mxu0 %v3961_v52  ;;  %2714 = vmatpush3.bf16.msra.mxu1 %v3893_v38  ;;  %v4503_v38 = vand.u32 4294901760, %v3716_v56  ;;  %v4507_v56 = vand.u32 4294901760, %v3784_v33 }
 0x130   :  { %2674 = vmatpush3.bf16.msra.mxu0 %v2673_v13  ;;  %1788 = vmatprep.mubr.f32.mxu0 %v3710_v16  ;;  %v4501_v16 = vand.u32 4294901760, %v4488_v27 }
 0x131   :  { %2676 = vmatprep.subr.bf16.mxu0 %v2675_v20  ;;  %2716 = vmatprep.subr.bf16.mxu1 %v3900_v9  ;;  %v2683_v59 = vpack.c.bf16 %v4503_v38, %v4502_v1  ;;  %v4505_v9 = vand.u32 4294901760, %v3746_v37  ;;  %v4509_v37 = vand.u32 4294901760, %v3798_v29  ;;  %v4513_v29 = vld [vmem:[#allocation22_spill] sm:$0xff] }
 0x132   :  { %v2681_v52 = vpack.c.bf16 %v4501_v16, %v4500_v45 }
 0x133   :  { %2718 = vmatpush3.bf16.msra.mxu1 %v3920_v31  ;;  %v2685_v4 = vpack.c.bf16 %v4505_v9, %v4504_v18  ;;  %v2687_v31 = vpack.c.bf16 %v1327_v39, %v4506_v60 }
 0x134   :  { %2678 = vmatpush3.bf16.msra.mxu0 %v2677_v40  ;;  %2720 = vmatprep.subr.bf16.mxu1 %v3926_v36  ;;  %v2689_v36 = vpack.c.bf16 %v4507_v56, %v1208_v57 }
 0x135   :  { %2680 = vmatprep.subr.bf16.mxu0 %v2679_v51 }
 0x137   :  { %2722 = vmatpush3.bf16.msra.mxu1 %v3940_v12  ;;  %v2691_v12 = vpack.c.bf16 %v4509_v37, %v4508_v10 }
 0x138   :  { %2682 = vmatpush3.bf16.msra.mxu0 %v2681_v52  ;;  %2724 = vmatprep.subr.bf16.mxu1 %v3946_v6 }
 0x139   :  { %2684 = vmatprep.subr.bf16.mxu0 %v2683_v59 }
 0x13b   :  { %2726 = vmatpush3.bf16.msra.mxu1 %v3957_v2 }
 0x13c   :  { %2686 = vmatpush3.bf16.msra.mxu0 %v2685_v4  ;;  %2728 = vmatprep.subr.bf16.mxu1 %v3968_v43 }
 0x13d   :  { %2688 = vmatprep.subr.bf16.mxu0 %v2687_v31 }
 0x13f   :  { %2730 = vmatpush3.bf16.msra.mxu1 %v3975_v49 }
 0x140   :  { %2690 = vmatpush3.bf16.msra.mxu0 %v2689_v36  ;;  %2732 = vmatprep.subr.bf16.mxu1 %v3984_v50 }
 0x141   :  { %2692 = vmatprep.subr.bf16.mxu0 %v2691_v12 }
 0x143   :  { %2734 = vmatpush3.bf16.msra.mxu1 %v3992_v26 }
 0x144   :  { %2694 = vmatpush3.bf16.msra.mxu0 %v4510_v30 }
 0x145   :  { %2696 = vmatprep.subr.bf16.mxu0 %v4511_v44 }
 0x146   :  { %1894 = vmatmul.mubr.f32.vlgmr.msra.gmra.mrb[10].mxu1 %v3949_v58 }
 0x148   :  { %2698 = vmatpush3.bf16.msra.mxu0 %v4512_v5 }
 0x149   :  { %2700 = vmatprep.subr.bf16.mxu0 %v4513_v29 }
 0x14c   :  { %2702 = vmatpush3.bf16.msra.mxu0 %v4514_v25 }
 0x14f   :  { %1790 = vmatmul.mubr.f32.vlgmr.msra.gmra.mrb[10].mxu0 %v3949_v58 }
 0x178   :  { %v1998_v33 = vpop.f32.mrb[0].mxu1 }
 0x179   :  { %v1999_v39 = vpop.f32.mrb[1].mxu1 }
 0x17a   :  { %v2000_v57 = vadd.f32 %v1999_v39, %v1998_v33 }
 0x180   :  { %v1963_v6 = vpop.f32.mrb[0].mxu0 }
 0x181   :  { %v1964_v2 = vpop.f32.mrb[1].mxu0 }
 0x182   :  { %v1965_v43 = vadd.f32 %v1964_v2, %v1963_v6 }
 0x184   :  { %v516_v49 = vadd.f32 %v2000_v57, %v1965_v43 }
 0x198   :  { %v2068_v50 = vpop.f32.mrb[2].mxu1 }
 0x199   :  { %v2069_v26 = vpop.f32.mrb[3].mxu1 }
 0x19a   :  { %v2070_v28 = vadd.f32 %v2069_v26, %v2068_v50 }
 0x1a0   :  { %v2033_v32 = vpop.f32.mrb[2].mxu0 }
 0x1a1   :  { %v2034_v11 = vpop.f32.mrb[3].mxu0 }
 0x1a2   :  { %v2035_v22 = vadd.f32 %v2034_v11, %v2033_v32 }
 0x1a4   :  { %v654_v63 = vadd.f32 %v2035_v22, %v516_v49 }
 0x1a6   :  { %v762_v27 = vadd.f32 %v2070_v28, %v654_v63 }
 0x1b9   :  { %v2138_v23 = vpop.f32.mrb[4].mxu1 }
 0x1ba   :  { %v2139_v62 = vpop.f32.mrb[5].mxu1 }
 0x1bb   :  { %v2140_v21 = vadd.f32 %v2139_v62, %v2138_v23 }
 0x1c0   :  { %v2103_v48 = vpop.f32.mrb[4].mxu0 }
 0x1c1   :  { %v2104_v58 = vpop.f32.mrb[5].mxu0 }
 0x1c2   :  { %v2105_v19 = vadd.f32 %v2104_v58, %v2103_v48 }
 0x1c4   :  { %v930_v0 = vadd.f32 %v2105_v19, %v762_v27 }
 0x1c6   :  { %v1034_v55 = vadd.f32 %v2140_v21, %v930_v0 }
 0x1d9   :  { %v2208_v8 = vpop.f32.mrb[6].mxu1 }
 0x1da   :  { %v2209_v34 = vpop.f32.mrb[7].mxu1 }
 0x1db   :  { %v2210_v3 = vadd.f32 %v2209_v34, %v2208_v8 }
 0x1e2   :  { %v2173_v42 = vpop.f32.mrb[6].mxu0 }
 0x1e3   :  { %v2174_v17 = vpop.f32.mrb[7].mxu0 }
 0x1e4   :  { %v2175_v61 = vadd.f32 %v2174_v17, %v2173_v42 }
 0x1e6   :  { %v1146_v53 = vadd.f32 %v2175_v61, %v1034_v55 }
 0x1e8   :  { %v1378_v47 = vadd.f32 %v2210_v3, %v1146_v53 }
 0x1f9   :  { %v2278_v14 = vpop.f32.mrb[8].mxu1 }
 0x1fa   :  { %v2279_v54 = vpop.f32.mrb[9].mxu1 }
 0x1fb   :  { %v2280_v13 = vadd.f32 %v2279_v54, %v2278_v14 }
 0x202   :  { %v2243_v7 = vpop.f32.mrb[8].mxu0 }
 0x203   :  { %v2244_v15 = vpop.f32.mrb[9].mxu0 }
 0x204   :  { %v2245_v20 = vadd.f32 %v2244_v15, %v2243_v7 }
 0x206   :  { %v1516_v46 = vadd.f32 %v2245_v20, %v1378_v47 }
 0x208   :  { %v1624_v24 = vadd.f32 %v2280_v13, %v1516_v46 }
 0x219   :  { %v2348_v40 = vpop.f32.mrb[10].mxu1 }
 0x21a   :  { %v2349_v35 = vpop.f32.mrb[11].mxu1 }
 0x21b   :  { %v2350_v41 = vadd.f32 %v2349_v35, %v2348_v40 }
 0x222   :  { %v2313_v51 = vpop.f32.mrb[10].mxu0 }
 0x223   :  { %v2314_v45 = vpop.f32.mrb[11].mxu0 }
 0x224   :  { %v2315_v16 = vadd.f32 %v2314_v45, %v2313_v51 }
 0x226   :  { %v1792_v52 = vadd.f32 %v2315_v16, %v1624_v24 }
 0x228   :  { %v1896_v1 = vadd.f32 %v2350_v41, %v1792_v52 }
 0x22a   :  { %1899 = vst [vmem:[#allocation5] sm:$0xff] %v1896_v1 }
 0x22b   :  { %2782 = shalt.err (!%p2779_p12)
}
 0x22c   :  { %s2783_s28 = scalar_lea.hbm %s4131_s2, 128 }
 0x22d   :  { %p2784_p13 = scmp.ne.s32.totalorder %s4131_s2, %s2783_s28  ;;  %p2787_p0 = scmp.lt.u32.totalorder %s2783_s28, %s4131_s2 }
 0x22f   :  { %p2789_p1 = pnand %p2787_p0, %p2784_p13 }
 0x231   :  { %2792 = shalt.err (!%p2789_p1)
}
 0x232   :  { %1909 = dma.vmem_to_hbm [thread:$0]  %s1907_s1, 128, %s4131_s2, [#allocation4]  }
 0x233   :  { %2795 = dma.done.wait [#allocation4], 128  }
 0x234   :  { %2796 = vsyncadd [#allocation4], 4294967168 }
 0x235   :  { %1913 = vsyncpa [#allocation3], 1 }
 0x236   :  { %1914 = vsyncpa [#allocation4], 1 }

// kernel: tpu_custom_call.1
= control target key start
LH: loop header
LB: loop body
LE: loop exit
PB: predicated region body
PF: predicated region fallthrough
CT: control target
= control target key end

     0   :  { %7 = vsyncpa [#allocation3], 0  ;;  %s4129_s0 = inlined_call_operand.vmem [shape: s32[8,4], index: 0, kind: input, shape index: {}]   ;;  %s4130_s1 = inlined_call_operand.hbm [shape: f32[512,128], index: 1, kind: input, shape index: {}]   ;;  %s4131_s2 = inlined_call_operand.hbm [shape: f32[8,128], index: 2, kind: output, shape index: {}]  }
   0x1   :  { %8 = vsyncpa [#allocation4], 0  ;;  %s2797_s9 = smov [#allocation2]   ;;  %s2749_s13 = scalar_lea.hbm %s4130_s1, 8192 }
   0x2   :  { %s16_s10 = sshll.u32 %s2797_s9, 4  ;;  %p2750_p0 = scmp.ne.s32.totalorder %s4130_s1, %s2749_s13  ;;  %s17_s10 = int_to_ptr.vmem [resolvable:$true] %s16_s10 }
   0x3   :  { %p2753_p1 = scmp.lt.u32.totalorder %s2749_s13, %s4130_s1 }
   0x5   :  { %p2755_p2 = pnand %p2753_p1, %p2750_p0 }
   0x7   :  { %2758 = shalt.err (!%p2755_p2)
}
   0x8   :  { %s2759_s18 = scalar_lea.vmem %s17_s10, 8192  ;;  %p2764_p4 = scmp.lt.s32.totalorder %s17_s10, %s17_s10 }
   0x9   :  { %p2760_p3 = scmp.ne.s32.totalorder %s17_s10, %s2759_s18  ;;  %p2765_p5 = scmp.lt.s32.totalorder %s2759_s18, %s2759_s18 }
   0xb   :  { %p2766_p6 = por %p2765_p5, %p2764_p4 }
   0xd   :  { %p2767_p7 = pnand %p2766_p6, %p2760_p3 }
   0xf   :  { %2770 = shalt.err (!%p2767_p7)
}
  0x10   :  { %s2798_s19 = smov 128   ;;  %s2799_s20 = smov 8  }
  0x11   :  { %22 = dma.hbm_to_vmem [thread:$0]  %s4130_s1, 8192, %s17_s10, [#allocation3], %s2798_s19, %s2798_s19, %s2799_s20  }
  0x12   :  { %2793 = dma.done.wait [#allocation3], 8192  }
  0x13   :  { %2794 = vsyncadd [#allocation3], 4294959104  ;;  %v2800_v0 = vmov 0   ;;  %v2801_v1 = vmov 2   ;;  %v31_v2 = vld [vmem:[%s4129_s0] sm:$0xff]  ;;  %v128_v4 = vld [vmem:[#allocation2 + $0x88] sm:$0xff] }
  0x14   :  { %2744 = vset.pattern.permute.xlu0 %v2800_v0  ;;  %2746 = vset.pattern.permute.xlu1 %v2801_v1  ;;  %v2836_v3 = vld [vmem:[#allocation2 + $0x80] sm:$0xff]  ;;  %v71_v5 = vadd.s32 256, %v31_v2  ;;  %v51_v6 = vadd.s32 128, %v31_v2  ;;  %v91_v7 = vadd.s32 384, %v31_v2  ;;  %v2841_v10 = vld [vmem:[#allocation2 + $0x8] sm:$0xff]  ;;  %v227_v11 = vand.u32 4294901760, %v128_v4 }
  0x15   :  { %33 = vperm.xlu0 %2744, %v31_v2   ;;  %v224_v8 = vand.u32 4294901760, %v2836_v3  ;;  %v2839_v9 = vld [vmem:[#allocation2] sm:$0xff]  ;;  %v179_v13 = vand.u32 4294901760, %v2841_v10  ;;  %v2845_v14 = vld [vmem:[#allocation2 + $0x90] sm:$0xff]  ;;  %v2847_v15 = vld [vmem:[#allocation2 + $0x98] sm:$0xff]  ;;  %v2802_v26 = vmov 1  }
  0x16   :  { %v176_v12 = vand.u32 4294901760, %v2839_v9  ;;  %v2849_v16 = vld [vmem:[#allocation2 + $0x10] sm:$0xff]  ;;  %73 = vperm.xlu1 %2746, %v71_v5   ;;  %v230_v18 = vand.u32 4294901760, %v2845_v14  ;;  %v233_v19 = vand.u32 4294901760, %v2847_v15  ;;  %v2856_v20 = vld [vmem:[#allocation2 + $0x18] sm:$0xff]  ;;  %v2859_v22 = vsub.f32 %v128_v4, %v227_v11  ;;  %v2917_v48 = vld [vmem:[#allocation2 + $0xa0] sm:$0xff] }
  0x17   :  { %v2852_v17 = vsub.f32 %v2836_v3, %v224_v8  ;;  %v182_v21 = vand.u32 4294901760, %v2849_v16  ;;  %v2867_v24 = vsub.f32 %v2841_v10, %v179_v13  ;;  %v185_v25 = vand.u32 4294901760, %v2856_v20  ;;  %v2922_v53 = vld [vmem:[#allocation2 + $0xa8] sm:$0xff]  ;;  %v2924_v54 = vld [vmem:[#allocation2 + $0x20] sm:$0xff]  ;;  %v2931_v0 = vld [vmem:[#allocation2 + $0xb0] sm:$0xff]  ;;  %s2805_s0 = smov [#allocation5]  }
  0x18   :  { %v2864_v23 = vsub.f32 %v2839_v9, %v176_v12  ;;  %v2874_v28 = vsub.f32 %v2845_v14, %v230_v18  ;;  %v2877_v29 = vsub.f32 %v2847_v15, %v233_v19  ;;  %v4154_v31 = vand.u32 4294901760, %v2859_v22  ;;  %v2928_v59 = vld [vmem:[#allocation2 + $0x28] sm:$0xff]  ;;  %v2933_v1 = vld [vmem:[#allocation2 + $0xb8] sm:$0xff]  ;;  %s1906_s1 = sshll.u32 %s2805_s0, 4  ;;  %s1907_s1 = int_to_ptr.vmem [resolvable:$true] %s1906_s1 }
  0x19   :  { %2745 = vset.pattern.permute.xlu0 %v2802_v26  ;;  %v4155_v27 = vand.u32 4294901760, %v2852_v17  ;;  %v2882_v30 = vsub.f32 %v2849_v16, %v182_v21  ;;  %v4152_v33 = vand.u32 4294901760, %v2867_v24  ;;  %v2890_v34 = vsub.f32 %v2856_v20, %v185_v25  ;;  %v2963_v26 = vld [vmem:[#allocation2 + $0x38] sm:$0xff]  ;;  %s2771_s25 = scalar_lea.vmem %s1907_s1, 128  ;;  %p2776_p9 = scmp.lt.s32.totalorder %s1907_s1, %s1907_s1 }
  0x1a   :  { %53 = vperm.xlu0 %2745, %v51_v6   ;;  %v4153_v32 = vand.u32 4294901760, %v2864_v23  ;;  %v2803_v35 = vmov 3   ;;  %v4148_v37 = vand.u32 4294901760, %v2874_v28  ;;  %v4147_v38 = vand.u32 4294901760, %v2877_v29  ;;  %v2942_v6 = vld [vmem:[#allocation2 + $0x30] sm:$0xff]  ;;  %p2772_p8 = scmp.ne.s32.totalorder %s1907_s1, %s2771_s25  ;;  %p2777_p10 = scmp.lt.s32.totalorder %s2771_s25, %s2771_s25 }
  0x1b   :  { %2747 = vset.pattern.permute.xlu1 %v2803_v35  ;;  %v403_v36 = vsub.f32 %v2852_v17, %v4155_v27  ;;  %v4145_v39 = vand.u32 4294901760, %v2882_v30  ;;  %v410_v40 = vsub.f32 %v2859_v22, %v4154_v31  ;;  %v298_v42 = vsub.f32 %v2867_v24, %v4152_v33 }
  0x1c   :  { %93 = vperm.xlu1 %2747, %v91_v7   ;;  %v291_v41 = vsub.f32 %v2864_v23, %v4153_v32  ;;  %v4144_v43 = vand.u32 4294901760, %v2890_v34  ;;  %v417_v45 = vsub.f32 %v2874_v28, %v4148_v37  ;;  %v424_v46 = vsub.f32 %v2877_v29, %v4147_v38  ;;  %v124_v37 = vld [vmem:[#allocation2 + $0x68] sm:$0xff]  ;;  %p2778_p11 = por %p2777_p10, %p2776_p9 }
  0x1d   :  { %v404_v44 = vand.u32 4294901760, %v403_v36  ;;  %v305_v47 = vsub.f32 %v2882_v30, %v4145_v39  ;;  %v411_v49 = vand.u32 4294901760, %v410_v40  ;;  %v299_v51 = vand.u32 4294901760, %v298_v42 }
  0x1e   :  { %v292_v50 = vand.u32 4294901760, %v291_v41  ;;  %v312_v52 = vsub.f32 %v2890_v34, %v4144_v43  ;;  %2748 = vset.pattern.permute.xlu0 %v2803_v35  ;;  %v418_v55 = vand.u32 4294901760, %v417_v45  ;;  %v425_v56 = vand.u32 4294901760, %v424_v46  ;;  %v3119_v43 = vld [vmem:[#allocation2 + $0x60] sm:$0xff]  ;;  %p2779_p12 = pnand %p2778_p11, %p2772_p8 }
  0x1f   :  { %v306_v57 = vand.u32 4294901760, %v305_v47  ;;  %v2926_v58 = vpack.c.bf16 %v227_v11, %v224_v8  ;;  %v2383_v60 = vpack.c.bf16 %v411_v49, %v404_v44  ;;  %v236_v63 = vand.u32 4294901760, %v2917_v48 }
  0x20   :  { %v2385_v61 = vpack.c.bf16 %v299_v51, %v292_v50  ;;  %v313_v62 = vand.u32 4294901760, %v312_v52  ;;  %v2387_v2 = vpack.c.bf16 %v425_v56, %v418_v55  ;;  %v239_v3 = vand.u32 4294901760, %v2922_v53  ;;  %v3013_v52 = vld [vmem:[#allocation2 + $0xc0] sm:$0xff] }
  0x21   :  { %4249 = vst [vmem:[#allocation8_spill] sm:$0xff] %v2926_v58  ;;  %2352 = vmatprep.subr.bf16.mxu0 %v2926_v58  ;;  %v2939_v4 = vpack.c.bf16 %v179_v13, %v176_v12  ;;  %v188_v5 = vand.u32 4294901760, %v2924_v54  ;;  %2384 = vmatprep.subr.bf16.mxu1 %v2383_v60  ;;  %v2945_v8 = vsub.f32 %v2917_v48, %v236_v63  ;;  %v191_v10 = vand.u32 4294901760, %v2928_v59 }
  0x22   :  { %v2389_v7 = vpack.c.bf16 %v313_v62, %v306_v57  ;;  %v2950_v11 = vpack.c.bf16 %v233_v19, %v230_v18  ;;  %2386 = vmatpush3.bf16.msra.mxu1 %v2385_v61  ;;  %v2953_v9 = vsub.f32 %v2922_v53, %v239_v3  ;;  %v242_v13 = vand.u32 4294901760, %v2931_v0 }
  0x23   :  { %2354 = vmatpush3.bf16.msra.mxu0 %v2939_v4  ;;  %v2959_v12 = vsub.f32 %v2924_v54, %v188_v5  ;;  %v245_v15 = vand.u32 4294901760, %v2933_v1  ;;  %2388 = vmatprep.subr.bf16.mxu1 %v2387_v2  ;;  %v4143_v14 = vand.u32 4294901760, %v2945_v8  ;;  %v2967_v18 = vsub.f32 %v2928_v59, %v191_v10  ;;  %v3021_v59 = vld [vmem:[#allocation2 + $0xc8] sm:$0xff] }
  0x24   :  { %2356 = vmatprep.subr.bf16.mxu0 %v2950_v11  ;;  %v2974_v19 = vpack.c.bf16 %v185_v25, %v182_v21  ;;  %v194_v35 = vand.u32 4294901760, %v2942_v6  ;;  %v4142_v36 = vand.u32 4294901760, %v2953_v9  ;;  %v2980_v41 = vsub.f32 %v2931_v0, %v242_v13 }
  0x25   :  { %v4141_v40 = vand.u32 4294901760, %v2959_v12  ;;  %v2983_v42 = vsub.f32 %v2933_v1, %v245_v15  ;;  %v431_v16 = vsub.f32 %v2945_v8, %v4143_v14  ;;  %v4139_v20 = vand.u32 4294901760, %v2967_v18  ;;  %v3029_v1 = vld [vmem:[#allocation2 + $0x40] sm:$0xff] }
  0x26   :  { %v197_v21 = vand.u32 4294901760, %v2963_v26  ;;  %v2993_v25 = vsub.f32 %v2942_v6, %v194_v35  ;;  %2390 = vmatpush3.bf16.msra.mxu1 %v2389_v7  ;;  %v438_v44 = vsub.f32 %v2953_v9, %v4142_v36  ;;  %v4133_v46 = vand.u32 4294901760, %v2980_v41 }
  0x27   :  { %v319_v45 = vsub.f32 %v2959_v12, %v4141_v40  ;;  %v4132_v47 = vand.u32 4294901760, %v2983_v42  ;;  %2358 = vmatpush3.bf16.msra.mxu0 %v2974_v19  ;;  %v432_v48 = vand.u32 4294901760, %v431_v16  ;;  %v326_v49 = vsub.f32 %v2967_v18, %v4139_v20 }
  0x28   :  { %v4134_v50 = vand.u32 4294901760, %v2993_v25  ;;  %v3011_v51 = vsub.f32 %v2963_v26, %v197_v21  ;;  %v439_v53 = vand.u32 4294901760, %v438_v44  ;;  %v445_v56 = vsub.f32 %v2980_v41, %v4133_v46 }
  0x29   :  { %v320_v55 = vand.u32 4294901760, %v319_v45  ;;  %v452_v57 = vsub.f32 %v2983_v42, %v4132_v47  ;;  %v327_v60 = vand.u32 4294901760, %v326_v49  ;;  %v3027_v0 = vpack.c.bf16 %v239_v3, %v236_v63  ;;  %v3032_v45 = vld [vmem:[#allocation2 + $0x48] sm:$0xff]  ;;  %v3039_v3 = vld [vmem:[#allocation2 + $0xd0] sm:$0xff] }
  0x2a   :  { %v333_v61 = vsub.f32 %v2993_v25, %v4134_v50  ;;  %v4135_v62 = vand.u32 4294901760, %v3011_v51  ;;  %v2391_v2 = vpack.c.bf16 %v439_v53, %v432_v48  ;;  %v446_v7 = vand.u32 4294901760, %v445_v56  ;;  %v3041_v50 = vld [vmem:[#allocation2 + $0xd8] sm:$0xff] }
  0x2b   :  { %v453_v16 = vand.u32 4294901760, %v452_v57  ;;  %v248_v44 = vand.u32 4294901760, %v3013_v52  ;;  %v2393_v47 = vpack.c.bf16 %v327_v60, %v320_v55  ;;  %2360 = vmatprep.subr.bf16.mxu0 %v3027_v0  ;;  %v251_v63 = vand.u32 4294901760, %v3021_v59 }
  0x2c   :  { %v334_v46 = vand.u32 4294901760, %v333_v61  ;;  %v340_v49 = vsub.f32 %v3011_v51, %v4135_v62  ;;  %2392 = vmatprep.subr.bf16.mxu1 %v2391_v2  ;;  %v3048_v55 = vpack.c.bf16 %v191_v10, %v188_v5  ;;  %v200_v56 = vand.u32 4294901760, %v3029_v1 }
  0x2d   :  { %v2395_v48 = vpack.c.bf16 %v453_v16, %v446_v7  ;;  %v3044_v53 = vsub.f32 %v3013_v52, %v248_v44  ;;  %2394 = vmatpush3.bf16.msra.mxu1 %v2393_v47  ;;  %v3052_v60 = vsub.f32 %v3021_v59, %v251_v63  ;;  %v203_v61 = vand.u32 4294901760, %v3032_v45  ;;  %v3064_v47 = vld [vmem:[#allocation2 + $0x50] sm:$0xff] }
  0x2e   :  { %v341_v57 = vand.u32 4294901760, %v340_v49  ;;  %v3055_v62 = vpack.c.bf16 %v245_v15, %v242_v13  ;;  %2362 = vmatpush3.bf16.msra.mxu0 %v3048_v55  ;;  %v3060_v54 = vsub.f32 %v3029_v1, %v200_v56  ;;  %v254_v5 = vand.u32 4294901760, %v3039_v3 }
  0x2f   :  { %2396 = vmatprep.subr.bf16.mxu1 %v2395_v48  ;;  %v4136_v2 = vand.u32 4294901760, %v3044_v53  ;;  %v257_v10 = vand.u32 4294901760, %v3041_v50  ;;  %v4137_v59 = vand.u32 4294901760, %v3052_v60  ;;  %v3068_v13 = vsub.f32 %v3032_v45, %v203_v61 }
  0x30   :  { %v2397_v52 = vpack.c.bf16 %v341_v57, %v334_v46  ;;  %2364 = vmatprep.subr.bf16.mxu0 %v3055_v62  ;;  %v4138_v1 = vand.u32 4294901760, %v3060_v54  ;;  %v3076_v7 = vsub.f32 %v3039_v3, %v254_v5  ;;  %v122_v46 = vld [vmem:[#allocation2 + $0x58] sm:$0xff]  ;;  %v3089_v48 = vpack.c.bf16 %v197_v21, %v194_v35  ;;  %v3104_v21 = vld [vmem:[#allocation2 + $0xe0] sm:$0xff] }
  0x31   :  { %v459_v15 = vsub.f32 %v3044_v53, %v4136_v2  ;;  %v3079_v16 = vsub.f32 %v3041_v50, %v257_v10  ;;  %v466_v45 = vsub.f32 %v3052_v60, %v4137_v59  ;;  %v4140_v49 = vand.u32 4294901760, %v3068_v13 }
  0x32   :  { %2398 = vmatpush3.bf16.msra.mxu1 %v2397_v52  ;;  %v206_v3 = vand.u32 4294901760, %v3064_v47  ;;  %v347_v50 = vsub.f32 %v3060_v54, %v4138_v1  ;;  %v4146_v52 = vand.u32 4294901760, %v3076_v7  ;;  %2366 = vmatpush3.bf16.msra.mxu0 %v3089_v48  ;;  %v209_v26 = vand.u32 4294901760, %v122_v46 }
  0x33   :  { %v460_v57 = vand.u32 4294901760, %v459_v15  ;;  %v4149_v2 = vand.u32 4294901760, %v3079_v16  ;;  %v467_v59 = vand.u32 4294901760, %v466_v45  ;;  %v354_v6 = vsub.f32 %v3068_v13, %v4140_v49  ;;  %v3106_v15 = vld [vmem:[#allocation2 + $0xe8] sm:$0xff] }
  0x34   :  { %v3102_v35 = vsub.f32 %v3064_v47, %v206_v3  ;;  %v348_v1 = vand.u32 4294901760, %v347_v50  ;;  %v473_v20 = vsub.f32 %v3076_v7, %v4146_v52  ;;  %v3114_v49 = vpack.c.bf16 %v251_v63, %v248_v44 }
  0x35   :  { %v480_v45 = vsub.f32 %v3079_v16, %v4149_v2  ;;  %v2399_v40 = vpack.c.bf16 %v467_v59, %v460_v57  ;;  %v355_v36 = vand.u32 4294901760, %v354_v6  ;;  %v3117_v14 = vsub.f32 %v122_v46, %v209_v26  ;;  %v141_v57 = vld [vmem:[#allocation2 + $0xf0] sm:$0xff] }
  0x36   :  { %4250 = vst [vmem:[#allocation9_spill] sm:$0xff] %v3102_v35  ;;  %v4150_v47 = vand.u32 4294901760, %v3102_v35  ;;  %v474_v39 = vand.u32 4294901760, %v473_v20  ;;  %2368 = vmatprep.subr.bf16.mxu0 %v3114_v49  ;;  %v260_v52 = vand.u32 4294901760, %v3104_v21  ;;  %v263_v38 = vand.u32 4294901760, %v3106_v15 }
  0x37   :  { %4251 = vst [vmem:[#allocation10_spill] sm:$0xff] %v3117_v14  ;;  %v481_v50 = vand.u32 4294901760, %v480_v45  ;;  %2400 = vmatprep.subr.bf16.mxu1 %v2399_v40  ;;  %v2401_v44 = vpack.c.bf16 %v355_v36, %v348_v1  ;;  %v4151_v59 = vand.u32 4294901760, %v3117_v14  ;;  %v3128_v46 = vpack.c.bf16 %v203_v61, %v200_v56  ;;  %v142_v40 = vld [vmem:[#allocation2 + $0xf8] sm:$0xff] }
  0x38   :  { %v361_v63 = vsub.f32 %v3102_v35, %v4150_v47  ;;  %v3131_v6 = vsub.f32 %v3104_v21, %v260_v52  ;;  %v3134_v45 = vsub.f32 %v3106_v15, %v263_v38  ;;  %v212_v2 = vand.u32 4294901760, %v3119_v43 }
  0x39   :  { %4252 = vst [vmem:[#allocation11_spill] sm:$0xff] %v3128_v46  ;;  %v2403_v20 = vpack.c.bf16 %v481_v50, %v474_v39  ;;  %2402 = vmatpush3.bf16.msra.mxu1 %v2401_v44  ;;  %v368_v1 = vsub.f32 %v3117_v14, %v4151_v59  ;;  %2370 = vmatpush3.bf16.msra.mxu0 %v3128_v46  ;;  %v215_v56 = vand.u32 4294901760, %v124_v37  ;;  %v266_v50 = vand.u32 4294901760, %v141_v57  ;;  %v125_v44 = vld [vmem:[#allocation2 + $0x70] sm:$0xff] }
  0x3a   :  { %4253 = vst [vmem:[#allocation12_spill] sm:$0xff] %v3131_v6  ;;  %4254 = vst [vmem:[#allocation13_spill] sm:$0xff] %v3134_v45  ;;  %v362_v36 = vand.u32 4294901760, %v361_v63  ;;  %v3141_v61 = vpack.c.bf16 %v257_v10, %v254_v5  ;;  %v4156_v39 = vand.u32 4294901760, %v3131_v6  ;;  %v4157_v21 = vand.u32 4294901760, %v3134_v45 }
  0x3b   :  { %2404 = vmatprep.subr.bf16.mxu1 %v2403_v20  ;;  %v3146_v15 = vsub.f32 %v3119_v43, %v212_v2  ;;  %v369_v63 = vand.u32 4294901760, %v368_v1  ;;  %v3148_v47 = vsub.f32 %v124_v37, %v215_v56  ;;  %v269_v59 = vand.u32 4294901760, %v142_v40  ;;  %v126_v1 = vld [vmem:[#allocation2 + $0x78] sm:$0xff] }
  0x3c   :  { %4255 = vst [vmem:[#allocation14_spill] sm:$0xff] %v3141_v61  ;;  %2372 = vmatprep.subr.bf16.mxu0 %v3141_v61  ;;  %v3151_v33 = vpack.c.bf16 %v209_v26, %v206_v3  ;;  %v487_v5 = vsub.f32 %v3131_v6, %v4156_v39  ;;  %v494_v10 = vsub.f32 %v3134_v45, %v4157_v21  ;;  %v218_v3 = vand.u32 4294901760, %v125_v44 }
  0x3d   :  { %4256 = vst [vmem:[#allocation15_spill] sm:$0xff] %v3146_v15  ;;  %4257 = vst [vmem:[#allocation16_spill] sm:$0xff] %v3148_v47  ;;  %v4162_v43 = vand.u32 4294901760, %v3146_v15  ;;  %v3160_v20 = vsub.f32 %v141_v57, %v266_v50  ;;  %v2405_v37 = vpack.c.bf16 %v369_v63, %v362_v36  ;;  %v4163_v32 = vand.u32 4294901760, %v3148_v47 }
  0x3e   :  { %4258 = vst [vmem:[#allocation17_spill] sm:$0xff] %v3151_v33  ;;  %v3163_v31 = vsub.f32 %v142_v40, %v269_v59  ;;  %2374 = vmatpush3.bf16.msra.mxu0 %v3151_v33  ;;  %v488_v26 = vand.u32 4294901760, %v487_v5  ;;  %v495_v27 = vand.u32 4294901760, %v494_v10  ;;  %v221_v40 = vand.u32 4294901760, %v126_v1 }
  0x3f   :  { %4259 = vst [vmem:[#allocation18_spill] sm:$0xff] %v3160_v20  ;;  %v375_v39 = vsub.f32 %v3146_v15, %v4162_v43  ;;  %v4167_v21 = vand.u32 4294901760, %v3160_v20  ;;  %2406 = vmatpush3.bf16.msra.mxu1 %v2405_v37  ;;  %v382_v57 = vsub.f32 %v3148_v47, %v4163_v32  ;;  %v3174_v63 = vsub.f32 %v125_v44, %v218_v3 }
  0x40   :  { %4260 = vst [vmem:[#allocation19_spill] sm:$0xff] %v3163_v31  ;;  %v4166_v36 = vand.u32 4294901760, %v3163_v31  ;;  %v2407_v33 = vpack.c.bf16 %v495_v27, %v488_v26  ;;  %v3179_v10 = vpack.c.bf16 %v263_v38, %v260_v52  ;;  %v3185_v46 = vsub.f32 %v126_v1, %v221_v40 }
  0x41   :  { %4261 = vst [vmem:[#allocation20_spill] sm:$0xff] %v3174_v63  ;;  %v376_v61 = vand.u32 4294901760, %v375_v39  ;;  %v501_v5 = vsub.f32 %v3160_v20, %v4167_v21  ;;  %v383_v43 = vand.u32 4294901760, %v382_v57  ;;  %v388_v32 = vand.u32 4294901760, %v3174_v63 }
  0x42   :  { %v508_v37 = vsub.f32 %v3163_v31, %v4166_v36  ;;  %4262 = vst [vmem:[#allocation21_spill] sm:$0xff] %v3185_v46  ;;  %2408 = vmatprep.subr.bf16.mxu1 %v2407_v33  ;;  %2376 = vmatprep.subr.bf16.mxu0 %v3179_v10  ;;  %v3188_v27 = vpack.c.bf16 %v215_v56, %v212_v2  ;;  %v395_v36 = vand.u32 4294901760, %v3185_v46 }
  0x43   :  { %v502_v44 = vand.u32 4294901760, %v501_v5  ;;  %v3190_v39 = vpack.c.bf16 %v269_v59, %v266_v50  ;;  %v3192_v26 = vpack.c.bf16 %v221_v40, %v218_v3  ;;  %v2409_v38 = vpack.c.bf16 %v383_v43, %v376_v61 }
  0x44   :  { %v509_v52 = vand.u32 4294901760, %v508_v37  ;;  %v389_v57 = vsub.f32 %v3174_v63, %v388_v32  ;;  %2378 = vmatpush3.bf16.msra.mxu0 %v3188_v27  ;;  %v2415_v33 = vpack.c.bf16 %v2859_v22, %v2852_v17  ;;  %v396_v50 = vsub.f32 %v3185_v46, %v395_v36 }
  0x45   :  { %4263 = vst [vmem:[#allocation22_spill] sm:$0xff] %v3192_v26  ;;  %2410 = vmatpush3.bf16.msra.mxu1 %v2409_v38  ;;  %2380 = vmatprep.subr.bf16.mxu0 %v3190_v39  ;;  %v4267_v40 = vand.u32 4294901760, %v2864_v23  ;;  %v4268_v5 = vand.u32 4294901760, %v2867_v24 }
  0x46   :  { %v2411_v56 = vpack.c.bf16 %v509_v52, %v502_v44  ;;  %v390_v61 = vand.u32 4294901760, %v389_v57  ;;  %v397_v44 = vand.u32 4294901760, %v396_v50  ;;  %v4264_v52 = vand.u32 4294901760, %v2852_v17 }
  0x47   :  { %v4265_v57 = vand.u32 4294901760, %v2859_v22  ;;  %v3243_v3 = vpack.c.bf16 %v4268_v5, %v4267_v40  ;;  %v4273_v17 = vand.u32 4294901760, %v2882_v30  ;;  %v4274_v22 = vand.u32 4294901760, %v2890_v34 }
  0x48   :  { %2412 = vmatprep.subr.bf16.mxu1 %v2411_v56  ;;  %2382 = vmatpush3.bf16.msra.mxu0 %v3192_v26  ;;  %v2413_v38 = vpack.c.bf16 %v397_v44, %v390_v61  ;;  %v4270_v56 = vand.u32 4294901760, %v2874_v28  ;;  %v4271_v61 = vand.u32 4294901760, %v2877_v29  ;;  %v4279_v40 = vand.u32 4294901760, %v2959_v12 }
  0x49   :  { %2416 = vmatprep.subr.bf16.mxu0 %v2415_v33  ;;  %v3236_v37 = vpack.c.bf16 %v4265_v57, %v4264_v52  ;;  %4269 = vst [vmem:[#allocation24_spill] sm:$0xff] %v3243_v3  ;;  %v3255_v44 = vpack.c.bf16 %v4274_v22, %v4273_v17  ;;  %v4277_v52 = vand.u32 4294901760, %v2953_v9  ;;  %v4280_v5 = vand.u32 4294901760, %v2967_v18 }
  0x4a   :  { %2414 = vmatpush3.bf16.msra.mxu1 %v2413_v38  ;;  %v3249_v33 = vpack.c.bf16 %v4271_v61, %v4270_v56  ;;  %v4276_v38 = vand.u32 4294901760, %v2945_v8  ;;  %v4282_v56 = vand.u32 4294901760, %v2980_v41  ;;  %v4283_v61 = vand.u32 4294901760, %v2983_v42 }
  0x4b   :  { %4266 = vst [vmem:[#allocation23_spill] sm:$0xff] %v3236_v37  ;;  %2448 = vmatprep.subr.bf16.mxu1 %v2926_v58  ;;  %4275 = vst [vmem:[#allocation26_spill] sm:$0xff] %v3255_v44  ;;  %v3267_v50 = vpack.c.bf16 %v4280_v5, %v4279_v40  ;;  %v4285_v17 = vand.u32 4294901760, %v2993_v25  ;;  %v4286_v22 = vand.u32 4294901760, %v3011_v51  ;;  %v4291_v40 = vand.u32 4294901760, %v3060_v54 }
  0x4c   :  { %4272 = vst [vmem:[#allocation25_spill] sm:$0xff] %v3249_v33  ;;  %v3261_v57 = vpack.c.bf16 %v4277_v52, %v4276_v38  ;;  %v3273_v43 = vpack.c.bf16 %v4283_v61, %v4282_v56  ;;  %v4288_v38 = vand.u32 4294901760, %v3044_v53  ;;  %v4289_v52 = vand.u32 4294901760, %v3052_v60 }
  0x4d   :  { %4281 = vst [vmem:[#allocation28_spill] sm:$0xff] %v3267_v50  ;;  %v3279_v59 = vpack.c.bf16 %v4286_v22, %v4285_v17  ;;  %v4292_v5 = vand.u32 4294901760, %v3068_v13  ;;  %v4294_v56 = vand.u32 4294901760, %v3076_v7  ;;  %v4295_v61 = vand.u32 4294901760, %v3079_v16 }
  0x4e   :  { %4278 = vst [vmem:[#allocation27_spill] sm:$0xff] %v3261_v57  ;;  %4284 = vst [vmem:[#allocation29_spill] sm:$0xff] %v3273_v43  ;;  %v3285_v2 = vpack.c.bf16 %v4289_v52, %v4288_v38  ;;  %v4297_v17 = vand.u32 4294901760, %v3102_v35  ;;  %v4298_v22 = vand.u32 4294901760, %v3117_v14  ;;  %v4300_v38 = vand.u32 4294901760, %v3131_v6 }
  0x4f   :  { %4287 = vst [vmem:[#allocation30_spill] sm:$0xff] %v3279_v59  ;;  %v3291_v1 = vpack.c.bf16 %v4292_v5, %v4291_v40  ;;  %v3297_v21 = vpack.c.bf16 %v4295_v61, %v4294_v56  ;;  %v4301_v52 = vand.u32 4294901760, %v3134_v45  ;;  %v4303_v40 = vand.u32 4294901760, %v3146_v15 }
  0x50   :  { %4290 = vst [vmem:[#allocation31_spill] sm:$0xff] %v3285_v2  ;;  %v3303_v59 = vpack.c.bf16 %v4298_v22, %v4297_v17  ;;  %v4304_v5 = vand.u32 4294901760, %v3148_v47  ;;  %v4306_v56 = vand.u32 4294901760, %v3160_v20  ;;  %v4307_v61 = vand.u32 4294901760, %v3163_v31 }
  0x51   :  { %4293 = vst [vmem:[#allocation32_spill] sm:$0xff] %v3291_v1  ;;  %4296 = vst [vmem:[#allocation33_spill] sm:$0xff] %v3297_v21  ;;  %v3309_v2 = vpack.c.bf16 %v4301_v52, %v4300_v38  ;;  %v3323_v17 = vpack.c.bf16 %v395_v36, %v388_v32  ;;  %v26_v22 = vlaneseq }
  0x52   :  { %4299 = vst [vmem:[#allocation34_spill] sm:$0xff] %v3303_v59  ;;  %v3315_v1 = vpack.c.bf16 %v4304_v5, %v4303_v40  ;;  %v3321_v21 = vpack.c.bf16 %v4307_v61, %v4306_v56  ;;  %v2804_v5 = vmov 0.0  }
  0x53   :  { %4302 = vst [vmem:[#allocation35_spill] sm:$0xff] %v3309_v2  ;;  %4309 = vst [vmem:[#allocation38_spill] sm:$0xff] %v3323_v17  ;;  %v27_v59 = vand.u32 127, %v26_v22 }
  0x54   :  { %4305 = vst [vmem:[#allocation36_spill] sm:$0xff] %v3315_v1  ;;  %4308 = vst [vmem:[#allocation37_spill] sm:$0xff] %v3321_v21 }
  0x55   :  { %v29_v43 = vadd.s32 256, %v27_v59  ;;  %v30_v50 = vadd.s32 384, %v27_v59  ;;  %v28_v38 = vadd.s32 128, %v27_v59 }
  0x94   :  { %v34_v52 = vpop.permute.xlu0 %33 }
  0x95   :  { %vm37_vm0 = vcmp.eq.s32.totalorder %v29_v43, %v34_v52  ;;  %vm38_vm1 = vcmp.eq.s32.totalorder %v30_v50, %v34_v52  ;;  %vm35_vm2 = vcmp.eq.s32.totalorder %v27_v59, %v34_v52  ;;  %vm36_vm3 = vcmp.eq.s32.totalorder %v28_v38, %v34_v52  ;;  %v74_v40 = vpop.permute.xlu1 %73 }
  0x96   :  { %v1917_v1 = vsel %vm37_vm0, 1.0, %v2804_v5  ;;  %v1918_v2 = vsel %vm38_vm1, 1.0, %v2804_v5  ;;  %vm75_vm4 = vcmp.eq.s32.totalorder %v27_v59, %v74_v40  ;;  %vm76_vm5 = vcmp.eq.s32.totalorder %v28_v38, %v74_v40 }
  0x97   :  { %vm77_vm6 = vcmp.eq.s32.totalorder %v29_v43, %v74_v40  ;;  %vm78_vm7 = vcmp.eq.s32.totalorder %v30_v50, %v74_v40  ;;  %v1923_v56 = vsel %vm75_vm4, 1.0, %v2804_v5  ;;  %v1924_v61 = vsel %vm76_vm5, 1.0, %v2804_v5 }
  0x98   :  { %v1925_v32 = vsel %vm77_vm6, 1.0, %v2804_v5  ;;  %v1926_v36 = vsel %vm78_vm7, 1.0, %v2804_v5  ;;  %v1915_v22 = vsel %vm35_vm2, 1.0, %v2804_v5  ;;  %v1916_v17 = vsel %vm36_vm3, 1.0, %v2804_v5 }
  0x99   :  { %v54_v21 = vpop.permute.xlu0 %53 }
  0x9a   :  { %vm55_vm8 = vcmp.eq.s32.totalorder %v27_v59, %v54_v21  ;;  %vm56_vm9 = vcmp.eq.s32.totalorder %v28_v38, %v54_v21  ;;  %vm57_vm10 = vcmp.eq.s32.totalorder %v29_v43, %v54_v21  ;;  %vm58_vm11 = vcmp.eq.s32.totalorder %v30_v50, %v54_v21 }
  0x9b   :  { %v1919_v52 = vsel %vm55_vm8, 1.0, %v2804_v5  ;;  %v1920_v57 = vsel %vm56_vm9, 1.0, %v2804_v5  ;;  %v1921_v44 = vsel %vm57_vm10, 1.0, %v2804_v5  ;;  %v1922_v33 = vsel %vm58_vm11, 1.0, %v2804_v5  ;;  %v94_v3 = vpop.permute.xlu1 %93 }
  0x9c   :  { %v67_v37 = vadd.f32 %v1919_v52, %v1915_v22  ;;  %v68_v63 = vadd.f32 %v1920_v57, %v1916_v17  ;;  %v69_v46 = vadd.f32 %v1921_v44, %v1917_v1  ;;  %v70_v40 = vadd.f32 %v1922_v33, %v1918_v2  ;;  %v3387_v33 = vld [vmem:[#allocation2 + $0x1f0] sm:$0xff]  ;;  %v3389_v44 = vld [vmem:[#allocation2 + $0x1f8] sm:$0xff] }
  0x9d   :  { %vm95_vm12 = vcmp.eq.s32.totalorder %v27_v59, %v94_v3  ;;  %vm96_vm13 = vcmp.eq.s32.totalorder %v28_v38, %v94_v3  ;;  %vm97_vm14 = vcmp.eq.s32.totalorder %v29_v43, %v94_v3  ;;  %vm98_vm15 = vcmp.eq.s32.totalorder %v30_v50, %v94_v3  ;;  %v3373_v43 = vld [vmem:[#allocation2 + $0x1e0] sm:$0xff]  ;;  %v4322_v3 = vld [vmem:[#allocation14_spill] sm:$0xff]  ;;  %4325 = vst [vmem:[#allocation44_spill] sm:$0xff] %v3387_v33  ;;  %v3405_v38 = vld [vmem:[#allocation2 + $0x170] sm:$0xff] }
  0x9e   :  { %v87_v20 = vadd.f32 %v1923_v56, %v67_v37  ;;  %v88_v31 = vadd.f32 %v1924_v61, %v68_v63  ;;  %v89_v15 = vadd.f32 %v1925_v32, %v69_v46  ;;  %v90_v47 = vadd.f32 %v1926_v36, %v70_v40  ;;  %v3381_v37 = vld [vmem:[#allocation2 + $0x160] sm:$0xff]  ;;  %4326 = vst [vmem:[#allocation45_spill] sm:$0xff] %v3389_v44 }
  0x9f   :  { %v1927_v58 = vsel %vm95_vm12, 1.0, %v2804_v5  ;;  %v1928_v6 = vsel %vm96_vm13, 1.0, %v2804_v5  ;;  %v1929_v21 = vsel %vm97_vm14, 1.0, %v2804_v5  ;;  %v1930_v45 = vsel %vm98_vm15, 1.0, %v2804_v5  ;;  %4323 = vst [vmem:[#allocation14_spill] sm:$0xff] %v3381_v37  ;;  %v3407_v5 = vld [vmem:[#allocation2 + $0x178] sm:$0xff] }
  0xa0   :  { %v107_v26 = vadd.f32 %v1927_v58, %v87_v20  ;;  %v108_v35 = vadd.f32 %v1928_v6, %v88_v31  ;;  %v3325_v14 = vadd.f32 %v1929_v21, %v89_v15  ;;  %v3327_v22 = vadd.f32 %v1930_v45, %v90_v47  ;;  %4330 = vst [vmem:[#allocation46_spill] sm:$0xff] %v3407_v5 }
  0xa1   :  { %v4311_v45 = vpack.c.bf16 %v2867_v24, %v2864_v23  ;;  %v4312_v15 = vpack.c.bf16 %v2877_v29, %v2874_v28  ;;  %v4313_v20 = vpack.c.bf16 %v2890_v34, %v2882_v30  ;;  %v3363_v23 = vld [vmem:[#allocation2 + $0x150] sm:$0xff]  ;;  %v3365_v24 = vld [vmem:[#allocation2 + $0x158] sm:$0xff]  ;;  %v4317_v28 = vpack.c.bf16 %v2967_v18, %v2959_v12  ;;  %v4318_v29 = vld [vmem:[#allocation11_spill] sm:$0xff] }
  0xa2   :  { %4310 = vst [vmem:[#allocation39_spill] sm:$0xff] %v3325_v14  ;;  %v3329_v1 = vand.u32 4294901760, %v108_v35  ;;  %v3331_v2 = vand.u32 4294901760, %v107_v26  ;;  %4315 = vst [vmem:[#allocation40_spill] sm:$0xff] %v3363_v23  ;;  %v4190_v30 = vand.u32 4294901760, %v3363_v23  ;;  %v4189_v34 = vand.u32 4294901760, %v3365_v24 }
  0xa3   :  { %4316 = vst [vmem:[#allocation41_spill] sm:$0xff] %v3365_v24  ;;  %4319 = vst [vmem:[#allocation11_spill] sm:$0xff] %v3373_v43  ;;  %v3383_v12 = vld [vmem:[#allocation2 + $0x168] sm:$0xff]  ;;  %v4188_v18 = vand.u32 4294901760, %v3373_v43  ;;  %v4327_v57 = vpack.c.bf16 %v3011_v51, %v2993_v25  ;;  %v4331_v25 = vpack.c.bf16 %v3052_v60, %v3044_v53  ;;  %v4186_v51 = vand.u32 4294901760, %v3381_v37 }
  0xa4   :  { %v272_v59 = vsub.f32 %v108_v35, %v3329_v1  ;;  %v3335_v63 = vsub.f32 %v107_v26, %v3331_v2  ;;  %512 = vmatprep.mubr.f32.mxu1 %v3329_v1  ;;  %v4314_v26 = vpack.c.bf16 %v2953_v9, %v2945_v8  ;;  %v3375_v8 = vld [vmem:[#allocation2 + $0x1e8] sm:$0xff]  ;;  %v4321_v9 = vpack.c.bf16 %v2983_v42, %v2980_v41  ;;  %v4328_v41 = vld [vmem:[#allocation17_spill] sm:$0xff] }
  0xa5   :  { %514 = vmatmul.mubr.f32.vlgmr.msra.gmra.mrb[0].mxu1 %v3331_v2  ;;  %4320 = vst [vmem:[#allocation42_spill] sm:$0xff] %v3375_v8  ;;  %4324 = vst [vmem:[#allocation43_spill] sm:$0xff] %v3383_v12  ;;  %v4187_v50 = vand.u32 4294901760, %v3375_v8  ;;  %v3398_v42 = vsub.f32 %v3363_v23, %v4190_v30  ;;  %v3403_v17 = vsub.f32 %v3365_v24, %v4189_v34  ;;  %v4184_v32 = vand.u32 4294901760, %v3383_v12  ;;  %v4346_v34 = vld [vmem:[#allocation15_spill] sm:$0xff] }
  0xa6   :  { %2450 = vmatpush3.bf16.msra.mxu1 %v2939_v4  ;;  %v273_v31 = vand.u32 4294901760, %v272_v59  ;;  %v279_v58 = vand.u32 4294901760, %v3335_v63  ;;  %4329 = vst [vmem:[#allocation17_spill] sm:$0xff] %v3405_v38  ;;  %v4182_v36 = vand.u32 4294901760, %v3387_v33  ;;  %v4181_v56 = vand.u32 4294901760, %v3389_v44 }
  0xa7   :  { %2452 = vmatprep.subr.bf16.mxu1 %v2950_v11  ;;  %v3420_v61 = vsub.f32 %v3373_v43, %v4188_v18  ;;  %v3425_v53 = vsub.f32 %v3375_v8, %v4187_v50  ;;  %v4183_v60 = vand.u32 4294901760, %v3405_v38  ;;  %v4185_v52 = vand.u32 4294901760, %v3407_v5  ;;  %v4345_v18 = vld [vmem:[#allocation16_spill] sm:$0xff] }
  0xa8   :  { %756 = vmatprep.mubr.f32.mxu1 %v273_v31  ;;  %v274_v47 = vsub.f32 %v272_v59, %v273_v31  ;;  %v280_v35 = vsub.f32 %v3335_v63, %v279_v58  ;;  %v4332_v40 = vpack.c.bf16 %v3068_v13, %v3060_v54  ;;  %v4200_v21 = vand.u32 4294901760, %v3398_v42 }
  0xa9   :  { %v4333_v31 = vpack.c.bf16 %v3079_v16, %v3076_v7  ;;  %v3447_v54 = vsub.f32 %v3383_v12, %v4184_v32  ;;  %v3452_v13 = vsub.f32 %v3387_v33, %v4182_v36  ;;  %v3457_v7 = vsub.f32 %v3389_v44, %v4181_v56  ;;  %v4342_v56 = vld [vmem:[#allocation8_spill] sm:$0xff]  ;;  %v3489_v36 = vld [vmem:[#allocation2 + $0x100] sm:$0xff] }
  0xaa   :  { %2454 = vmatpush3.bf16.msra.mxu1 %v2974_v19  ;;  %v275_v46 = vand.u32 4294901760, %v274_v47  ;;  %v281_v6 = vand.u32 4294901760, %v280_v35  ;;  %v3442_v47 = vsub.f32 %v3381_v37, %v4186_v51  ;;  %v3465_v35 = vld [vmem:[#allocation2 + $0x180] sm:$0xff]  ;;  %v4347_v30 = vpack.c.bf16 %v4345_v18, %v4346_v34  ;;  %v4396_v37 = vld [vmem:[#allocation32_spill] sm:$0xff] }
  0xab   :  { %2456 = vmatprep.subr.bf16.mxu1 %v3027_v0 }
  0xac   :  { %276 = vmatprep.mubr.f32.mxu0 %v275_v46  ;;  %v3467_v46 = vld [vmem:[#allocation2 + $0x188] sm:$0xff]  ;;  %v4195_v32 = vand.u32 4294901760, %v3442_v47 }
  0xad   :  { %282 = vmatmul.mubr.f32.vlgmr.msra.gmra.mrb[0].mxu0 %v281_v6  ;;  %v4192_v6 = vand.u32 4294901760, %v3420_v61  ;;  %v4413_v23 = vand.u32 4294901760, %v3467_v46 }
  0xae   :  { %2418 = vmatpush3.bf16.msra.mxu0 %v4311_v45  ;;  %2458 = vmatpush3.bf16.msra.mxu1 %v3048_v55  ;;  %v4191_v45 = vand.u32 4294901760, %v3425_v53 }
  0xaf   :  { %649 = vmatprep.mubr.f32.mxu0 %v272_v59  ;;  %2420 = vmatprep.subr.bf16.mxu0 %v4312_v15  ;;  %v4193_v59 = vand.u32 4294901760, %v3403_v17  ;;  %v3474_v15 = vsub.f32 %v3405_v38, %v4183_v60  ;;  %v3491_v60 = vld [vmem:[#allocation2 + $0x108] sm:$0xff] }
  0xb0   :  { %2460 = vmatprep.subr.bf16.mxu1 %v3055_v62 }
  0xb1   :  { %v3463_v16 = vpack.c.bf16 %v4193_v59, %v4200_v21  ;;  %v4360_v21 = vld [vmem:[#allocation23_spill] sm:$0xff] }
  0xb2   :  { %2422 = vmatpush3.bf16.msra.mxu0 %v4313_v20  ;;  %2462 = vmatpush3.bf16.msra.mxu1 %v3089_v48  ;;  %v3479_v20 = vsub.f32 %v3407_v5, %v4185_v52  ;;  %v4194_v52 = vand.u32 4294901760, %v3447_v54 }
  0xb3   :  { %2424 = vmatprep.subr.bf16.mxu0 %v4314_v26  ;;  %2464 = vmatprep.subr.bf16.mxu1 %v3114_v49  ;;  %4334 = vst [vmem:[#allocation47_spill] sm:$0xff] %v3463_v16  ;;  %v4335_v26 = vld [vmem:[#allocation10_spill] sm:$0xff] }
  0xb4   :  { %v4196_v51 = vand.u32 4294901760, %v3479_v20  ;;  %v3515_v50 = vpack.c.bf16 %v4194_v52, %v4195_v32  ;;  %v4349_v52 = vld [vmem:[#allocation19_spill] sm:$0xff]  ;;  %v4350_v32 = vld [vmem:[#allocation18_spill] sm:$0xff] }
  0xb5   :  { %v4351_v34 = vpack.c.bf16 %v4349_v52, %v4350_v32  ;;  %v3553_v52 = vld [vmem:[#allocation2 + $0x110] sm:$0xff] }
  0xb6   :  { %2426 = vmatpush3.bf16.msra.mxu0 %v4317_v28  ;;  %2466 = vmatpush3.bf16.msra.mxu1 %v4318_v29  ;;  %v4336_v28 = vld [vmem:[#allocation9_spill] sm:$0xff] }
  0xb7   :  { %2428 = vmatprep.subr.bf16.mxu0 %v4321_v9  ;;  %2468 = vmatprep.subr.bf16.mxu1 %v4322_v3  ;;  %v4337_v9 = vpack.c.bf16 %v4335_v26, %v4336_v28  ;;  %v3499_v26 = vpack.c.bf16 %v4191_v45, %v4192_v6  ;;  %v4204_v28 = vand.u32 4294901760, %v3465_v35  ;;  %4344 = vst [vmem:[#allocation9_spill] sm:$0xff] %v3515_v50  ;;  %v4202_v45 = vand.u32 4294901760, %v3491_v60  ;;  %v3523_v6 = vld [vmem:[#allocation2 + $0x198] sm:$0xff]  ;;  %v3622_v50 = vld [vmem:[#allocation2 + $0x120] sm:$0xff] }
  0xb9   :  { %4343 = vst [vmem:[#allocation10_spill] sm:$0xff] %v3499_v26 }
  0xba   :  { %2430 = vmatpush3.bf16.msra.mxu0 %v4327_v57  ;;  %2470 = vmatpush3.bf16.msra.mxu1 %v4328_v41  ;;  %v4338_v57 = vld [vmem:[#allocation22_spill] sm:$0xff] }
  0xbb   :  { %2432 = vmatprep.subr.bf16.mxu0 %v4331_v25  ;;  %2472 = vmatprep.subr.bf16.mxu1 %v3179_v10  ;;  %v4339_v25 = vld [vmem:[#allocation13_spill] sm:$0xff] }
  0xbe   :  { %2434 = vmatpush3.bf16.msra.mxu0 %v4332_v40  ;;  %2474 = vmatpush3.bf16.msra.mxu1 %v3188_v27  ;;  %v4340_v40 = vld [vmem:[#allocation12_spill] sm:$0xff] }
  0xbf   :  { %2436 = vmatprep.subr.bf16.mxu0 %v4333_v31  ;;  %2476 = vmatprep.subr.bf16.mxu1 %v3190_v39  ;;  %v4341_v31 = vpack.c.bf16 %v4339_v25, %v4340_v40  ;;  %v4198_v25 = vand.u32 4294901760, %v3457_v7  ;;  %v3507_v40 = vld [vmem:[#allocation2 + $0x190] sm:$0xff] }
  0xc0   :  { %v4205_v32 = vand.u32 4294901760, %v3507_v40 }
  0xc2   :  { %2438 = vmatpush3.bf16.msra.mxu0 %v4337_v9  ;;  %2478 = vmatpush3.bf16.msra.mxu1 %v4338_v57  ;;  %v4201_v9 = vand.u32 4294901760, %v3467_v46 }
  0xc3   :  { %2440 = vmatprep.subr.bf16.mxu0 %v4341_v31  ;;  %2512 = vmatprep.subr.bf16.mxu1 %v4342_v56  ;;  %v4199_v56 = vand.u32 4294901760, %v3452_v13  ;;  %v4197_v31 = vand.u32 4294901760, %v3474_v15 }
  0xc4   :  { %v3550_v18 = vsub.f32 %v3467_v46, %v4201_v9  ;;  %v4207_v9 = vand.u32 4294901760, %v3553_v52 }
  0xc5   :  { %760 = vmatmul.mubr.f32.vlgmr.msra.gmra.mrb[2].mxu1 %v279_v58  ;;  %v4203_v58 = vand.u32 4294901760, %v3489_v36  ;;  %v3529_v59 = vpack.c.bf16 %v4198_v25, %v4199_v56  ;;  %v3568_v56 = vsub.f32 %v3491_v60, %v4202_v45 }
  0xc6   :  { %2442 = vmatpush3.bf16.msra.mxu0 %v4347_v30  ;;  %2514 = vmatpush3.bf16.msra.mxu1 %v2939_v4  ;;  %v3539_v4 = vpack.c.bf16 %v4196_v51, %v4197_v31  ;;  %v3545_v30 = vsub.f32 %v3465_v35, %v4204_v28  ;;  %4354 = vst [vmem:[#allocation8_spill] sm:$0xff] %v3550_v18  ;;  %v4355_v51 = vld [vmem:[#allocation21_spill] sm:$0xff]  ;;  %v4356_v31 = vld [vmem:[#allocation20_spill] sm:$0xff]  ;;  %v3592_v28 = vld [vmem:[#allocation2 + $0x1a0] sm:$0xff] }
  0xc7   :  { %4348 = vst [vmem:[#allocation22_spill] sm:$0xff] %v3529_v59  ;;  %1030 = vmatprep.mubr.f32.mxu1 %v3329_v1  ;;  %2444 = vmatprep.subr.bf16.mxu0 %v4351_v34  ;;  %v4206_v34 = vand.u32 4294901760, %v3523_v6  ;;  %v4357_v25 = vpack.c.bf16 %v4355_v51, %v4356_v31  ;;  %4359 = vst [vmem:[#allocation15_spill] sm:$0xff] %v3568_v56  ;;  %v3580_v31 = vld [vmem:[#allocation2 + $0x118] sm:$0xff]  ;;  %v4375_v16 = vand.u32 4294901760, %v3592_v28 }
  0xc8   :  { %4352 = vst [vmem:[#allocation13_spill] sm:$0xff] %v3539_v4  ;;  %2516 = vmatprep.subr.bf16.mxu1 %v2950_v11  ;;  %4353 = vst [vmem:[#allocation12_spill] sm:$0xff] %v3545_v30  ;;  %v3563_v11 = vsub.f32 %v3489_v36, %v4203_v58  ;;  %v4208_v51 = vand.u32 4294901760, %v3545_v30  ;;  %v4371_v45 = vand.u32 4294901760, %v3580_v31 }
  0xca   :  { %2446 = vmatpush3.bf16.msra.mxu0 %v4357_v25  ;;  %2518 = vmatpush3.bf16.msra.mxu1 %v2974_v19  ;;  %4358 = vst [vmem:[#allocation16_spill] sm:$0xff] %v3563_v11  ;;  %v3578_v25 = vsub.f32 %v3507_v40, %v4205_v32  ;;  %v3594_v32 = vld [vmem:[#allocation2 + $0x1a8] sm:$0xff] }
  0xcb   :  { %2480 = vmatprep.subr.bf16.mxu0 %v4360_v21  ;;  %2520 = vmatprep.subr.bf16.mxu1 %v3027_v0  ;;  %v3586_v21 = vsub.f32 %v3523_v6, %v4206_v34  ;;  %v4363_v0 = vld [vmem:[#allocation24_spill] sm:$0xff]  ;;  %v4366_v34 = vand.u32 4294901760, %v3550_v18 }
  0xcc   :  { %4361 = vst [vmem:[#allocation19_spill] sm:$0xff] %v3578_v25  ;;  %v4373_v26 = vand.u32 4294901760, %v3578_v25 }
  0xcd   :  { %652 = vmatmul.mubr.f32.vlgmr.msra.gmra.mrb[2].mxu0 %v3335_v63  ;;  %4362 = vst [vmem:[#allocation18_spill] sm:$0xff] %v3586_v21  ;;  %v4364_v63 = vld [vmem:[#allocation25_spill] sm:$0xff]  ;;  %v1272_v58 = vsub.f32 %v3550_v18, %v4366_v34  ;;  %v4370_v34 = vld [vmem:[#allocation27_spill] sm:$0xff] }
  0xce   :  { %2482 = vmatpush3.bf16.msra.mxu0 %v4363_v0  ;;  %926 = vmatprep.mubr.f32.mxu0 %v3329_v1  ;;  %v3602_v0 = vsub.f32 %v3553_v52, %v4207_v9  ;;  %v1265_v1 = vsub.f32 %v3545_v30, %v4208_v51  ;;  %v4367_v9 = vld [vmem:[#allocation26_spill] sm:$0xff]  ;;  %v4369_v51 = vand.u32 4294901760, %v3568_v56  ;;  %v4382_v30 = vand.u32 4294901760, %v3622_v50 }
  0xcf   :  { %2522 = vmatpush3.bf16.msra.mxu1 %v3048_v55  ;;  %2484 = vmatprep.subr.bf16.mxu0 %v4364_v63  ;;  %v3632_v63 = vld [vmem:[#allocation2 + $0x128] sm:$0xff]  ;;  %v1273_v55 = vand.u32 4294901760, %v1272_v58  ;;  %v3654_v58 = vld [vmem:[#allocation2 + $0x1b8] sm:$0xff] }
  0xd0   :  { %4365 = vst [vmem:[#allocation21_spill] sm:$0xff] %v3602_v0  ;;  %2524 = vmatprep.subr.bf16.mxu1 %v3055_v62  ;;  %v4368_v62 = vand.u32 4294901760, %v3563_v11  ;;  %v1160_v59 = vsub.f32 %v3568_v56, %v4369_v51  ;;  %v1266_v51 = vand.u32 4294901760, %v1265_v1  ;;  %v4377_v56 = vand.u32 4294901760, %v3594_v32  ;;  %v4379_v1 = vld [vmem:[#allocation28_spill] sm:$0xff] }
  0xd1   :  { %v4381_v18 = vand.u32 4294901760, %v3602_v0 }
  0xd2   :  { %2486 = vmatpush3.bf16.msra.mxu0 %v4367_v9  ;;  %v1153_v4 = vsub.f32 %v3563_v11, %v4368_v62  ;;  %v3630_v9 = vsub.f32 %v3580_v31, %v4371_v45  ;;  %v3634_v62 = vld [vmem:[#allocation2 + $0x1b0] sm:$0xff]  ;;  %v3646_v45 = vsub.f32 %v3592_v28, %v4375_v16  ;;  %v3651_v11 = vsub.f32 %v3594_v32, %v4377_v56 }
  0xd3   :  { %2526 = vmatpush3.bf16.msra.mxu1 %v3089_v48  ;;  %2488 = vmatprep.subr.bf16.mxu0 %v4370_v34  ;;  %v1279_v48 = vsub.f32 %v3578_v25, %v4373_v26  ;;  %v4374_v34 = vand.u32 4294901760, %v3586_v21  ;;  %v1161_v25 = vand.u32 4294901760, %v1160_v59  ;;  %v4380_v16 = vld [vmem:[#allocation29_spill] sm:$0xff]  ;;  %v3664_v56 = vsub.f32 %v3602_v0, %v4381_v18 }
  0xd4   :  { %4372 = vst [vmem:[#allocation20_spill] sm:$0xff] %v3630_v9  ;;  %2528 = vmatprep.subr.bf16.mxu1 %v3114_v49  ;;  %4376 = vst [vmem:[#allocation23_spill] sm:$0xff] %v3646_v45  ;;  %v1154_v26 = vand.u32 4294901760, %v1153_v4  ;;  %v3669_v4 = vld [vmem:[#allocation2 + $0x130] sm:$0xff]  ;;  %v3678_v18 = vsub.f32 %v3622_v50, %v4382_v30  ;;  %v3680_v49 = vld [vmem:[#allocation2 + $0x1c0] sm:$0xff]  ;;  %v2575_v59 = vpack.c.bf16 %v1273_v55, %v1266_v51  ;;  %v4390_v55 = vand.u32 4294901760, %v3630_v9 }
  0xd5   :  { %v1286_v19 = vsub.f32 %v3586_v21, %v4374_v34  ;;  %4378 = vst [vmem:[#allocation24_spill] sm:$0xff] %v3651_v11  ;;  %v3671_v34 = vld [vmem:[#allocation2 + $0x138] sm:$0xff]  ;;  %v4389_v30 = vld [vmem:[#allocation31_spill] sm:$0xff]  ;;  %v1168_v38 = vand.u32 4294901760, %v3664_v56  ;;  %v3720_v51 = vld [vmem:[#allocation2 + $0x1d0] sm:$0xff]  ;;  %v4394_v44 = vand.u32 4294901760, %v3646_v45 }
  0xd6   :  { %2490 = vmatpush3.bf16.msra.mxu0 %v4379_v1  ;;  %v1280_v1 = vand.u32 4294901760, %v1279_v48  ;;  %4383 = vst [vmem:[#allocation25_spill] sm:$0xff] %v3678_v18  ;;  %v4384_v48 = vld [vmem:[#allocation30_spill] sm:$0xff]  ;;  %v3685_v0 = vpack.c.bf16 %v1161_v25, %v1154_v26  ;;  %v1174_v25 = vsub.f32 %v3630_v9, %v4390_v55  ;;  %4392 = vst [vmem:[#allocation28_spill] sm:$0xff] %v3720_v51 }
  0xd7   :  { %2530 = vmatpush3.bf16.msra.mxu1 %v4318_v29  ;;  %2492 = vmatprep.subr.bf16.mxu0 %v4380_v16  ;;  %v1287_v21 = vand.u32 4294901760, %v1286_v19  ;;  %v4385_v19 = vand.u32 4294901760, %v3632_v63  ;;  %v4387_v16 = vand.u32 4294901760, %v3634_v62  ;;  %v3722_v26 = vld [vmem:[#allocation2 + $0x1d8] sm:$0xff]  ;;  %v1293_v33 = vsub.f32 %v3646_v45, %v4394_v44 }
  0xd8   :  { %2532 = vmatprep.subr.bf16.mxu1 %v4322_v3  ;;  %v3682_v3 = vld [vmem:[#allocation2 + $0x1c8] sm:$0xff]  ;;  %4393 = vst [vmem:[#allocation29_spill] sm:$0xff] %v3722_v26  ;;  %v4398_v44 = vand.u32 4294901760, %v3669_v4  ;;  %v1175_v55 = vand.u32 4294901760, %v1174_v25 }
  0xd9   :  { %v3690_v29 = vsub.f32 %v3632_v63, %v4385_v19  ;;  %v3695_v5 = vsub.f32 %v3634_v62, %v4387_v16  ;;  %v3707_v19 = vld [vmem:[#allocation2 + $0x148] sm:$0xff]  ;;  %v3710_v16 = vand.u32 4294901760, %v3327_v22  ;;  %v2579_v9 = vpack.c.bf16 %v1287_v21, %v1280_v1  ;;  %v4397_v1 = vld [vmem:[#allocation33_spill] sm:$0xff] }
  0xda   :  { %2494 = vmatpush3.bf16.msra.mxu0 %v4384_v48  ;;  %v3705_v48 = vld [vmem:[#allocation2 + $0x140] sm:$0xff]  ;;  %v1294_v8 = vand.u32 4294901760, %v1293_v33 }
  0xdb   :  { %4386 = vst [vmem:[#allocation26_spill] sm:$0xff] %v3690_v29  ;;  %4388 = vst [vmem:[#allocation27_spill] sm:$0xff] %v3695_v5  ;;  %2534 = vmatpush3.bf16.msra.mxu1 %v4328_v41  ;;  %2496 = vmatprep.subr.bf16.mxu0 %v4389_v30  ;;  %v4391_v41 = vand.u32 4294901760, %v3654_v58  ;;  %v3752_v21 = vsub.f32 %v3327_v22, %v3710_v16  ;;  %v4402_v22 = vand.u32 4294901760, %v3678_v18 }
  0xdc   :  { %2536 = vmatprep.subr.bf16.mxu1 %v3179_v10  ;;  %v4395_v10 = vand.u32 4294901760, %v3651_v11 }
  0xdd   :  { %v3716_v56 = vsub.f32 %v3654_v58, %v4391_v41  ;;  %v4399_v41 = vand.u32 4294901760, %v3671_v34  ;;  %v1181_v45 = vsub.f32 %v3678_v18, %v4402_v22  ;;  %v4408_v22 = vld [vmem:[#allocation35_spill] sm:$0xff]  ;;  %v2581_v18 = vpack.c.bf16 %v1175_v55, %v1168_v38 }
  0xde   :  { %v1300_v12 = vsub.f32 %v3651_v11, %v4395_v10  ;;  %2498 = vmatpush3.bf16.msra.mxu0 %v4396_v37  ;;  %v3741_v10 = vsub.f32 %v3669_v4, %v4398_v44 }
  0xdf   :  { %2538 = vmatpush3.bf16.msra.mxu1 %v3188_v27  ;;  %2500 = vmatprep.subr.bf16.mxu0 %v4397_v1  ;;  %v3746_v37 = vsub.f32 %v3671_v34, %v4399_v41  ;;  %v4400_v1 = vand.u32 4294901760, %v3680_v49  ;;  %v4401_v41 = vand.u32 4294901760, %v3682_v3  ;;  %v4404_v27 = vand.u32 4294901760, %v3690_v29 }
  0xe0   :  { %2540 = vmatprep.subr.bf16.mxu1 %v3190_v39  ;;  %v1301_v11 = vand.u32 4294901760, %v1300_v12  ;;  %v4403_v39 = vld [vmem:[#allocation34_spill] sm:$0xff]  ;;  %v4407_v12 = vand.u32 4294901760, %v3707_v19  ;;  %v4415_v38 = vand.u32 4294901760, %v3741_v10 }
  0xe1   :  { %v3759_v44 = vsub.f32 %v3680_v49, %v4400_v1  ;;  %v3764_v30 = vsub.f32 %v3682_v3, %v4401_v41  ;;  %v1188_v43 = vsub.f32 %v3690_v29, %v4404_v27  ;;  %v4405_v1 = vand.u32 4294901760, %v3695_v5 }
  0xe2   :  { %2502 = vmatpush3.bf16.msra.mxu0 %v4403_v39  ;;  %v4406_v41 = vand.u32 4294901760, %v3705_v48  ;;  %v3784_v33 = vsub.f32 %v3707_v19, %v4407_v12 }
  0xe3   :  { %v1307_v24 = vsub.f32 %v3695_v5, %v4405_v1  ;;  %2542 = vmatpush3.bf16.msra.mxu1 %v4338_v57  ;;  %2504 = vmatprep.subr.bf16.mxu0 %v4408_v22  ;;  %v4409_v1 = vand.u32 4294901760, %v3720_v51  ;;  %v4411_v57 = vand.u32 4294901760, %v3716_v56  ;;  %v1327_v39 = vand.u32 4294901760, %v3764_v30 }
  0xe4   :  { %v3779_v25 = vsub.f32 %v3705_v48, %v4406_v41  ;;  %v4410_v41 = vand.u32 4294901760, %v3722_v26  ;;  %2576 = vmatprep.subr.bf16.mxu1 %v2575_v59  ;;  %v4414_v59 = vld [vmem:[#allocation36_spill] sm:$0xff]  ;;  %v1189_v12 = vand.u32 4294901760, %v1188_v43  ;;  %v4248_v27 = vand.u32 4294901760, %v3784_v33  ;;  %v4417_v43 = vld [vmem:[#allocation37_spill] sm:$0xff] }
  0xe5   :  { %v3793_v5 = vsub.f32 %v3720_v51, %v4409_v1  ;;  %v1314_v22 = vsub.f32 %v3716_v56, %v4411_v57  ;;  %v4412_v1 = vand.u32 4294901760, %v3465_v35  ;;  %v1308_v51 = vand.u32 4294901760, %v1307_v24 }
  0xe6   :  { %v3798_v29 = vsub.f32 %v3722_v26, %v4410_v41  ;;  %v2583_v41 = vpack.c.bf16 %v1301_v11, %v1294_v8  ;;  %v1182_v26 = vand.u32 4294901760, %v1181_v45  ;;  %1032 = vmatmul.mubr.f32.vlgmr.msra.gmra.mrb[4].mxu1 %v3331_v2  ;;  %2506 = vmatpush3.bf16.msra.mxu0 %v4414_v59  ;;  %v1208_v57 = vand.u32 4294901760, %v3779_v25 }
  0xe7   :  { %v3810_v14 = vpack.c.bf16 %v4413_v23, %v4412_v1  ;;  %2578 = vmatpush3.bf16.msra.mxu1 %v3685_v0  ;;  %1374 = vmatprep.mubr.f32.mxu1 %v3710_v16  ;;  %v1195_v23 = vsub.f32 %v3741_v10, %v4415_v38  ;;  %v4416_v8 = vand.u32 4294901760, %v3746_v37  ;;  %v4418_v11 = vand.u32 4294901760, %v3752_v21 }
  0xe8   :  { %2508 = vmatprep.subr.bf16.mxu0 %v4417_v43  ;;  %2580 = vmatprep.subr.bf16.mxu1 %v2579_v9  ;;  %v1315_v45 = vand.u32 4294901760, %v1314_v22  ;;  %v4419_v55 = vand.u32 4294901760, %v3759_v44  ;;  %v1328_v59 = vsub.f32 %v3764_v30, %v1327_v39  ;;  %v4420_v38 = vand.u32 4294901760, %v3489_v36  ;;  %v4422_v9 = vld [vmem:[#allocation38_spill] sm:$0xff] }
  0xe9   :  { %v1202_v35 = vsub.f32 %v3746_v37, %v4416_v8  ;;  %v1136_v0 = vsub.f32 %v3752_v21, %v4418_v11  ;;  %v4421_v8 = vand.u32 4294901760, %v3491_v60  ;;  %v2585_v43 = vpack.c.bf16 %v1189_v12, %v1182_v26 }
  0xea   :  { %v1321_v1 = vsub.f32 %v3759_v44, %v4419_v55  ;;  %2510 = vmatpush3.bf16.msra.mxu0 %v4422_v9  ;;  %v4423_v11 = vand.u32 4294901760, %v3507_v40  ;;  %v4424_v22 = vand.u32 4294901760, %v3523_v6  ;;  %v1209_v55 = vsub.f32 %v3779_v25, %v1208_v57 }
  0xeb   :  { %v3840_v24 = vpack.c.bf16 %v4421_v8, %v4420_v38  ;;  %v1216_v36 = vsub.f32 %v3784_v33, %v4248_v27  ;;  %2582 = vmatpush3.bf16.msra.mxu1 %v2581_v18  ;;  %2544 = vmatprep.subr.bf16.mxu0 %v3810_v14  ;;  %v1196_v60 = vand.u32 4294901760, %v1195_v23  ;;  %v1203_v38 = vand.u32 4294901760, %v1202_v35 }
  0xec   :  { %v3847_v46 = vpack.c.bf16 %v4424_v22, %v4423_v11  ;;  %v4425_v26 = vand.u32 4294901760, %v3793_v5  ;;  %v4426_v6 = vand.u32 4294901760, %v3798_v29  ;;  %2584 = vmatprep.subr.bf16.mxu1 %v2583_v41  ;;  %v1137_v8 = vand.u32 4294901760, %v1136_v0 }
  0xed   :  { %v2587_v9 = vpack.c.bf16 %v1315_v45, %v1308_v51  ;;  %v1322_v11 = vand.u32 4294901760, %v1321_v1  ;;  %v1329_v22 = vand.u32 4294901760, %v1328_v59  ;;  %928 = vmatmul.mubr.f32.vlgmr.msra.gmra.mrb[4].mxu0 %v3331_v2  ;;  %v4427_v18 = vand.u32 4294901760, %v3553_v52 }
  0xee   :  { %v1335_v40 = vsub.f32 %v3793_v5, %v4425_v26  ;;  %v1342_v12 = vsub.f32 %v3798_v29, %v4426_v6  ;;  %v4428_v23 = vand.u32 4294901760, %v3580_v31  ;;  %2546 = vmatpush3.bf16.msra.mxu0 %v3840_v24  ;;  %1138 = vmatprep.mubr.f32.mxu0 %v1137_v8  ;;  %v1210_v26 = vand.u32 4294901760, %v1209_v55 }
  0xef   :  { %v1217_v27 = vand.u32 4294901760, %v1216_v36  ;;  %v4429_v6 = vand.u32 4294901760, %v3398_v42  ;;  %v4430_v51 = vand.u32 4294901760, %v3403_v17  ;;  %2586 = vmatpush3.bf16.msra.mxu1 %v2585_v43  ;;  %2548 = vmatprep.subr.bf16.mxu0 %v3847_v46  ;;  %v2589_v2 = vpack.c.bf16 %v1203_v38, %v1196_v60 }
  0xf0   :  { %v3867_v35 = vpack.c.bf16 %v4428_v23, %v4427_v18  ;;  %v4431_v52 = vand.u32 4294901760, %v3592_v28  ;;  %v4432_v31 = vand.u32 4294901760, %v3594_v32  ;;  %v1336_v1 = vand.u32 4294901760, %v1335_v40  ;;  %2588 = vmatprep.subr.bf16.mxu1 %v2587_v9 }
  0xf1   :  { %v1223_v41 = vsub.f32 %v3398_v42, %v4429_v6  ;;  %v1230_v0 = vsub.f32 %v3403_v17, %v4430_v51  ;;  %v1343_v59 = vand.u32 4294901760, %v1342_v12  ;;  %v2591_v55 = vpack.c.bf16 %v1329_v22, %v1322_v11 }
  0xf2   :  { %v3881_v45 = vpack.c.bf16 %v4432_v31, %v4431_v52  ;;  %v4433_v36 = vand.u32 4294901760, %v3420_v61  ;;  %v4434_v18 = vand.u32 4294901760, %v3425_v53  ;;  %v4435_v60 = vand.u32 4294901760, %v3622_v50  ;;  %2550 = vmatpush3.bf16.msra.mxu0 %v3867_v35 }
  0xf3   :  { %v4436_v28 = vand.u32 4294901760, %v3632_v63  ;;  %v2593_v32 = vpack.c.bf16 %v1217_v27, %v1210_v26  ;;  %v4437_v40 = vand.u32 4294901760, %v3634_v62  ;;  %v4438_v12 = vand.u32 4294901760, %v3654_v58  ;;  %2590 = vmatpush3.bf16.msra.mxu1 %v2589_v2 }
  0xf4   :  { %v1349_v8 = vsub.f32 %v3420_v61, %v4433_v36  ;;  %v1356_v43 = vsub.f32 %v3425_v53, %v4434_v18  ;;  %v1224_v11 = vand.u32 4294901760, %v1223_v41  ;;  %v1231_v22 = vand.u32 4294901760, %v1230_v0  ;;  %2552 = vmatprep.subr.bf16.mxu0 %v3881_v45  ;;  %2592 = vmatprep.subr.bf16.mxu1 %v2591_v55 }
  0xf5   :  { %v3893_v38 = vpack.c.bf16 %v4436_v28, %v4435_v60  ;;  %v3900_v9 = vpack.c.bf16 %v4438_v12, %v4437_v40  ;;  %v2595_v23 = vpack.c.bf16 %v1343_v59, %v1336_v1  ;;  %v4439_v50 = vand.u32 4294901760, %v3442_v47 }
  0xf6   :  { %v4440_v6 = vand.u32 4294901760, %v3447_v54  ;;  %v1350_v62 = vand.u32 4294901760, %v1349_v8  ;;  %v1357_v26 = vand.u32 4294901760, %v1356_v43  ;;  %v4441_v58 = vand.u32 4294901760, %v3452_v13 }
  0xf7   :  { %v1237_v63 = vsub.f32 %v3442_v47, %v4439_v50  ;;  %v4442_v51 = vand.u32 4294901760, %v3457_v7  ;;  %2554 = vmatpush3.bf16.msra.mxu0 %v3893_v38  ;;  %v4443_v2 = vand.u32 4294901760, %v3669_v4  ;;  %v4444_v52 = vand.u32 4294901760, %v3671_v34  ;;  %2594 = vmatpush3.bf16.msra.mxu1 %v2593_v32  ;;  %v4453_v50 = vld [vmem:[#allocation29_spill] sm:$0xff] }
  0xf8   :  { %v1244_v27 = vsub.f32 %v3447_v54, %v4440_v6  ;;  %v1363_v41 = vsub.f32 %v3452_v13, %v4441_v58  ;;  %v2597_v1 = vpack.c.bf16 %v1231_v22, %v1224_v11  ;;  %v4445_v59 = vand.u32 4294901760, %v3680_v49  ;;  %2556 = vmatprep.subr.bf16.mxu0 %v3900_v9  ;;  %2596 = vmatprep.subr.bf16.mxu1 %v2595_v23  ;;  %v4451_v11 = vld [vmem:[#allocation28_spill] sm:$0xff] }
  0xf9   :  { %v1370_v0 = vsub.f32 %v3457_v7, %v4442_v51  ;;  %v3920_v31 = vpack.c.bf16 %v4444_v52, %v4443_v2  ;;  %v4446_v55 = vand.u32 4294901760, %v3682_v3  ;;  %v1238_v8 = vand.u32 4294901760, %v1237_v63  ;;  %v4458_v51 = vld [vmem:[#allocation41_spill] sm:$0xff] }
  0xfa   :  { %v1245_v18 = vand.u32 4294901760, %v1244_v27  ;;  %v4447_v43 = vand.u32 4294901760, %v3474_v15  ;;  %v4448_v34 = vand.u32 4294901760, %v3479_v20  ;;  %v2599_v28 = vpack.c.bf16 %v1357_v26, %v1350_v62  ;;  %v4455_v27 = vld [vmem:[#allocation39_spill] sm:$0xff] }
  0xfb   :  { %v3926_v36 = vpack.c.bf16 %v4446_v55, %v4445_v59  ;;  %v1364_v49 = vand.u32 4294901760, %v1363_v41  ;;  %v1371_v40 = vand.u32 4294901760, %v1370_v0  ;;  %2558 = vmatpush3.bf16.msra.mxu0 %v3920_v31  ;;  %v4449_v3 = vand.u32 4294901760, %v3705_v48  ;;  %2598 = vmatpush3.bf16.msra.mxu1 %v2597_v1  ;;  %v4460_v59 = vld [vmem:[#allocation11_spill] sm:$0xff] }
  0xfc   :  { %v1251_v4 = vsub.f32 %v3474_v15, %v4447_v43  ;;  %v1258_v60 = vsub.f32 %v3479_v20, %v4448_v34  ;;  %v4450_v32 = vand.u32 4294901760, %v3707_v19  ;;  %v4452_v22 = vand.u32 4294901760, %v4451_v11  ;;  %2600 = vmatprep.subr.bf16.mxu1 %v2599_v28  ;;  %v4456_v19 = vld [vmem:[#allocation40_spill] sm:$0xff]  ;;  %v4470_v11 = vld [vmem:[#allocation45_spill] sm:$0xff] }
  0xfd   :  { %v4454_v63 = vand.u32 4294901760, %v4453_v50  ;;  %v3949_v58 = vand.u32 4294901760, %v4455_v27  ;;  %2560 = vmatprep.subr.bf16.mxu0 %v3926_v36  ;;  %v2601_v23 = vpack.c.bf16 %v1245_v18, %v1238_v8  ;;  %v2603_v48 = vpack.c.bf16 %v1371_v40, %v1364_v49  ;;  %v4462_v8 = vld [vmem:[#allocation42_spill] sm:$0xff] }
  0xfe   :  { %v3940_v12 = vpack.c.bf16 %v4450_v32, %v4449_v3  ;;  %v1252_v62 = vand.u32 4294901760, %v1251_v4  ;;  %v1259_v26 = vand.u32 4294901760, %v1258_v60  ;;  %v4457_v41 = vand.u32 4294901760, %v4456_v19  ;;  %v4464_v4 = vld [vmem:[#allocation14_spill] sm:$0xff]  ;;  %v4466_v60 = vld [vmem:[#allocation43_spill] sm:$0xff]  ;;  %v4468_v3 = vld [vmem:[#allocation44_spill] sm:$0xff] }
  0xff   :  { %v3946_v6 = vpack.c.bf16 %v4454_v63, %v4452_v22  ;;  %v4459_v0 = vand.u32 4294901760, %v4458_v51  ;;  %v3961_v52 = vsub.f32 %v4455_v27, %v3949_v58  ;;  %2602 = vmatpush3.bf16.msra.mxu1 %v2601_v23  ;;  %v4461_v55 = vand.u32 4294901760, %v4460_v59  ;;  %v4472_v63 = vld [vmem:[#allocation17_spill] sm:$0xff]  ;;  %v4474_v23 = vld [vmem:[#allocation46_spill] sm:$0xff]  ;;  %v4478_v51 = vld [vmem:[#allocation8_spill] sm:$0xff] }
 0x100   :  { %2562 = vmatpush3.bf16.msra.mxu0 %v3940_v12  ;;  %v2605_v1 = vpack.c.bf16 %v1259_v26, %v1252_v62  ;;  %v4463_v18 = vand.u32 4294901760, %v4462_v8  ;;  %2604 = vmatprep.subr.bf16.mxu1 %v2603_v48  ;;  %v4465_v34 = vand.u32 4294901760, %v4464_v4  ;;  %v4467_v28 = vand.u32 4294901760, %v4466_v60  ;;  %v4480_v59 = vld [vmem:[#allocation15_spill] sm:$0xff]  ;;  %v4482_v4 = vld [vmem:[#allocation18_spill] sm:$0xff]  ;;  %v4483_v60 = vld [vmem:[#allocation21_spill] sm:$0xff] }
 0x101   :  { %v3957_v2 = vpack.c.bf16 %v4459_v0, %v4457_v41  ;;  %2564 = vmatprep.subr.bf16.mxu0 %v3946_v6  ;;  %v1141_v40 = vand.u32 4294901760, %v3961_v52  ;;  %v4469_v32 = vand.u32 4294901760, %v4468_v3  ;;  %v4471_v22 = vand.u32 4294901760, %v4470_v11  ;;  %v4477_v41 = vld [vmem:[#allocation12_spill] sm:$0xff] }
 0x102   :  { %v3968_v43 = vpack.c.bf16 %v4463_v18, %v4461_v55  ;;  %v3975_v49 = vpack.c.bf16 %v4467_v28, %v4465_v34  ;;  %v4473_v27 = vand.u32 4294901760, %v4472_v63  ;;  %v4475_v62 = vand.u32 4294901760, %v4474_v23  ;;  %v4481_v18 = vld [vmem:[#allocation19_spill] sm:$0xff]  ;;  %v4484_v28 = vld [vmem:[#allocation20_spill] sm:$0xff]  ;;  %v4487_v63 = vld [vmem:[#allocation25_spill] sm:$0xff] }
 0x103   :  { %2606 = vmatpush3.bf16.msra.mxu1 %v2605_v1  ;;  %v3984_v50 = vpack.c.bf16 %v4471_v22, %v4469_v32  ;;  %v4476_v48 = vand.u32 4294901760, %v3752_v21  ;;  %v1142_v19 = vsub.f32 %v3961_v52, %v1141_v40  ;;  %v2607_v0 = vpack.c.bf16 %v4478_v51, %v4477_v41  ;;  %v4479_v1 = vld [vmem:[#allocation16_spill] sm:$0xff]  ;;  %v4485_v32 = vld [vmem:[#allocation23_spill] sm:$0xff] }
 0x104   :  { %2566 = vmatpush3.bf16.msra.mxu0 %v3957_v2  ;;  %2640 = vmatprep.subr.bf16.mxu1 %v3810_v14  ;;  %v3992_v26 = vpack.c.bf16 %v4475_v62, %v4473_v27  ;;  %v2609_v55 = vpack.c.bf16 %v4480_v59, %v4479_v1  ;;  %v2611_v34 = vpack.c.bf16 %v4482_v4, %v4481_v18  ;;  %v4486_v11 = vld [vmem:[#allocation24_spill] sm:$0xff]  ;;  %v4488_v27 = vld [vmem:[#allocation26_spill] sm:$0xff]  ;;  %v4489_v62 = vld [vmem:[#allocation27_spill] sm:$0xff] }
 0x105   :  { %2568 = vmatprep.subr.bf16.mxu0 %v3968_v43  ;;  %v1143_v8 = vand.u32 4294901760, %v1142_v19  ;;  %v2613_v3 = vpack.c.bf16 %v4484_v28, %v4483_v60  ;;  %v2615_v22 = vpack.c.bf16 %v4486_v11, %v4485_v32  ;;  %v2617_v23 = vpack.c.bf16 %v4488_v27, %v4487_v63 }
 0x106   :  { %1376 = vmatmul.mubr.f32.vlgmr.msra.gmra.mrb[6].mxu1 %v3949_v58  ;;  %v2623_v19 = vpack.c.bf16 %v3764_v30, %v3759_v44  ;;  %v4510_v30 = vld [vmem:[#allocation47_spill] sm:$0xff] }
 0x107   :  { %2642 = vmatpush3.bf16.msra.mxu1 %v3840_v24  ;;  %1618 = vmatprep.mubr.f32.mxu1 %v4476_v48  ;;  %v2621_v48 = vpack.c.bf16 %v3746_v37, %v3741_v10 }
 0x108   :  { %2570 = vmatpush3.bf16.msra.mxu0 %v3975_v49  ;;  %2644 = vmatprep.subr.bf16.mxu1 %v3847_v46 }
 0x109   :  { %2572 = vmatprep.subr.bf16.mxu0 %v3984_v50 }
 0x10b   :  { %2646 = vmatpush3.bf16.msra.mxu1 %v3867_v35 }
 0x10c   :  { %2574 = vmatpush3.bf16.msra.mxu0 %v3992_v26  ;;  %2648 = vmatprep.subr.bf16.mxu1 %v3881_v45 }
 0x10d   :  { %2608 = vmatprep.subr.bf16.mxu0 %v2607_v0  ;;  %v2625_v0 = vpack.c.bf16 %v3784_v33, %v3779_v25  ;;  %v4514_v25 = vld [vmem:[#allocation13_spill] sm:$0xff] }
 0x10f   :  { %1144 = vmatmul.mubr.f32.vlgmr.msra.gmra.mrb[6].mxu0 %v1143_v8  ;;  %2650 = vmatpush3.bf16.msra.mxu1 %v3893_v38  ;;  %v2629_v8 = vpack.c.bf16 %v3403_v17, %v3398_v42  ;;  %v2635_v42 = vpack.c.bf16 %v3457_v7, %v3452_v13  ;;  %v2637_v17 = vpack.c.bf16 %v3479_v20, %v3474_v15  ;;  %v4494_v7 = vand.u32 4294901760, %v4481_v18 }
 0x110   :  { %2610 = vmatpush3.bf16.msra.mxu0 %v2609_v55  ;;  %1511 = vmatprep.mubr.f32.mxu0 %v3752_v21  ;;  %v2619_v21 = vpack.c.bf16 %v3716_v56, %v4489_v62  ;;  %v2627_v55 = vpack.c.bf16 %v3798_v29, %v3793_v5  ;;  %v4495_v15 = vand.u32 4294901760, %v4482_v4  ;;  %v4504_v18 = vand.u32 4294901760, %v3741_v10 }
 0x111   :  { %2612 = vmatprep.subr.bf16.mxu0 %v2611_v34  ;;  %2652 = vmatprep.subr.bf16.mxu1 %v3900_v9  ;;  %v2631_v34 = vpack.c.bf16 %v3425_v53, %v3420_v61  ;;  %v4490_v61 = vand.u32 4294901760, %v4477_v41  ;;  %v4491_v53 = vand.u32 4294901760, %v4478_v51  ;;  %v4499_v41 = vand.u32 4294901760, %v4486_v11 }
 0x112   :  { %v2675_v20 = vpack.c.bf16 %v4495_v15, %v4494_v7  ;;  %v4508_v10 = vand.u32 4294901760, %v3793_v5  ;;  %v4512_v5 = vld [vmem:[#allocation9_spill] sm:$0xff] }
 0x113   :  { %2654 = vmatpush3.bf16.msra.mxu1 %v3920_v31 }
 0x114   :  { %2614 = vmatpush3.bf16.msra.mxu0 %v2613_v3  ;;  %2656 = vmatprep.subr.bf16.mxu1 %v3926_v36  ;;  %v2633_v3 = vpack.c.bf16 %v3447_v54, %v3442_v47  ;;  %v2671_v47 = vpack.c.bf16 %v4491_v53, %v4490_v61  ;;  %v4493_v54 = vand.u32 4294901760, %v4480_v59 }
 0x115   :  { %2616 = vmatprep.subr.bf16.mxu0 %v2615_v22 }
 0x117   :  { %2658 = vmatpush3.bf16.msra.mxu1 %v3940_v12 }
 0x118   :  { %2618 = vmatpush3.bf16.msra.mxu0 %v2617_v23  ;;  %2660 = vmatprep.subr.bf16.mxu1 %v3946_v6 }
 0x119   :  { %2620 = vmatprep.subr.bf16.mxu0 %v2619_v21 }
 0x11b   :  { %2662 = vmatpush3.bf16.msra.mxu1 %v3957_v2 }
 0x11c   :  { %2622 = vmatpush3.bf16.msra.mxu0 %v2621_v48  ;;  %2664 = vmatprep.subr.bf16.mxu1 %v3968_v43 }
 0x11d   :  { %2624 = vmatprep.subr.bf16.mxu0 %v2623_v19 }
 0x11f   :  { %2666 = vmatpush3.bf16.msra.mxu1 %v3975_v49 }
 0x120   :  { %2626 = vmatpush3.bf16.msra.mxu0 %v2625_v0  ;;  %2668 = vmatprep.subr.bf16.mxu1 %v3984_v50 }
 0x121   :  { %2628 = vmatprep.subr.bf16.mxu0 %v2627_v55 }
 0x123   :  { %2670 = vmatpush3.bf16.msra.mxu1 %v3992_v26 }
 0x124   :  { %2630 = vmatpush3.bf16.msra.mxu0 %v2629_v8  ;;  %2704 = vmatprep.subr.bf16.mxu1 %v3810_v14  ;;  %v4492_v14 = vand.u32 4294901760, %v4479_v1  ;;  %v4502_v1 = vand.u32 4294901760, %v4489_v62 }
 0x125   :  { %2632 = vmatprep.subr.bf16.mxu0 %v2631_v34 }
 0x126   :  { %1622 = vmatmul.mubr.f32.vlgmr.msra.gmra.mrb[8].mxu1 %v1141_v40  ;;  %v2673_v13 = vpack.c.bf16 %v4493_v54, %v4492_v14 }
 0x127   :  { %2706 = vmatpush3.bf16.msra.mxu1 %v3840_v24  ;;  %1892 = vmatprep.mubr.f32.mxu1 %v3710_v16  ;;  %v4497_v24 = vand.u32 4294901760, %v4484_v28 }
 0x128   :  { %2634 = vmatpush3.bf16.msra.mxu0 %v2633_v3  ;;  %2708 = vmatprep.subr.bf16.mxu1 %v3847_v46  ;;  %v4496_v46 = vand.u32 4294901760, %v4483_v60  ;;  %v4506_v60 = vand.u32 4294901760, %v3759_v44  ;;  %v4511_v44 = vld [vmem:[#allocation10_spill] sm:$0xff] }
 0x129   :  { %2636 = vmatprep.subr.bf16.mxu0 %v2635_v42 }
 0x12a   :  { %v2677_v40 = vpack.c.bf16 %v4497_v24, %v4496_v46 }
 0x12b   :  { %2710 = vmatpush3.bf16.msra.mxu1 %v3867_v35  ;;  %v4498_v35 = vand.u32 4294901760, %v4485_v32 }
 0x12c   :  { %2638 = vmatpush3.bf16.msra.mxu0 %v2637_v17  ;;  %2712 = vmatprep.subr.bf16.mxu1 %v3881_v45  ;;  %v4500_v45 = vand.u32 4294901760, %v4487_v63 }
 0x12d   :  { %2672 = vmatprep.subr.bf16.mxu0 %v2671_v47  ;;  %v2679_v51 = vpack.c.bf16 %v4499_v41, %v4498_v35 }
 0x12f   :  { %1514 = vmatmul.mubr.f32.vlgmr.msra.gmra.mrb[8].mxu0 %v3961_v52  ;;  %2714 = vmatpush3.bf16.msra.mxu1 %v3893_v38  ;;  %v4503_v38 = vand.u32 4294901760, %v3716_v56  ;;  %v4507_v56 = vand.u32 4294901760, %v3784_v33 }
 0x130   :  { %2674 = vmatpush3.bf16.msra.mxu0 %v2673_v13  ;;  %1788 = vmatprep.mubr.f32.mxu0 %v3710_v16  ;;  %v4501_v16 = vand.u32 4294901760, %v4488_v27 }
 0x131   :  { %2676 = vmatprep.subr.bf16.mxu0 %v2675_v20  ;;  %2716 = vmatprep.subr.bf16.mxu1 %v3900_v9  ;;  %v2683_v59 = vpack.c.bf16 %v4503_v38, %v4502_v1  ;;  %v4505_v9 = vand.u32 4294901760, %v3746_v37  ;;  %v4509_v37 = vand.u32 4294901760, %v3798_v29  ;;  %v4513_v29 = vld [vmem:[#allocation22_spill] sm:$0xff] }
 0x132   :  { %v2681_v52 = vpack.c.bf16 %v4501_v16, %v4500_v45 }
 0x133   :  { %2718 = vmatpush3.bf16.msra.mxu1 %v3920_v31  ;;  %v2685_v4 = vpack.c.bf16 %v4505_v9, %v4504_v18  ;;  %v2687_v31 = vpack.c.bf16 %v1327_v39, %v4506_v60 }
 0x134   :  { %2678 = vmatpush3.bf16.msra.mxu0 %v2677_v40  ;;  %2720 = vmatprep.subr.bf16.mxu1 %v3926_v36  ;;  %v2689_v36 = vpack.c.bf16 %v4507_v56, %v1208_v57 }
 0x135   :  { %2680 = vmatprep.subr.bf16.mxu0 %v2679_v51 }
 0x137   :  { %2722 = vmatpush3.bf16.msra.mxu1 %v3940_v12  ;;  %v2691_v12 = vpack.c.bf16 %v4509_v37, %v4508_v10 }
 0x138   :  { %2682 = vmatpush3.bf16.msra.mxu0 %v2681_v52  ;;  %2724 = vmatprep.subr.bf16.mxu1 %v3946_v6 }
 0x139   :  { %2684 = vmatprep.subr.bf16.mxu0 %v2683_v59 }
 0x13b   :  { %2726 = vmatpush3.bf16.msra.mxu1 %v3957_v2 }
 0x13c   :  { %2686 = vmatpush3.bf16.msra.mxu0 %v2685_v4  ;;  %2728 = vmatprep.subr.bf16.mxu1 %v3968_v43 }
 0x13d   :  { %2688 = vmatprep.subr.bf16.mxu0 %v2687_v31 }
 0x13f   :  { %2730 = vmatpush3.bf16.msra.mxu1 %v3975_v49 }
 0x140   :  { %2690 = vmatpush3.bf16.msra.mxu0 %v2689_v36  ;;  %2732 = vmatprep.subr.bf16.mxu1 %v3984_v50 }
 0x141   :  { %2692 = vmatprep.subr.bf16.mxu0 %v2691_v12 }
 0x143   :  { %2734 = vmatpush3.bf16.msra.mxu1 %v3992_v26 }
 0x144   :  { %2694 = vmatpush3.bf16.msra.mxu0 %v4510_v30 }
 0x145   :  { %2696 = vmatprep.subr.bf16.mxu0 %v4511_v44 }
 0x146   :  { %1894 = vmatmul.mubr.f32.vlgmr.msra.gmra.mrb[10].mxu1 %v3949_v58 }
 0x148   :  { %2698 = vmatpush3.bf16.msra.mxu0 %v4512_v5 }
 0x149   :  { %2700 = vmatprep.subr.bf16.mxu0 %v4513_v29 }
 0x14c   :  { %2702 = vmatpush3.bf16.msra.mxu0 %v4514_v25 }
 0x14f   :  { %1790 = vmatmul.mubr.f32.vlgmr.msra.gmra.mrb[10].mxu0 %v3949_v58 }
 0x178   :  { %v1998_v33 = vpop.f32.mrb[0].mxu1 }
 0x179   :  { %v1999_v39 = vpop.f32.mrb[1].mxu1 }
 0x17a   :  { %v2000_v57 = vadd.f32 %v1999_v39, %v1998_v33 }
 0x180   :  { %v1963_v6 = vpop.f32.mrb[0].mxu0 }
 0x181   :  { %v1964_v2 = vpop.f32.mrb[1].mxu0 }
 0x182   :  { %v1965_v43 = vadd.f32 %v1964_v2, %v1963_v6 }
 0x184   :  { %v516_v49 = vadd.f32 %v2000_v57, %v1965_v43 }
 0x198   :  { %v2068_v50 = vpop.f32.mrb[2].mxu1 }
 0x199   :  { %v2069_v26 = vpop.f32.mrb[3].mxu1 }
 0x19a   :  { %v2070_v28 = vadd.f32 %v2069_v26, %v2068_v50 }
 0x1a0   :  { %v2033_v32 = vpop.f32.mrb[2].mxu0 }
 0x1a1   :  { %v2034_v11 = vpop.f32.mrb[3].mxu0 }
 0x1a2   :  { %v2035_v22 = vadd.f32 %v2034_v11, %v2033_v32 }
 0x1a4   :  { %v654_v63 = vadd.f32 %v2035_v22, %v516_v49 }
 0x1a6   :  { %v762_v27 = vadd.f32 %v2070_v28, %v654_v63 }
 0x1b9   :  { %v2138_v23 = vpop.f32.mrb[4].mxu1 }
 0x1ba   :  { %v2139_v62 = vpop.f32.mrb[5].mxu1 }
 0x1bb   :  { %v2140_v21 = vadd.f32 %v2139_v62, %v2138_v23 }
 0x1c0   :  { %v2103_v48 = vpop.f32.mrb[4].mxu0 }
 0x1c1   :  { %v2104_v58 = vpop.f32.mrb[5].mxu0 }
 0x1c2   :  { %v2105_v19 = vadd.f32 %v2104_v58, %v2103_v48 }
 0x1c4   :  { %v930_v0 = vadd.f32 %v2105_v19, %v762_v27 }
 0x1c6   :  { %v1034_v55 = vadd.f32 %v2140_v21, %v930_v0 }
 0x1d9   :  { %v2208_v8 = vpop.f32.mrb[6].mxu1 }
 0x1da   :  { %v2209_v34 = vpop.f32.mrb[7].mxu1 }
 0x1db   :  { %v2210_v3 = vadd.f32 %v2209_v34, %v2208_v8 }
 0x1e2   :  { %v2173_v42 = vpop.f32.mrb[6].mxu0 }
 0x1e3   :  { %v2174_v17 = vpop.f32.mrb[7].mxu0 }
 0x1e4   :  { %v2175_v61 = vadd.f32 %v2174_v17, %v2173_v42 }
 0x1e6   :  { %v1146_v53 = vadd.f32 %v2175_v61, %v1034_v55 }
 0x1e8   :  { %v1378_v47 = vadd.f32 %v2210_v3, %v1146_v53 }
 0x1f9   :  { %v2278_v14 = vpop.f32.mrb[8].mxu1 }
 0x1fa   :  { %v2279_v54 = vpop.f32.mrb[9].mxu1 }
 0x1fb   :  { %v2280_v13 = vadd.f32 %v2279_v54, %v2278_v14 }
 0x202   :  { %v2243_v7 = vpop.f32.mrb[8].mxu0 }
 0x203   :  { %v2244_v15 = vpop.f32.mrb[9].mxu0 }
 0x204   :  { %v2245_v20 = vadd.f32 %v2244_v15, %v2243_v7 }
 0x206   :  { %v1516_v46 = vadd.f32 %v2245_v20, %v1378_v47 }
 0x208   :  { %v1624_v24 = vadd.f32 %v2280_v13, %v1516_v46 }
 0x219   :  { %v2348_v40 = vpop.f32.mrb[10].mxu1 }
 0x21a   :  { %v2349_v35 = vpop.f32.mrb[11].mxu1 }
 0x21b   :  { %v2350_v41 = vadd.f32 %v2349_v35, %v2348_v40 }
 0x222   :  { %v2313_v51 = vpop.f32.mrb[10].mxu0 }
 0x223   :  { %v2314_v45 = vpop.f32.mrb[11].mxu0 }
 0x224   :  { %v2315_v16 = vadd.f32 %v2314_v45, %v2313_v51 }
 0x226   :  { %v1792_v52 = vadd.f32 %v2315_v16, %v1624_v24 }
 0x228   :  { %v1896_v1 = vadd.f32 %v2350_v41, %v1792_v52 }
 0x22a   :  { %1899 = vst [vmem:[#allocation5] sm:$0xff] %v1896_v1 }
 0x22b   :  { %2782 = shalt.err (!%p2779_p12)
}
 0x22c   :  { %s2783_s28 = scalar_lea.hbm %s4131_s2, 128 }
 0x22d   :  { %p2784_p13 = scmp.ne.s32.totalorder %s4131_s2, %s2783_s28  ;;  %p2787_p0 = scmp.lt.u32.totalorder %s2783_s28, %s4131_s2 }
 0x22f   :  { %p2789_p1 = pnand %p2787_p0, %p2784_p13 }
 0x231   :  { %2792 = shalt.err (!%p2789_p1)
}
 0x232   :  { %1909 = dma.vmem_to_hbm [thread:$0]  %s1907_s1, 128, %s4131_s2, [#allocation4]  }
 0x233   :  { %2795 = dma.done.wait [#allocation4], 128  }
 0x234   :  { %2796 = vsyncadd [#allocation4], 4294967168 }
 0x235   :  { %1913 = vsyncpa [#allocation3], 1 }
 0x236   :  { %1914 = vsyncpa [#allocation4], 1 }

</bundles_post_ra>
